<compile_context>
chip_gen: v7x
topology: tpu7x:2x2x1
jax: 0.10.0
libtpu: 0.0.40
codegen_flags: <defaults>
</compile_context>

<pallas_src>
import math

import jax
import jax.numpy as jnp
from jax.experimental import pallas as pl
from jax.experimental.pallas import tpu as pltpu  # noqa: F401  (TPU backend assumed)

# small, module-consistent shapes
BATCH = 2
SEQ = 4
HEAD = 8                 # reference: head = 8, mask = zeros(8, 4, 4)
D_K = 8
D_MODEL = HEAD * D_K     # 64 (scaled-down d_model)
D_FF = 64                # reference: d_ff = 64
N_LAYERS = 2
BL = BATCH * SEQ         # 8 rows -> exactly one sublane group

LN_EPS = 1e6             # LayerNorm default eps in the reference module
NEG_INF = -1.0e9         # masked_fill value (in-batch masked positions)
CROSS_NEG = -2.0e9       # cross-batch positions: strictly more negative so exp -> 0 exactly
ATTN_SCALE = 1.0 / math.sqrt(D_K)


# ----------------------------- kernel helpers ------------------------------

def _layernorm(x, a2, b2):
    # torch: mean over last dim, unbiased std (N-1), a2*(x-mean)/(std+eps)+b2
    mean = jnp.mean(x, axis=-1, keepdims=True)
    diff = x - mean
    var = jnp.sum(diff * diff, axis=-1, keepdims=True) * (1.0 / (D_MODEL - 1))
    std = jnp.sqrt(var)
    inv = pl.reciprocal(std + LN_EPS, approx=True)      # divide -> EUP reciprocal
    return a2 * diff * inv + b2


# ------------------------------ Pallas kernel -------------------------------

def encoder_kernel(x_ref, keep_ref, fill_ref,
                   ln1a_ref, ln1b_ref, wqkv_ref, bqkv_ref, wo_ref, bo_ref,
                   ln2a_ref, ln2b_ref, w1_ref, b1_ref, w2_ref, b2_ref,
                   fna_ref, fnb_ref, o_ref):
    """Whole encoder forward for the whole (flattened) batch in one kernel."""
    x = x_ref[...]                                      # (B*L, D), stays resident

    # hoisted once per kernel (identical for every layer):
    fill = fill_ref[...]                                # (B*L, B*L): -1e9 in-batch, -2e9 cross-batch
    keeps = [keep_ref[h] != 0.0 for h in range(HEAD)]   # per-head keep masks (bool)

    for l in range(N_LAYERS):                           # static unrolled layer loop
        # ---- sublayer 1: x + MultiHeadAttention(LayerNorm(x)) ----
        xn = _layernorm(x, ln1a_ref[l], ln1b_ref[l])
        # fused Q/K/V projection: one (B*L, D) @ (D, 3D) MXU push
        qkv = jnp.dot(xn, wqkv_ref[l], preferred_element_type=jnp.float32) + bqkv_ref[l]
        wo_l = wo_ref[l]                                # (D, D)
        attn = jnp.zeros_like(x)
        for h in range(HEAD):                           # static loop, masks hoisted above
            qh = qkv[:, h * D_K:(h + 1) * D_K]
            kh = qkv[:, D_MODEL + h * D_K:D_MODEL + (h + 1) * D_K]
            vh = qkv[:, 2 * D_MODEL + h * D_K:2 * D_MODEL + (h + 1) * D_K]
            # scores over the flattened batch; block-diagonal fill keeps batches separate
            s = jax.lax.dot_general(qh, kh, (((1,), (1,)), ((), ())),
                                    preferred_element_type=jnp.float32) * ATTN_SCALE
            s = jnp.where(keeps[h], s, fill)            # masked_fill semantics (replace)
            s = s - jnp.max(s, axis=-1, keepdims=True)  # XLU lane reduce
            e = jnp.exp(s)                              # EUP
            p = e * pl.reciprocal(jnp.sum(e, axis=-1, keepdims=True), approx=True)
            oh = jnp.dot(p, vh, preferred_element_type=jnp.float32)        # (B*L, D_K)
            # per-head accumulation into the output projection (no lane concat)
            attn = attn + jnp.dot(oh, wo_l[h * D_K:(h + 1) * D_K, :],
                                  preferred_element_type=jnp.float32)
        x = x + attn + bo_ref[l]                        # residual (dropout = identity)

        # ---- sublayer 2: x + W2(relu(W1(LayerNorm(x)))) ----
        xn = _layernorm(x, ln2a_ref[l], ln2b_ref[l])
        hdn = jnp.dot(xn, w1_ref[l], preferred_element_type=jnp.float32) + b1_ref[l]
        hdn = jnp.maximum(hdn, 0.0)
        x = x + jnp.dot(hdn, w2_ref[l], preferred_element_type=jnp.float32) + b2_ref[l]

    # final encoder LayerNorm
    o_ref[...] = _layernorm(x, fna_ref[...], fnb_ref[...])


# ------------------------------ call wrapper --------------------------------

def encoder_forward(x, mask, params):
    """Encoder.forward: N layers (self-attn + ffn sublayers), then LayerNorm."""
    B, L, D = x.shape
    # layout plumbing outside the kernel: flatten batch into sublanes and
    # pre-bake the per-head block-diagonal keep/fill masks ONCE.
    x2 = x.reshape(B * L, D)
    same = jnp.kron(jnp.eye(B, dtype=jnp.float32), jnp.ones((L, L), jnp.float32))  # (BL, BL)
    keep = jnp.tile((mask != 0).astype(jnp.float32), (1, B, B)) * same[None]       # (H, BL, BL)
    fill = jnp.where(same > 0, NEG_INF, CROSS_NEG).astype(jnp.float32)             # (BL, BL)

    out2 = pl.pallas_call(
        encoder_kernel,
        out_shape=jax.ShapeDtypeStruct((B * L, D), jnp.float32),
    )(x2, keep, fill, *params)
    return out2.reshape(B, L, D)


# ------------------------------- parameters ---------------------------------

def init_params(key):
    ks = jax.random.split(key, 6)

    def lin(k, din, dout):
        k1, k2 = jax.random.split(k)
        # stored as (in, out) so the kernel computes y = x @ W + b
        w = jax.random.normal(k1, (din, dout), jnp.float32) * 0.1
        b = jax.random.normal(k2, (1, dout), jnp.float32) * 0.1
        return w, b

    wq, bq = lin(ks[0], D_MODEL, D_MODEL)
    wk, bk = lin(ks[1], D_MODEL, D_MODEL)
    wv, bv = lin(ks[2], D_MODEL, D_MODEL)
    wo, bo = lin(ks[3], D_MODEL, D_MODEL)
    w1, b1 = lin(ks[4], D_MODEL, D_FF)
    w2, b2 = lin(ks[5], D_FF, D_MODEL)

    ones = jnp.ones((1, D_MODEL), jnp.float32)
    zeros = jnp.zeros((1, D_MODEL), jnp.float32)

    # fused QKV projection (host-side concat = layout plumbing, not compute)
    wqkv = jnp.concatenate([wq, wk, wv], axis=1)        # (D, 3D)
    bqkv = jnp.concatenate([bq, bk, bv], axis=1)        # (1, 3D)

    def stack(p):
        # clones(layer, N): all N layers share identical initial parameters
        return jnp.stack([p] * N_LAYERS, axis=0)

    params = (
        stack(ones), stack(zeros),       # attn-sublayer LayerNorm a2 / b2
        stack(wqkv), stack(bqkv),        # fused QKV projection
        stack(wo), stack(bo),            # attention output projection
        stack(ones), stack(zeros),       # ffn-sublayer LayerNorm a2 / b2
        stack(w1), stack(b1),            # FFN W1
        stack(w2), stack(b2),            # FFN W2
        ones, zeros,                     # final encoder LayerNorm a2 / b2
    )
    return params


# ---------------------------------- main -------------------------------------

if __name__ == "__main__":
    key = jax.random.PRNGKey(0)
    k_x, k_p = jax.random.split(key)

    x = jax.random.normal(k_x, (BATCH, SEQ, D_MODEL), jnp.float32)
    # like Variable(torch.zeros(8, 4, 4)) in the reference: an all-zero mask
    # (everything masked -> uniform attention), shape (head, L, L)
    mask = jnp.zeros((HEAD, SEQ, SEQ), jnp.float32)

    params = init_params(k_p)

    out = jax.jit(encoder_forward)(x, mask, params)
    out = jax.block_until_ready(out)
    assert out.shape == (BATCH, SEQ, D_MODEL)
    assert bool(jnp.all(jnp.isfinite(out)))
    print("KERNEL_OK")
</pallas_src>

<mosaic_0001>
module attributes {stable_mosaic.version = 11 : i64} {
  func.func @encoder_kernel(%arg0: memref<8x64xf32, #tpu.memory_space<vmem>>, %arg1: memref<8x8x8xf32, #tpu.memory_space<vmem>>, %arg2: memref<8x8xf32, #tpu.memory_space<vmem>>, %arg3: memref<2x1x64xf32, #tpu.memory_space<vmem>>, %arg4: memref<2x1x64xf32, #tpu.memory_space<vmem>>, %arg5: memref<2x64x192xf32, #tpu.memory_space<vmem>>, %arg6: memref<2x1x192xf32, #tpu.memory_space<vmem>>, %arg7: memref<2x64x64xf32, #tpu.memory_space<vmem>>, %arg8: memref<2x1x64xf32, #tpu.memory_space<vmem>>, %arg9: memref<2x1x64xf32, #tpu.memory_space<vmem>>, %arg10: memref<2x1x64xf32, #tpu.memory_space<vmem>>, %arg11: memref<2x64x64xf32, #tpu.memory_space<vmem>>, %arg12: memref<2x1x64xf32, #tpu.memory_space<vmem>>, %arg13: memref<2x64x64xf32, #tpu.memory_space<vmem>>, %arg14: memref<2x1x64xf32, #tpu.memory_space<vmem>>, %arg15: memref<1x64xf32, #tpu.memory_space<vmem>>, %arg16: memref<1x64xf32, #tpu.memory_space<vmem>>, %arg17: memref<8x64xf32, #tpu.memory_space<vmem>>) attributes {dimension_semantics = [], scalar_prefetch = 0 : i64, scratch_operands = 0 : i64, tpu.core_type = #tpu.core_type<tc>} {
    %c0 = arith.constant 0 : index
    %c0_0 = arith.constant 0 : index
    %0 = vector.load %arg0[%c0, %c0_0] : memref<8x64xf32, #tpu.memory_space<vmem>>, vector<8x64xf32>
    %c0_1 = arith.constant 0 : index
    %c0_2 = arith.constant 0 : index
    %1 = vector.load %arg2[%c0_1, %c0_2] : memref<8x8xf32, #tpu.memory_space<vmem>>, vector<8x8xf32>
    %c0_3 = arith.constant 0 : index
    %c0_4 = arith.constant 0 : index
    %c0_5 = arith.constant 0 : index
    %2 = vector.load %arg1[%c0_3, %c0_4, %c0_5] : memref<8x8x8xf32, #tpu.memory_space<vmem>>, vector<1x8x8xf32>
    %3 = vector.shape_cast %2 : vector<1x8x8xf32> to vector<8x8xf32>
    %cst = arith.constant 0.000000e+00 : f32
    %4 = vector.broadcast %cst : f32 to vector<8x8xf32>
    %5 = arith.cmpf one, %3, %4 : vector<8x8xf32>
    %c1 = arith.constant 1 : index
    %c0_6 = arith.constant 0 : index
    %c0_7 = arith.constant 0 : index
    %6 = vector.load %arg1[%c1, %c0_6, %c0_7] : memref<8x8x8xf32, #tpu.memory_space<vmem>>, vector<1x8x8xf32>
    %7 = vector.shape_cast %6 : vector<1x8x8xf32> to vector<8x8xf32>
    %cst_8 = arith.constant 0.000000e+00 : f32
    %8 = vector.broadcast %cst_8 : f32 to vector<8x8xf32>
    %9 = arith.cmpf one, %7, %8 : vector<8x8xf32>
    %c2 = arith.constant 2 : index
    %c0_9 = arith.constant 0 : index
    %c0_10 = arith.constant 0 : index
    %10 = vector.load %arg1[%c2, %c0_9, %c0_10] : memref<8x8x8xf32, #tpu.memory_space<vmem>>, vector<1x8x8xf32>
    %11 = vector.shape_cast %10 : vector<1x8x8xf32> to vector<8x8xf32>
    %cst_11 = arith.constant 0.000000e+00 : f32
    %12 = vector.broadcast %cst_11 : f32 to vector<8x8xf32>
    %13 = arith.cmpf one, %11, %12 : vector<8x8xf32>
    %c3 = arith.constant 3 : index
    %c0_12 = arith.constant 0 : index
    %c0_13 = arith.constant 0 : index
    %14 = vector.load %arg1[%c3, %c0_12, %c0_13] : memref<8x8x8xf32, #tpu.memory_space<vmem>>, vector<1x8x8xf32>
    %15 = vector.shape_cast %14 : vector<1x8x8xf32> to vector<8x8xf32>
    %cst_14 = arith.constant 0.000000e+00 : f32
    %16 = vector.broadcast %cst_14 : f32 to vector<8x8xf32>
    %17 = arith.cmpf one, %15, %16 : vector<8x8xf32>
    %c4 = arith.constant 4 : index
    %c0_15 = arith.constant 0 : index
    %c0_16 = arith.constant 0 : index
    %18 = vector.load %arg1[%c4, %c0_15, %c0_16] : memref<8x8x8xf32, #tpu.memory_space<vmem>>, vector<1x8x8xf32>
    %19 = vector.shape_cast %18 : vector<1x8x8xf32> to vector<8x8xf32>
    %cst_17 = arith.constant 0.000000e+00 : f32
    %20 = vector.broadcast %cst_17 : f32 to vector<8x8xf32>
    %21 = arith.cmpf one, %19, %20 : vector<8x8xf32>
    %c5 = arith.constant 5 : index
    %c0_18 = arith.constant 0 : index
    %c0_19 = arith.constant 0 : index
    %22 = vector.load %arg1[%c5, %c0_18, %c0_19] : memref<8x8x8xf32, #tpu.memory_space<vmem>>, vector<1x8x8xf32>
    %23 = vector.shape_cast %22 : vector<1x8x8xf32> to vector<8x8xf32>
    %cst_20 = arith.constant 0.000000e+00 : f32
    %24 = vector.broadcast %cst_20 : f32 to vector<8x8xf32>
    %25 = arith.cmpf one, %23, %24 : vector<8x8xf32>
    %c6 = arith.constant 6 : index
    %c0_21 = arith.constant 0 : index
    %c0_22 = arith.constant 0 : index
    %26 = vector.load %arg1[%c6, %c0_21, %c0_22] : memref<8x8x8xf32, #tpu.memory_space<vmem>>, vector<1x8x8xf32>
    %27 = vector.shape_cast %26 : vector<1x8x8xf32> to vector<8x8xf32>
    %cst_23 = arith.constant 0.000000e+00 : f32
    %28 = vector.broadcast %cst_23 : f32 to vector<8x8xf32>
    %29 = arith.cmpf one, %27, %28 : vector<8x8xf32>
    %c7 = arith.constant 7 : index
    %c0_24 = arith.constant 0 : index
    %c0_25 = arith.constant 0 : index
    %30 = vector.load %arg1[%c7, %c0_24, %c0_25] : memref<8x8x8xf32, #tpu.memory_space<vmem>>, vector<1x8x8xf32>
    %31 = vector.shape_cast %30 : vector<1x8x8xf32> to vector<8x8xf32>
    %cst_26 = arith.constant 0.000000e+00 : f32
    %32 = vector.broadcast %cst_26 : f32 to vector<8x8xf32>
    %33 = arith.cmpf one, %31, %32 : vector<8x8xf32>
    %c0_27 = arith.constant 0 : index
    %c0_28 = arith.constant 0 : index
    %c0_29 = arith.constant 0 : index
    %34 = vector.load %arg3[%c0_27, %c0_28, %c0_29] : memref<2x1x64xf32, #tpu.memory_space<vmem>>, vector<1x1x64xf32>
    %35 = vector.shape_cast %34 : vector<1x1x64xf32> to vector<1x64xf32>
    %c0_30 = arith.constant 0 : index
    %c0_31 = arith.constant 0 : index
    %c0_32 = arith.constant 0 : index
    %36 = vector.load %arg4[%c0_30, %c0_31, %c0_32] : memref<2x1x64xf32, #tpu.memory_space<vmem>>, vector<1x1x64xf32>
    %37 = vector.shape_cast %36 : vector<1x1x64xf32> to vector<1x64xf32>
    %cst_33 = arith.constant dense<0.000000e+00> : vector<8xf32>
    %38 = vector.multi_reduction <add>, %0, %cst_33 [1] : vector<8x64xf32> to vector<8xf32>
    %39 = vector.shape_cast %38 : vector<8xf32> to vector<8x1xf32>
    %cst_34 = arith.constant 6.400000e+01 : f32
    %40 = vector.broadcast %cst_34 : f32 to vector<8x1xf32>
    %41 = arith.divf %39, %40 : vector<8x1xf32>
    %42 = vector.broadcast %41 : vector<8x1xf32> to vector<8x64xf32>
    %43 = arith.subf %0, %42 : vector<8x64xf32>
    %44 = arith.mulf %43, %43 : vector<8x64xf32>
    %cst_35 = arith.constant dense<0.000000e+00> : vector<8xf32>
    %45 = vector.multi_reduction <add>, %44, %cst_35 [1] : vector<8x64xf32> to vector<8xf32>
    %46 = vector.shape_cast %45 : vector<8xf32> to vector<8x1xf32>
    %cst_36 = arith.constant 0.0158730168 : f32
    %47 = vector.broadcast %cst_36 : f32 to vector<8x1xf32>
    %48 = arith.mulf %46, %47 : vector<8x1xf32>
    %49 = math.sqrt %48 : vector<8x1xf32>
    %cst_37 = arith.constant 1.000000e+06 : f32
    %50 = vector.broadcast %cst_37 : f32 to vector<8x1xf32>
    %51 = arith.addf %49, %50 : vector<8x1xf32>
    %52 = tpu.reciprocal %51 {approx = true} : vector<8x1xf32> -> vector<8x1xf32>
    %53 = vector.broadcast %35 : vector<1x64xf32> to vector<8x64xf32>
    %54 = arith.mulf %53, %43 : vector<8x64xf32>
    %55 = vector.broadcast %52 : vector<8x1xf32> to vector<8x64xf32>
    %56 = arith.mulf %54, %55 : vector<8x64xf32>
    %57 = vector.broadcast %37 : vector<1x64xf32> to vector<8x64xf32>
    %58 = arith.addf %56, %57 : vector<8x64xf32>
    %c0_38 = arith.constant 0 : index
    %c0_39 = arith.constant 0 : index
    %c0_40 = arith.constant 0 : index
    %59 = vector.load %arg5[%c0_38, %c0_39, %c0_40] : memref<2x64x192xf32, #tpu.memory_space<vmem>>, vector<1x64x192xf32>
    %60 = vector.shape_cast %59 : vector<1x64x192xf32> to vector<64x192xf32>
    %cst_41 = arith.constant dense<0.000000e+00> : vector<8x192xf32>
    %61 = tpu.matmul %58, %60, %cst_41 {dimension_numbers = #tpu.dot_dimension_numbers<[1], [0], [0], [1], [0, 0, 1, 1], [], []>} : vector<8x64xf32>, vector<64x192xf32>, vector<8x192xf32> -> vector<8x192xf32>
    %c0_42 = arith.constant 0 : index
    %c0_43 = arith.constant 0 : index
    %c0_44 = arith.constant 0 : index
    %62 = vector.load %arg6[%c0_42, %c0_43, %c0_44] : memref<2x1x192xf32, #tpu.memory_space<vmem>>, vector<1x1x192xf32>
    %63 = vector.shape_cast %62 : vector<1x1x192xf32> to vector<1x192xf32>
    %64 = vector.broadcast %63 : vector<1x192xf32> to vector<8x192xf32>
    %65 = arith.addf %61, %64 : vector<8x192xf32>
    %c0_45 = arith.constant 0 : index
    %c0_46 = arith.constant 0 : index
    %c0_47 = arith.constant 0 : index
    %66 = vector.load %arg7[%c0_45, %c0_46, %c0_47] : memref<2x64x64xf32, #tpu.memory_space<vmem>>, vector<1x64x64xf32>
    %67 = vector.shape_cast %66 : vector<1x64x64xf32> to vector<64x64xf32>
    %cst_48 = arith.constant 0.000000e+00 : f32
    %68 = vector.broadcast %cst_48 : f32 to vector<8x64xf32>
    %69 = vector.extract_strided_slice %65 {offsets = [0, 0], sizes = [8, 8], strides = [1, 1]} : vector<8x192xf32> to vector<8x8xf32>
    %70 = vector.extract_strided_slice %65 {offsets = [0, 64], sizes = [8, 8], strides = [1, 1]} : vector<8x192xf32> to vector<8x8xf32>
    %71 = vector.extract_strided_slice %65 {offsets = [0, 128], sizes = [8, 8], strides = [1, 1]} : vector<8x192xf32> to vector<8x8xf32>
    %cst_49 = arith.constant dense<0.000000e+00> : vector<8x8xf32>
    %72 = tpu.matmul %69, %70, %cst_49 {dimension_numbers = #tpu.dot_dimension_numbers<[1], [1], [0], [0], [0, 0, 1, 0], [], []>} : vector<8x8xf32>, vector<8x8xf32>, vector<8x8xf32> -> vector<8x8xf32>
    %cst_50 = arith.constant 0.353553385 : f32
    %73 = vector.broadcast %cst_50 : f32 to vector<8x8xf32>
    %74 = arith.mulf %72, %73 : vector<8x8xf32>
    %75 = arith.select %5, %74, %1 : vector<8x8xi1>, vector<8x8xf32>
    %cst_51 = arith.constant dense<0xFF800000> : vector<8xf32>
    %76 = vector.multi_reduction <maximumf>, %75, %cst_51 [1] : vector<8x8xf32> to vector<8xf32>
    %77 = vector.shape_cast %76 : vector<8xf32> to vector<8x1xf32>
    %78 = vector.broadcast %77 : vector<8x1xf32> to vector<8x8xf32>
    %79 = arith.subf %75, %78 : vector<8x8xf32>
    %80 = math.exp %79 : vector<8x8xf32>
    %cst_52 = arith.constant dense<0.000000e+00> : vector<8xf32>
    %81 = vector.multi_reduction <add>, %80, %cst_52 [1] : vector<8x8xf32> to vector<8xf32>
    %82 = vector.shape_cast %81 : vector<8xf32> to vector<8x1xf32>
    %83 = tpu.reciprocal %82 {approx = true} : vector<8x1xf32> -> vector<8x1xf32>
    %84 = vector.broadcast %83 : vector<8x1xf32> to vector<8x8xf32>
    %85 = arith.mulf %80, %84 : vector<8x8xf32>
    %cst_53 = arith.constant dense<0.000000e+00> : vector<8x8xf32>
    %86 = tpu.matmul %85, %71, %cst_53 {dimension_numbers = #tpu.dot_dimension_numbers<[1], [0], [0], [1], [0, 0, 1, 1], [], []>} : vector<8x8xf32>, vector<8x8xf32>, vector<8x8xf32> -> vector<8x8xf32>
    %87 = vector.extract_strided_slice %67 {offsets = [0, 0], sizes = [8, 64], strides = [1, 1]} : vector<64x64xf32> to vector<8x64xf32>
    %cst_54 = arith.constant dense<0.000000e+00> : vector<8x64xf32>
    %88 = tpu.matmul %86, %87, %cst_54 {dimension_numbers = #tpu.dot_dimension_numbers<[1], [0], [0], [1], [0, 0, 1, 1], [], []>} : vector<8x8xf32>, vector<8x64xf32>, vector<8x64xf32> -> vector<8x64xf32>
    %89 = arith.addf %68, %88 : vector<8x64xf32>
    %90 = vector.extract_strided_slice %65 {offsets = [0, 8], sizes = [8, 8], strides = [1, 1]} : vector<8x192xf32> to vector<8x8xf32>
    %91 = vector.extract_strided_slice %65 {offsets = [0, 72], sizes = [8, 8], strides = [1, 1]} : vector<8x192xf32> to vector<8x8xf32>
    %92 = vector.extract_strided_slice %65 {offsets = [0, 136], sizes = [8, 8], strides = [1, 1]} : vector<8x192xf32> to vector<8x8xf32>
    %cst_55 = arith.constant dense<0.000000e+00> : vector<8x8xf32>
    %93 = tpu.matmul %90, %91, %cst_55 {dimension_numbers = #tpu.dot_dimension_numbers<[1], [1], [0], [0], [0, 0, 1, 0], [], []>} : vector<8x8xf32>, vector<8x8xf32>, vector<8x8xf32> -> vector<8x8xf32>
    %cst_56 = arith.constant 0.353553385 : f32
    %94 = vector.broadcast %cst_56 : f32 to vector<8x8xf32>
    %95 = arith.mulf %93, %94 : vector<8x8xf32>
    %96 = arith.select %9, %95, %1 : vector<8x8xi1>, vector<8x8xf32>
    %cst_57 = arith.constant dense<0xFF800000> : vector<8xf32>
    %97 = vector.multi_reduction <maximumf>, %96, %cst_57 [1] : vector<8x8xf32> to vector<8xf32>
    %98 = vector.shape_cast %97 : vector<8xf32> to vector<8x1xf32>
    %99 = vector.broadcast %98 : vector<8x1xf32> to vector<8x8xf32>
    %100 = arith.subf %96, %99 : vector<8x8xf32>
    %101 = math.exp %100 : vector<8x8xf32>
    %cst_58 = arith.constant dense<0.000000e+00> : vector<8xf32>
    %102 = vector.multi_reduction <add>, %101, %cst_58 [1] : vector<8x8xf32> to vector<8xf32>
    %103 = vector.shape_cast %102 : vector<8xf32> to vector<8x1xf32>
    %104 = tpu.reciprocal %103 {approx = true} : vector<8x1xf32> -> vector<8x1xf32>
    %105 = vector.broadcast %104 : vector<8x1xf32> to vector<8x8xf32>
    %106 = arith.mulf %101, %105 : vector<8x8xf32>
    %cst_59 = arith.constant dense<0.000000e+00> : vector<8x8xf32>
    %107 = tpu.matmul %106, %92, %cst_59 {dimension_numbers = #tpu.dot_dimension_numbers<[1], [0], [0], [1], [0, 0, 1, 1], [], []>} : vector<8x8xf32>, vector<8x8xf32>, vector<8x8xf32> -> vector<8x8xf32>
    %108 = vector.extract_strided_slice %67 {offsets = [8, 0], sizes = [8, 64], strides = [1, 1]} : vector<64x64xf32> to vector<8x64xf32>
    %cst_60 = arith.constant dense<0.000000e+00> : vector<8x64xf32>
    %109 = tpu.matmul %107, %108, %cst_60 {dimension_numbers = #tpu.dot_dimension_numbers<[1], [0], [0], [1], [0, 0, 1, 1], [], []>} : vector<8x8xf32>, vector<8x64xf32>, vector<8x64xf32> -> vector<8x64xf32>
    %110 = arith.addf %89, %109 : vector<8x64xf32>
    %111 = vector.extract_strided_slice %65 {offsets = [0, 16], sizes = [8, 8], strides = [1, 1]} : vector<8x192xf32> to vector<8x8xf32>
    %112 = vector.extract_strided_slice %65 {offsets = [0, 80], sizes = [8, 8], strides = [1, 1]} : vector<8x192xf32> to vector<8x8xf32>
    %113 = vector.extract_strided_slice %65 {offsets = [0, 144], sizes = [8, 8], strides = [1, 1]} : vector<8x192xf32> to vector<8x8xf32>
    %cst_61 = arith.constant dense<0.000000e+00> : vector<8x8xf32>
    %114 = tpu.matmul %111, %112, %cst_61 {dimension_numbers = #tpu.dot_dimension_numbers<[1], [1], [0], [0], [0, 0, 1, 0], [], []>} : vector<8x8xf32>, vector<8x8xf32>, vector<8x8xf32> -> vector<8x8xf32>
    %cst_62 = arith.constant 0.353553385 : f32
    %115 = vector.broadcast %cst_62 : f32 to vector<8x8xf32>
    %116 = arith.mulf %114, %115 : vector<8x8xf32>
    %117 = arith.select %13, %116, %1 : vector<8x8xi1>, vector<8x8xf32>
    %cst_63 = arith.constant dense<0xFF800000> : vector<8xf32>
    %118 = vector.multi_reduction <maximumf>, %117, %cst_63 [1] : vector<8x8xf32> to vector<8xf32>
    %119 = vector.shape_cast %118 : vector<8xf32> to vector<8x1xf32>
    %120 = vector.broadcast %119 : vector<8x1xf32> to vector<8x8xf32>
    %121 = arith.subf %117, %120 : vector<8x8xf32>
    %122 = math.exp %121 : vector<8x8xf32>
    %cst_64 = arith.constant dense<0.000000e+00> : vector<8xf32>
    %123 = vector.multi_reduction <add>, %122, %cst_64 [1] : vector<8x8xf32> to vector<8xf32>
    %124 = vector.shape_cast %123 : vector<8xf32> to vector<8x1xf32>
    %125 = tpu.reciprocal %124 {approx = true} : vector<8x1xf32> -> vector<8x1xf32>
    %126 = vector.broadcast %125 : vector<8x1xf32> to vector<8x8xf32>
    %127 = arith.mulf %122, %126 : vector<8x8xf32>
    %cst_65 = arith.constant dense<0.000000e+00> : vector<8x8xf32>
    %128 = tpu.matmul %127, %113, %cst_65 {dimension_numbers = #tpu.dot_dimension_numbers<[1], [0], [0], [1], [0, 0, 1, 1], [], []>} : vector<8x8xf32>, vector<8x8xf32>, vector<8x8xf32> -> vector<8x8xf32>
    %129 = vector.extract_strided_slice %67 {offsets = [16, 0], sizes = [8, 64], strides = [1, 1]} : vector<64x64xf32> to vector<8x64xf32>
    %cst_66 = arith.constant dense<0.000000e+00> : vector<8x64xf32>
    %130 = tpu.matmul %128, %129, %cst_66 {dimension_numbers = #tpu.dot_dimension_numbers<[1], [0], [0], [1], [0, 0, 1, 1], [], []>} : vector<8x8xf32>, vector<8x64xf32>, vector<8x64xf32> -> vector<8x64xf32>
    %131 = arith.addf %110, %130 : vector<8x64xf32>
    %132 = vector.extract_strided_slice %65 {offsets = [0, 24], sizes = [8, 8], strides = [1, 1]} : vector<8x192xf32> to vector<8x8xf32>
    %133 = vector.extract_strided_slice %65 {offsets = [0, 88], sizes = [8, 8], strides = [1, 1]} : vector<8x192xf32> to vector<8x8xf32>
    %134 = vector.extract_strided_slice %65 {offsets = [0, 152], sizes = [8, 8], strides = [1, 1]} : vector<8x192xf32> to vector<8x8xf32>
    %cst_67 = arith.constant dense<0.000000e+00> : vector<8x8xf32>
    %135 = tpu.matmul %132, %133, %cst_67 {dimension_numbers = #tpu.dot_dimension_numbers<[1], [1], [0], [0], [0, 0, 1, 0], [], []>} : vector<8x8xf32>, vector<8x8xf32>, vector<8x8xf32> -> vector<8x8xf32>
    %cst_68 = arith.constant 0.353553385 : f32
    %136 = vector.broadcast %cst_68 : f32 to vector<8x8xf32>
    %137 = arith.mulf %135, %136 : vector<8x8xf32>
    %138 = arith.select %17, %137, %1 : vector<8x8xi1>, vector<8x8xf32>
    %cst_69 = arith.constant dense<0xFF800000> : vector<8xf32>
    %139 = vector.multi_reduction <maximumf>, %138, %cst_69 [1] : vector<8x8xf32> to vector<8xf32>
    %140 = vector.shape_cast %139 : vector<8xf32> to vector<8x1xf32>
    %141 = vector.broadcast %140 : vector<8x1xf32> to vector<8x8xf32>
    %142 = arith.subf %138, %141 : vector<8x8xf32>
    %143 = math.exp %142 : vector<8x8xf32>
    %cst_70 = arith.constant dense<0.000000e+00> : vector<8xf32>
    %144 = vector.multi_reduction <add>, %143, %cst_70 [1] : vector<8x8xf32> to vector<8xf32>
    %145 = vector.shape_cast %144 : vector<8xf32> to vector<8x1xf32>
    %146 = tpu.reciprocal %145 {approx = true} : vector<8x1xf32> -> vector<8x1xf32>
    %147 = vector.broadcast %146 : vector<8x1xf32> to vector<8x8xf32>
    %148 = arith.mulf %143, %147 : vector<8x8xf32>
    %cst_71 = arith.constant dense<0.000000e+00> : vector<8x8xf32>
    %149 = tpu.matmul %148, %134, %cst_71 {dimension_numbers = #tpu.dot_dimension_numbers<[1], [0], [0], [1], [0, 0, 1, 1], [], []>} : vector<8x8xf32>, vector<8x8xf32>, vector<8x8xf32> -> vector<8x8xf32>
    %150 = vector.extract_strided_slice %67 {offsets = [24, 0], sizes = [8, 64], strides = [1, 1]} : vector<64x64xf32> to vector<8x64xf32>
    %cst_72 = arith.constant dense<0.000000e+00> : vector<8x64xf32>
    %151 = tpu.matmul %149, %150, %cst_72 {dimension_numbers = #tpu.dot_dimension_numbers<[1], [0], [0], [1], [0, 0, 1, 1], [], []>} : vector<8x8xf32>, vector<8x64xf32>, vector<8x64xf32> -> vector<8x64xf32>
    %152 = arith.addf %131, %151 : vector<8x64xf32>
    %153 = vector.extract_strided_slice %65 {offsets = [0, 32], sizes = [8, 8], strides = [1, 1]} : vector<8x192xf32> to vector<8x8xf32>
    %154 = vector.extract_strided_slice %65 {offsets = [0, 96], sizes = [8, 8], strides = [1, 1]} : vector<8x192xf32> to vector<8x8xf32>
    %155 = vector.extract_strided_slice %65 {offsets = [0, 160], sizes = [8, 8], strides = [1, 1]} : vector<8x192xf32> to vector<8x8xf32>
    %cst_73 = arith.constant dense<0.000000e+00> : vector<8x8xf32>
    %156 = tpu.matmul %153, %154, %cst_73 {dimension_numbers = #tpu.dot_dimension_numbers<[1], [1], [0], [0], [0, 0, 1, 0], [], []>} : vector<8x8xf32>, vector<8x8xf32>, vector<8x8xf32> -> vector<8x8xf32>
    %cst_74 = arith.constant 0.353553385 : f32
    %157 = vector.broadcast %cst_74 : f32 to vector<8x8xf32>
    %158 = arith.mulf %156, %157 : vector<8x8xf32>
    %159 = arith.select %21, %158, %1 : vector<8x8xi1>, vector<8x8xf32>
    %cst_75 = arith.constant dense<0xFF800000> : vector<8xf32>
    %160 = vector.multi_reduction <maximumf>, %159, %cst_75 [1] : vector<8x8xf32> to vector<8xf32>
    %161 = vector.shape_cast %160 : vector<8xf32> to vector<8x1xf32>
    %162 = vector.broadcast %161 : vector<8x1xf32> to vector<8x8xf32>
    %163 = arith.subf %159, %162 : vector<8x8xf32>
    %164 = math.exp %163 : vector<8x8xf32>
    %cst_76 = arith.constant dense<0.000000e+00> : vector<8xf32>
    %165 = vector.multi_reduction <add>, %164, %cst_76 [1] : vector<8x8xf32> to vector<8xf32>
    %166 = vector.shape_cast %165 : vector<8xf32> to vector<8x1xf32>
    %167 = tpu.reciprocal %166 {approx = true} : vector<8x1xf32> -> vector<8x1xf32>
    %168 = vector.broadcast %167 : vector<8x1xf32> to vector<8x8xf32>
    %169 = arith.mulf %164, %168 : vector<8x8xf32>
    %cst_77 = arith.constant dense<0.000000e+00> : vector<8x8xf32>
    %170 = tpu.matmul %169, %155, %cst_77 {dimension_numbers = #tpu.dot_dimension_numbers<[1], [0], [0], [1], [0, 0, 1, 1], [], []>} : vector<8x8xf32>, vector<8x8xf32>, vector<8x8xf32> -> vector<8x8xf32>
    %171 = vector.extract_strided_slice %67 {offsets = [32, 0], sizes = [8, 64], strides = [1, 1]} : vector<64x64xf32> to vector<8x64xf32>
    %cst_78 = arith.constant dense<0.000000e+00> : vector<8x64xf32>
    %172 = tpu.matmul %170, %171, %cst_78 {dimension_numbers = #tpu.dot_dimension_numbers<[1], [0], [0], [1], [0, 0, 1, 1], [], []>} : vector<8x8xf32>, vector<8x64xf32>, vector<8x64xf32> -> vector<8x64xf32>
    %173 = arith.addf %152, %172 : vector<8x64xf32>
    %174 = vector.extract_strided_slice %65 {offsets = [0, 40], sizes = [8, 8], strides = [1, 1]} : vector<8x192xf32> to vector<8x8xf32>
    %175 = vector.extract_strided_slice %65 {offsets = [0, 104], sizes = [8, 8], strides = [1, 1]} : vector<8x192xf32> to vector<8x8xf32>
    %176 = vector.extract_strided_slice %65 {offsets = [0, 168], sizes = [8, 8], strides = [1, 1]} : vector<8x192xf32> to vector<8x8xf32>
    %cst_79 = arith.constant dense<0.000000e+00> : vector<8x8xf32>
    %177 = tpu.matmul %174, %175, %cst_79 {dimension_numbers = #tpu.dot_dimension_numbers<[1], [1], [0], [0], [0, 0, 1, 0], [], []>} : vector<8x8xf32>, vector<8x8xf32>, vector<8x8xf32> -> vector<8x8xf32>
    %cst_80 = arith.constant 0.353553385 : f32
    %178 = vector.broadcast %cst_80 : f32 to vector<8x8xf32>
    %179 = arith.mulf %177, %178 : vector<8x8xf32>
    %180 = arith.select %25, %179, %1 : vector<8x8xi1>, vector<8x8xf32>
    %cst_81 = arith.constant dense<0xFF800000> : vector<8xf32>
    %181 = vector.multi_reduction <maximumf>, %180, %cst_81 [1] : vector<8x8xf32> to vector<8xf32>
    %182 = vector.shape_cast %181 : vector<8xf32> to vector<8x1xf32>
    %183 = vector.broadcast %182 : vector<8x1xf32> to vector<8x8xf32>
    %184 = arith.subf %180, %183 : vector<8x8xf32>
    %185 = math.exp %184 : vector<8x8xf32>
    %cst_82 = arith.constant dense<0.000000e+00> : vector<8xf32>
    %186 = vector.multi_reduction <add>, %185, %cst_82 [1] : vector<8x8xf32> to vector<8xf32>
    %187 = vector.shape_cast %186 : vector<8xf32> to vector<8x1xf32>
    %188 = tpu.reciprocal %187 {approx = true} : vector<8x1xf32> -> vector<8x1xf32>
    %189 = vector.broadcast %188 : vector<8x1xf32> to vector<8x8xf32>
    %190 = arith.mulf %185, %189 : vector<8x8xf32>
    %cst_83 = arith.constant dense<0.000000e+00> : vector<8x8xf32>
    %191 = tpu.matmul %190, %176, %cst_83 {dimension_numbers = #tpu.dot_dimension_numbers<[1], [0], [0], [1], [0, 0, 1, 1], [], []>} : vector<8x8xf32>, vector<8x8xf32>, vector<8x8xf32> -> vector<8x8xf32>
    %192 = vector.extract_strided_slice %67 {offsets = [40, 0], sizes = [8, 64], strides = [1, 1]} : vector<64x64xf32> to vector<8x64xf32>
    %cst_84 = arith.constant dense<0.000000e+00> : vector<8x64xf32>
    %193 = tpu.matmul %191, %192, %cst_84 {dimension_numbers = #tpu.dot_dimension_numbers<[1], [0], [0], [1], [0, 0, 1, 1], [], []>} : vector<8x8xf32>, vector<8x64xf32>, vector<8x64xf32> -> vector<8x64xf32>
    %194 = arith.addf %173, %193 : vector<8x64xf32>
    %195 = vector.extract_strided_slice %65 {offsets = [0, 48], sizes = [8, 8], strides = [1, 1]} : vector<8x192xf32> to vector<8x8xf32>
    %196 = vector.extract_strided_slice %65 {offsets = [0, 112], sizes = [8, 8], strides = [1, 1]} : vector<8x192xf32> to vector<8x8xf32>
    %197 = vector.extract_strided_slice %65 {offsets = [0, 176], sizes = [8, 8], strides = [1, 1]} : vector<8x192xf32> to vector<8x8xf32>
    %cst_85 = arith.constant dense<0.000000e+00> : vector<8x8xf32>
    %198 = tpu.matmul %195, %196, %cst_85 {dimension_numbers = #tpu.dot_dimension_numbers<[1], [1], [0], [0], [0, 0, 1, 0], [], []>} : vector<8x8xf32>, vector<8x8xf32>, vector<8x8xf32> -> vector<8x8xf32>
    %cst_86 = arith.constant 0.353553385 : f32
    %199 = vector.broadcast %cst_86 : f32 to vector<8x8xf32>
    %200 = arith.mulf %198, %199 : vector<8x8xf32>
    %201 = arith.select %29, %200, %1 : vector<8x8xi1>, vector<8x8xf32>
    %cst_87 = arith.constant dense<0xFF800000> : vector<8xf32>
    %202 = vector.multi_reduction <maximumf>, %201, %cst_87 [1] : vector<8x8xf32> to vector<8xf32>
    %203 = vector.shape_cast %202 : vector<8xf32> to vector<8x1xf32>
    %204 = vector.broadcast %203 : vector<8x1xf32> to vector<8x8xf32>
    %205 = arith.subf %201, %204 : vector<8x8xf32>
    %206 = math.exp %205 : vector<8x8xf32>
    %cst_88 = arith.constant dense<0.000000e+00> : vector<8xf32>
    %207 = vector.multi_reduction <add>, %206, %cst_88 [1] : vector<8x8xf32> to vector<8xf32>
    %208 = vector.shape_cast %207 : vector<8xf32> to vector<8x1xf32>
    %209 = tpu.reciprocal %208 {approx = true} : vector<8x1xf32> -> vector<8x1xf32>
    %210 = vector.broadcast %209 : vector<8x1xf32> to vector<8x8xf32>
    %211 = arith.mulf %206, %210 : vector<8x8xf32>
    %cst_89 = arith.constant dense<0.000000e+00> : vector<8x8xf32>
    %212 = tpu.matmul %211, %197, %cst_89 {dimension_numbers = #tpu.dot_dimension_numbers<[1], [0], [0], [1], [0, 0, 1, 1], [], []>} : vector<8x8xf32>, vector<8x8xf32>, vector<8x8xf32> -> vector<8x8xf32>
    %213 = vector.extract_strided_slice %67 {offsets = [48, 0], sizes = [8, 64], strides = [1, 1]} : vector<64x64xf32> to vector<8x64xf32>
    %cst_90 = arith.constant dense<0.000000e+00> : vector<8x64xf32>
    %214 = tpu.matmul %212, %213, %cst_90 {dimension_numbers = #tpu.dot_dimension_numbers<[1], [0], [0], [1], [0, 0, 1, 1], [], []>} : vector<8x8xf32>, vector<8x64xf32>, vector<8x64xf32> -> vector<8x64xf32>
    %215 = arith.addf %194, %214 : vector<8x64xf32>
    %216 = vector.extract_strided_slice %65 {offsets = [0, 56], sizes = [8, 8], strides = [1, 1]} : vector<8x192xf32> to vector<8x8xf32>
    %217 = vector.extract_strided_slice %65 {offsets = [0, 120], sizes = [8, 8], strides = [1, 1]} : vector<8x192xf32> to vector<8x8xf32>
    %218 = vector.extract_strided_slice %65 {offsets = [0, 184], sizes = [8, 8], strides = [1, 1]} : vector<8x192xf32> to vector<8x8xf32>
    %cst_91 = arith.constant dense<0.000000e+00> : vector<8x8xf32>
    %219 = tpu.matmul %216, %217, %cst_91 {dimension_numbers = #tpu.dot_dimension_numbers<[1], [1], [0], [0], [0, 0, 1, 0], [], []>} : vector<8x8xf32>, vector<8x8xf32>, vector<8x8xf32> -> vector<8x8xf32>
    %cst_92 = arith.constant 0.353553385 : f32
    %220 = vector.broadcast %cst_92 : f32 to vector<8x8xf32>
    %221 = arith.mulf %219, %220 : vector<8x8xf32>
    %222 = arith.select %33, %221, %1 : vector<8x8xi1>, vector<8x8xf32>
    %cst_93 = arith.constant dense<0xFF800000> : vector<8xf32>
    %223 = vector.multi_reduction <maximumf>, %222, %cst_93 [1] : vector<8x8xf32> to vector<8xf32>
    %224 = vector.shape_cast %223 : vector<8xf32> to vector<8x1xf32>
    %225 = vector.broadcast %224 : vector<8x1xf32> to vector<8x8xf32>
    %226 = arith.subf %222, %225 : vector<8x8xf32>
    %227 = math.exp %226 : vector<8x8xf32>
    %cst_94 = arith.constant dense<0.000000e+00> : vector<8xf32>
    %228 = vector.multi_reduction <add>, %227, %cst_94 [1] : vector<8x8xf32> to vector<8xf32>
    %229 = vector.shape_cast %228 : vector<8xf32> to vector<8x1xf32>
    %230 = tpu.reciprocal %229 {approx = true} : vector<8x1xf32> -> vector<8x1xf32>
    %231 = vector.broadcast %230 : vector<8x1xf32> to vector<8x8xf32>
    %232 = arith.mulf %227, %231 : vector<8x8xf32>
    %cst_95 = arith.constant dense<0.000000e+00> : vector<8x8xf32>
    %233 = tpu.matmul %232, %218, %cst_95 {dimension_numbers = #tpu.dot_dimension_numbers<[1], [0], [0], [1], [0, 0, 1, 1], [], []>} : vector<8x8xf32>, vector<8x8xf32>, vector<8x8xf32> -> vector<8x8xf32>
    %234 = vector.extract_strided_slice %67 {offsets = [56, 0], sizes = [8, 64], strides = [1, 1]} : vector<64x64xf32> to vector<8x64xf32>
    %cst_96 = arith.constant dense<0.000000e+00> : vector<8x64xf32>
    %235 = tpu.matmul %233, %234, %cst_96 {dimension_numbers = #tpu.dot_dimension_numbers<[1], [0], [0], [1], [0, 0, 1, 1], [], []>} : vector<8x8xf32>, vector<8x64xf32>, vector<8x64xf32> -> vector<8x64xf32>
    %236 = arith.addf %215, %235 : vector<8x64xf32>
    %237 = arith.addf %0, %236 : vector<8x64xf32>
    %c0_97 = arith.constant 0 : index
    %c0_98 = arith.constant 0 : index
    %c0_99 = arith.constant 0 : index
    %238 = vector.load %arg8[%c0_97, %c0_98, %c0_99] : memref<2x1x64xf32, #tpu.memory_space<vmem>>, vector<1x1x64xf32>
    %239 = vector.shape_cast %238 : vector<1x1x64xf32> to vector<1x64xf32>
    %240 = vector.broadcast %239 : vector<1x64xf32> to vector<8x64xf32>
    %241 = arith.addf %237, %240 : vector<8x64xf32>
    %c0_100 = arith.constant 0 : index
    %c0_101 = arith.constant 0 : index
    %c0_102 = arith.constant 0 : index
    %242 = vector.load %arg9[%c0_100, %c0_101, %c0_102] : memref<2x1x64xf32, #tpu.memory_space<vmem>>, vector<1x1x64xf32>
    %243 = vector.shape_cast %242 : vector<1x1x64xf32> to vector<1x64xf32>
    %c0_103 = arith.constant 0 : index
    %c0_104 = arith.constant 0 : index
    %c0_105 = arith.constant 0 : index
    %244 = vector.load %arg10[%c0_103, %c0_104, %c0_105] : memref<2x1x64xf32, #tpu.memory_space<vmem>>, vector<1x1x64xf32>
    %245 = vector.shape_cast %244 : vector<1x1x64xf32> to vector<1x64xf32>
    %cst_106 = arith.constant dense<0.000000e+00> : vector<8xf32>
    %246 = vector.multi_reduction <add>, %241, %cst_106 [1] : vector<8x64xf32> to vector<8xf32>
    %247 = vector.shape_cast %246 : vector<8xf32> to vector<8x1xf32>
    %cst_107 = arith.constant 6.400000e+01 : f32
    %248 = vector.broadcast %cst_107 : f32 to vector<8x1xf32>
    %249 = arith.divf %247, %248 : vector<8x1xf32>
    %250 = vector.broadcast %249 : vector<8x1xf32> to vector<8x64xf32>
    %251 = arith.subf %241, %250 : vector<8x64xf32>
    %252 = arith.mulf %251, %251 : vector<8x64xf32>
    %cst_108 = arith.constant dense<0.000000e+00> : vector<8xf32>
    %253 = vector.multi_reduction <add>, %252, %cst_108 [1] : vector<8x64xf32> to vector<8xf32>
    %254 = vector.shape_cast %253 : vector<8xf32> to vector<8x1xf32>
    %cst_109 = arith.constant 0.0158730168 : f32
    %255 = vector.broadcast %cst_109 : f32 to vector<8x1xf32>
    %256 = arith.mulf %254, %255 : vector<8x1xf32>
    %257 = math.sqrt %256 : vector<8x1xf32>
    %cst_110 = arith.constant 1.000000e+06 : f32
    %258 = vector.broadcast %cst_110 : f32 to vector<8x1xf32>
    %259 = arith.addf %257, %258 : vector<8x1xf32>
    %260 = tpu.reciprocal %259 {approx = true} : vector<8x1xf32> -> vector<8x1xf32>
    %261 = vector.broadcast %243 : vector<1x64xf32> to vector<8x64xf32>
    %262 = arith.mulf %261, %251 : vector<8x64xf32>
    %263 = vector.broadcast %260 : vector<8x1xf32> to vector<8x64xf32>
    %264 = arith.mulf %262, %263 : vector<8x64xf32>
    %265 = vector.broadcast %245 : vector<1x64xf32> to vector<8x64xf32>
    %266 = arith.addf %264, %265 : vector<8x64xf32>
    %c0_111 = arith.constant 0 : index
    %c0_112 = arith.constant 0 : index
    %c0_113 = arith.constant 0 : index
    %267 = vector.load %arg11[%c0_111, %c0_112, %c0_113] : memref<2x64x64xf32, #tpu.memory_space<vmem>>, vector<1x64x64xf32>
    %268 = vector.shape_cast %267 : vector<1x64x64xf32> to vector<64x64xf32>
    %cst_114 = arith.constant dense<0.000000e+00> : vector<8x64xf32>
    %269 = tpu.matmul %266, %268, %cst_114 {dimension_numbers = #tpu.dot_dimension_numbers<[1], [0], [0], [1], [0, 0, 1, 1], [], []>} : vector<8x64xf32>, vector<64x64xf32>, vector<8x64xf32> -> vector<8x64xf32>
    %c0_115 = arith.constant 0 : index
    %c0_116 = arith.constant 0 : index
    %c0_117 = arith.constant 0 : index
    %270 = vector.load %arg12[%c0_115, %c0_116, %c0_117] : memref<2x1x64xf32, #tpu.memory_space<vmem>>, vector<1x1x64xf32>
    %271 = vector.shape_cast %270 : vector<1x1x64xf32> to vector<1x64xf32>
    %272 = vector.broadcast %271 : vector<1x64xf32> to vector<8x64xf32>
    %273 = arith.addf %269, %272 : vector<8x64xf32>
    %cst_118 = arith.constant 0.000000e+00 : f32
    %274 = vector.broadcast %cst_118 : f32 to vector<8x64xf32>
    %275 = arith.maximumf %273, %274 : vector<8x64xf32>
    %c0_119 = arith.constant 0 : index
    %c0_120 = arith.constant 0 : index
    %c0_121 = arith.constant 0 : index
    %276 = vector.load %arg13[%c0_119, %c0_120, %c0_121] : memref<2x64x64xf32, #tpu.memory_space<vmem>>, vector<1x64x64xf32>
    %277 = vector.shape_cast %276 : vector<1x64x64xf32> to vector<64x64xf32>
    %cst_122 = arith.constant dense<0.000000e+00> : vector<8x64xf32>
    %278 = tpu.matmul %275, %277, %cst_122 {dimension_numbers = #tpu.dot_dimension_numbers<[1], [0], [0], [1], [0, 0, 1, 1], [], []>} : vector<8x64xf32>, vector<64x64xf32>, vector<8x64xf32> -> vector<8x64xf32>
    %279 = arith.addf %241, %278 : vector<8x64xf32>
    %c0_123 = arith.constant 0 : index
    %c0_124 = arith.constant 0 : index
    %c0_125 = arith.constant 0 : index
    %280 = vector.load %arg14[%c0_123, %c0_124, %c0_125] : memref<2x1x64xf32, #tpu.memory_space<vmem>>, vector<1x1x64xf32>
    %281 = vector.shape_cast %280 : vector<1x1x64xf32> to vector<1x64xf32>
    %282 = vector.broadcast %281 : vector<1x64xf32> to vector<8x64xf32>
    %283 = arith.addf %279, %282 : vector<8x64xf32>
    %c1_126 = arith.constant 1 : index
    %c0_127 = arith.constant 0 : index
    %c0_128 = arith.constant 0 : index
    %284 = vector.load %arg3[%c1_126, %c0_127, %c0_128] : memref<2x1x64xf32, #tpu.memory_space<vmem>>, vector<1x1x64xf32>
    %285 = vector.shape_cast %284 : vector<1x1x64xf32> to vector<1x64xf32>
    %c1_129 = arith.constant 1 : index
    %c0_130 = arith.constant 0 : index
    %c0_131 = arith.constant 0 : index
    %286 = vector.load %arg4[%c1_129, %c0_130, %c0_131] : memref<2x1x64xf32, #tpu.memory_space<vmem>>, vector<1x1x64xf32>
    %287 = vector.shape_cast %286 : vector<1x1x64xf32> to vector<1x64xf32>
    %cst_132 = arith.constant dense<0.000000e+00> : vector<8xf32>
    %288 = vector.multi_reduction <add>, %283, %cst_132 [1] : vector<8x64xf32> to vector<8xf32>
    %289 = vector.shape_cast %288 : vector<8xf32> to vector<8x1xf32>
    %cst_133 = arith.constant 6.400000e+01 : f32
    %290 = vector.broadcast %cst_133 : f32 to vector<8x1xf32>
    %291 = arith.divf %289, %290 : vector<8x1xf32>
    %292 = vector.broadcast %291 : vector<8x1xf32> to vector<8x64xf32>
    %293 = arith.subf %283, %292 : vector<8x64xf32>
    %294 = arith.mulf %293, %293 : vector<8x64xf32>
    %cst_134 = arith.constant dense<0.000000e+00> : vector<8xf32>
    %295 = vector.multi_reduction <add>, %294, %cst_134 [1] : vector<8x64xf32> to vector<8xf32>
    %296 = vector.shape_cast %295 : vector<8xf32> to vector<8x1xf32>
    %cst_135 = arith.constant 0.0158730168 : f32
    %297 = vector.broadcast %cst_135 : f32 to vector<8x1xf32>
    %298 = arith.mulf %296, %297 : vector<8x1xf32>
    %299 = math.sqrt %298 : vector<8x1xf32>
    %cst_136 = arith.constant 1.000000e+06 : f32
    %300 = vector.broadcast %cst_136 : f32 to vector<8x1xf32>
    %301 = arith.addf %299, %300 : vector<8x1xf32>
    %302 = tpu.reciprocal %301 {approx = true} : vector<8x1xf32> -> vector<8x1xf32>
    %303 = vector.broadcast %285 : vector<1x64xf32> to vector<8x64xf32>
    %304 = arith.mulf %303, %293 : vector<8x64xf32>
    %305 = vector.broadcast %302 : vector<8x1xf32> to vector<8x64xf32>
    %306 = arith.mulf %304, %305 : vector<8x64xf32>
    %307 = vector.broadcast %287 : vector<1x64xf32> to vector<8x64xf32>
    %308 = arith.addf %306, %307 : vector<8x64xf32>
    %c1_137 = arith.constant 1 : index
    %c0_138 = arith.constant 0 : index
    %c0_139 = arith.constant 0 : index
    %309 = vector.load %arg5[%c1_137, %c0_138, %c0_139] : memref<2x64x192xf32, #tpu.memory_space<vmem>>, vector<1x64x192xf32>
    %310 = vector.shape_cast %309 : vector<1x64x192xf32> to vector<64x192xf32>
    %cst_140 = arith.constant dense<0.000000e+00> : vector<8x192xf32>
    %311 = tpu.matmul %308, %310, %cst_140 {dimension_numbers = #tpu.dot_dimension_numbers<[1], [0], [0], [1], [0, 0, 1, 1], [], []>} : vector<8x64xf32>, vector<64x192xf32>, vector<8x192xf32> -> vector<8x192xf32>
    %c1_141 = arith.constant 1 : index
    %c0_142 = arith.constant 0 : index
    %c0_143 = arith.constant 0 : index
    %312 = vector.load %arg6[%c1_141, %c0_142, %c0_143] : memref<2x1x192xf32, #tpu.memory_space<vmem>>, vector<1x1x192xf32>
    %313 = vector.shape_cast %312 : vector<1x1x192xf32> to vector<1x192xf32>
    %314 = vector.broadcast %313 : vector<1x192xf32> to vector<8x192xf32>
    %315 = arith.addf %311, %314 : vector<8x192xf32>
    %c1_144 = arith.constant 1 : index
    %c0_145 = arith.constant 0 : index
    %c0_146 = arith.constant 0 : index
    %316 = vector.load %arg7[%c1_144, %c0_145, %c0_146] : memref<2x64x64xf32, #tpu.memory_space<vmem>>, vector<1x64x64xf32>
    %317 = vector.shape_cast %316 : vector<1x64x64xf32> to vector<64x64xf32>
    %cst_147 = arith.constant 0.000000e+00 : f32
    %318 = vector.broadcast %cst_147 : f32 to vector<8x64xf32>
    %319 = vector.extract_strided_slice %315 {offsets = [0, 0], sizes = [8, 8], strides = [1, 1]} : vector<8x192xf32> to vector<8x8xf32>
    %320 = vector.extract_strided_slice %315 {offsets = [0, 64], sizes = [8, 8], strides = [1, 1]} : vector<8x192xf32> to vector<8x8xf32>
    %321 = vector.extract_strided_slice %315 {offsets = [0, 128], sizes = [8, 8], strides = [1, 1]} : vector<8x192xf32> to vector<8x8xf32>
    %cst_148 = arith.constant dense<0.000000e+00> : vector<8x8xf32>
    %322 = tpu.matmul %319, %320, %cst_148 {dimension_numbers = #tpu.dot_dimension_numbers<[1], [1], [0], [0], [0, 0, 1, 0], [], []>} : vector<8x8xf32>, vector<8x8xf32>, vector<8x8xf32> -> vector<8x8xf32>
    %cst_149 = arith.constant 0.353553385 : f32
    %323 = vector.broadcast %cst_149 : f32 to vector<8x8xf32>
    %324 = arith.mulf %322, %323 : vector<8x8xf32>
    %325 = arith.select %5, %324, %1 : vector<8x8xi1>, vector<8x8xf32>
    %cst_150 = arith.constant dense<0xFF800000> : vector<8xf32>
    %326 = vector.multi_reduction <maximumf>, %325, %cst_150 [1] : vector<8x8xf32> to vector<8xf32>
    %327 = vector.shape_cast %326 : vector<8xf32> to vector<8x1xf32>
    %328 = vector.broadcast %327 : vector<8x1xf32> to vector<8x8xf32>
    %329 = arith.subf %325, %328 : vector<8x8xf32>
    %330 = math.exp %329 : vector<8x8xf32>
    %cst_151 = arith.constant dense<0.000000e+00> : vector<8xf32>
    %331 = vector.multi_reduction <add>, %330, %cst_151 [1] : vector<8x8xf32> to vector<8xf32>
    %332 = vector.shape_cast %331 : vector<8xf32> to vector<8x1xf32>
    %333 = tpu.reciprocal %332 {approx = true} : vector<8x1xf32> -> vector<8x1xf32>
    %334 = vector.broadcast %333 : vector<8x1xf32> to vector<8x8xf32>
    %335 = arith.mulf %330, %334 : vector<8x8xf32>
    %cst_152 = arith.constant dense<0.000000e+00> : vector<8x8xf32>
    %336 = tpu.matmul %335, %321, %cst_152 {dimension_numbers = #tpu.dot_dimension_numbers<[1], [0], [0], [1], [0, 0, 1, 1], [], []>} : vector<8x8xf32>, vector<8x8xf32>, vector<8x8xf32> -> vector<8x8xf32>
    %337 = vector.extract_strided_slice %317 {offsets = [0, 0], sizes = [8, 64], strides = [1, 1]} : vector<64x64xf32> to vector<8x64xf32>
    %cst_153 = arith.constant dense<0.000000e+00> : vector<8x64xf32>
    %338 = tpu.matmul %336, %337, %cst_153 {dimension_numbers = #tpu.dot_dimension_numbers<[1], [0], [0], [1], [0, 0, 1, 1], [], []>} : vector<8x8xf32>, vector<8x64xf32>, vector<8x64xf32> -> vector<8x64xf32>
    %339 = arith.addf %318, %338 : vector<8x64xf32>
    %340 = vector.extract_strided_slice %315 {offsets = [0, 8], sizes = [8, 8], strides = [1, 1]} : vector<8x192xf32> to vector<8x8xf32>
    %341 = vector.extract_strided_slice %315 {offsets = [0, 72], sizes = [8, 8], strides = [1, 1]} : vector<8x192xf32> to vector<8x8xf32>
    %342 = vector.extract_strided_slice %315 {offsets = [0, 136], sizes = [8, 8], strides = [1, 1]} : vector<8x192xf32> to vector<8x8xf32>
    %cst_154 = arith.constant dense<0.000000e+00> : vector<8x8xf32>
    %343 = tpu.matmul %340, %341, %cst_154 {dimension_numbers = #tpu.dot_dimension_numbers<[1], [1], [0], [0], [0, 0, 1, 0], [], []>} : vector<8x8xf32>, vector<8x8xf32>, vector<8x8xf32> -> vector<8x8xf32>
    %cst_155 = arith.constant 0.353553385 : f32
    %344 = vector.broadcast %cst_155 : f32 to vector<8x8xf32>
    %345 = arith.mulf %343, %344 : vector<8x8xf32>
    %346 = arith.select %9, %345, %1 : vector<8x8xi1>, vector<8x8xf32>
    %cst_156 = arith.constant dense<0xFF800000> : vector<8xf32>
    %347 = vector.multi_reduction <maximumf>, %346, %cst_156 [1] : vector<8x8xf32> to vector<8xf32>
    %348 = vector.shape_cast %347 : vector<8xf32> to vector<8x1xf32>
    %349 = vector.broadcast %348 : vector<8x1xf32> to vector<8x8xf32>
    %350 = arith.subf %346, %349 : vector<8x8xf32>
    %351 = math.exp %350 : vector<8x8xf32>
    %cst_157 = arith.constant dense<0.000000e+00> : vector<8xf32>
    %352 = vector.multi_reduction <add>, %351, %cst_157 [1] : vector<8x8xf32> to vector<8xf32>
    %353 = vector.shape_cast %352 : vector<8xf32> to vector<8x1xf32>
    %354 = tpu.reciprocal %353 {approx = true} : vector<8x1xf32> -> vector<8x1xf32>
    %355 = vector.broadcast %354 : vector<8x1xf32> to vector<8x8xf32>
    %356 = arith.mulf %351, %355 : vector<8x8xf32>
    %cst_158 = arith.constant dense<0.000000e+00> : vector<8x8xf32>
    %357 = tpu.matmul %356, %342, %cst_158 {dimension_numbers = #tpu.dot_dimension_numbers<[1], [0], [0], [1], [0, 0, 1, 1], [], []>} : vector<8x8xf32>, vector<8x8xf32>, vector<8x8xf32> -> vector<8x8xf32>
    %358 = vector.extract_strided_slice %317 {offsets = [8, 0], sizes = [8, 64], strides = [1, 1]} : vector<64x64xf32> to vector<8x64xf32>
    %cst_159 = arith.constant dense<0.000000e+00> : vector<8x64xf32>
    %359 = tpu.matmul %357, %358, %cst_159 {dimension_numbers = #tpu.dot_dimension_numbers<[1], [0], [0], [1], [0, 0, 1, 1], [], []>} : vector<8x8xf32>, vector<8x64xf32>, vector<8x64xf32> -> vector<8x64xf32>
    %360 = arith.addf %339, %359 : vector<8x64xf32>
    %361 = vector.extract_strided_slice %315 {offsets = [0, 16], sizes = [8, 8], strides = [1, 1]} : vector<8x192xf32> to vector<8x8xf32>
    %362 = vector.extract_strided_slice %315 {offsets = [0, 80], sizes = [8, 8], strides = [1, 1]} : vector<8x192xf32> to vector<8x8xf32>
    %363 = vector.extract_strided_slice %315 {offsets = [0, 144], sizes = [8, 8], strides = [1, 1]} : vector<8x192xf32> to vector<8x8xf32>
    %cst_160 = arith.constant dense<0.000000e+00> : vector<8x8xf32>
    %364 = tpu.matmul %361, %362, %cst_160 {dimension_numbers = #tpu.dot_dimension_numbers<[1], [1], [0], [0], [0, 0, 1, 0], [], []>} : vector<8x8xf32>, vector<8x8xf32>, vector<8x8xf32> -> vector<8x8xf32>
    %cst_161 = arith.constant 0.353553385 : f32
    %365 = vector.broadcast %cst_161 : f32 to vector<8x8xf32>
    %366 = arith.mulf %364, %365 : vector<8x8xf32>
    %367 = arith.select %13, %366, %1 : vector<8x8xi1>, vector<8x8xf32>
    %cst_162 = arith.constant dense<0xFF800000> : vector<8xf32>
    %368 = vector.multi_reduction <maximumf>, %367, %cst_162 [1] : vector<8x8xf32> to vector<8xf32>
    %369 = vector.shape_cast %368 : vector<8xf32> to vector<8x1xf32>
    %370 = vector.broadcast %369 : vector<8x1xf32> to vector<8x8xf32>
    %371 = arith.subf %367, %370 : vector<8x8xf32>
    %372 = math.exp %371 : vector<8x8xf32>
    %cst_163 = arith.constant dense<0.000000e+00> : vector<8xf32>
    %373 = vector.multi_reduction <add>, %372, %cst_163 [1] : vector<8x8xf32> to vector<8xf32>
    %374 = vector.shape_cast %373 : vector<8xf32> to vector<8x1xf32>
    %375 = tpu.reciprocal %374 {approx = true} : vector<8x1xf32> -> vector<8x1xf32>
    %376 = vector.broadcast %375 : vector<8x1xf32> to vector<8x8xf32>
    %377 = arith.mulf %372, %376 : vector<8x8xf32>
    %cst_164 = arith.constant dense<0.000000e+00> : vector<8x8xf32>
    %378 = tpu.matmul %377, %363, %cst_164 {dimension_numbers = #tpu.dot_dimension_numbers<[1], [0], [0], [1], [0, 0, 1, 1], [], []>} : vector<8x8xf32>, vector<8x8xf32>, vector<8x8xf32> -> vector<8x8xf32>
    %379 = vector.extract_strided_slice %317 {offsets = [16, 0], sizes = [8, 64], strides = [1, 1]} : vector<64x64xf32> to vector<8x64xf32>
    %cst_165 = arith.constant dense<0.000000e+00> : vector<8x64xf32>
    %380 = tpu.matmul %378, %379, %cst_165 {dimension_numbers = #tpu.dot_dimension_numbers<[1], [0], [0], [1], [0, 0, 1, 1], [], []>} : vector<8x8xf32>, vector<8x64xf32>, vector<8x64xf32> -> vector<8x64xf32>
    %381 = arith.addf %360, %380 : vector<8x64xf32>
    %382 = vector.extract_strided_slice %315 {offsets = [0, 24], sizes = [8, 8], strides = [1, 1]} : vector<8x192xf32> to vector<8x8xf32>
    %383 = vector.extract_strided_slice %315 {offsets = [0, 88], sizes = [8, 8], strides = [1, 1]} : vector<8x192xf32> to vector<8x8xf32>
    %384 = vector.extract_strided_slice %315 {offsets = [0, 152], sizes = [8, 8], strides = [1, 1]} : vector<8x192xf32> to vector<8x8xf32>
    %cst_166 = arith.constant dense<0.000000e+00> : vector<8x8xf32>
    %385 = tpu.matmul %382, %383, %cst_166 {dimension_numbers = #tpu.dot_dimension_numbers<[1], [1], [0], [0], [0, 0, 1, 0], [], []>} : vector<8x8xf32>, vector<8x8xf32>, vector<8x8xf32> -> vector<8x8xf32>
    %cst_167 = arith.constant 0.353553385 : f32
    %386 = vector.broadcast %cst_167 : f32 to vector<8x8xf32>
    %387 = arith.mulf %385, %386 : vector<8x8xf32>
    %388 = arith.select %17, %387, %1 : vector<8x8xi1>, vector<8x8xf32>
    %cst_168 = arith.constant dense<0xFF800000> : vector<8xf32>
    %389 = vector.multi_reduction <maximumf>, %388, %cst_168 [1] : vector<8x8xf32> to vector<8xf32>
    %390 = vector.shape_cast %389 : vector<8xf32> to vector<8x1xf32>
    %391 = vector.broadcast %390 : vector<8x1xf32> to vector<8x8xf32>
    %392 = arith.subf %388, %391 : vector<8x8xf32>
    %393 = math.exp %392 : vector<8x8xf32>
    %cst_169 = arith.constant dense<0.000000e+00> : vector<8xf32>
    %394 = vector.multi_reduction <add>, %393, %cst_169 [1] : vector<8x8xf32> to vector<8xf32>
    %395 = vector.shape_cast %394 : vector<8xf32> to vector<8x1xf32>
    %396 = tpu.reciprocal %395 {approx = true} : vector<8x1xf32> -> vector<8x1xf32>
    %397 = vector.broadcast %396 : vector<8x1xf32> to vector<8x8xf32>
    %398 = arith.mulf %393, %397 : vector<8x8xf32>
    %cst_170 = arith.constant dense<0.000000e+00> : vector<8x8xf32>
    %399 = tpu.matmul %398, %384, %cst_170 {dimension_numbers = #tpu.dot_dimension_numbers<[1], [0], [0], [1], [0, 0, 1, 1], [], []>} : vector<8x8xf32>, vector<8x8xf32>, vector<8x8xf32> -> vector<8x8xf32>
    %400 = vector.extract_strided_slice %317 {offsets = [24, 0], sizes = [8, 64], strides = [1, 1]} : vector<64x64xf32> to vector<8x64xf32>
    %cst_171 = arith.constant dense<0.000000e+00> : vector<8x64xf32>
    %401 = tpu.matmul %399, %400, %cst_171 {dimension_numbers = #tpu.dot_dimension_numbers<[1], [0], [0], [1], [0, 0, 1, 1], [], []>} : vector<8x8xf32>, vector<8x64xf32>, vector<8x64xf32> -> vector<8x64xf32>
    %402 = arith.addf %381, %401 : vector<8x64xf32>
    %403 = vector.extract_strided_slice %315 {offsets = [0, 32], sizes = [8, 8], strides = [1, 1]} : vector<8x192xf32> to vector<8x8xf32>
    %404 = vector.extract_strided_slice %315 {offsets = [0, 96], sizes = [8, 8], strides = [1, 1]} : vector<8x192xf32> to vector<8x8xf32>
    %405 = vector.extract_strided_slice %315 {offsets = [0, 160], sizes = [8, 8], strides = [1, 1]} : vector<8x192xf32> to vector<8x8xf32>
    %cst_172 = arith.constant dense<0.000000e+00> : vector<8x8xf32>
    %406 = tpu.matmul %403, %404, %cst_172 {dimension_numbers = #tpu.dot_dimension_numbers<[1], [1], [0], [0], [0, 0, 1, 0], [], []>} : vector<8x8xf32>, vector<8x8xf32>, vector<8x8xf32> -> vector<8x8xf32>
    %cst_173 = arith.constant 0.353553385 : f32
    %407 = vector.broadcast %cst_173 : f32 to vector<8x8xf32>
    %408 = arith.mulf %406, %407 : vector<8x8xf32>
    %409 = arith.select %21, %408, %1 : vector<8x8xi1>, vector<8x8xf32>
    %cst_174 = arith.constant dense<0xFF800000> : vector<8xf32>
    %410 = vector.multi_reduction <maximumf>, %409, %cst_174 [1] : vector<8x8xf32> to vector<8xf32>
    %411 = vector.shape_cast %410 : vector<8xf32> to vector<8x1xf32>
    %412 = vector.broadcast %411 : vector<8x1xf32> to vector<8x8xf32>
    %413 = arith.subf %409, %412 : vector<8x8xf32>
    %414 = math.exp %413 : vector<8x8xf32>
    %cst_175 = arith.constant dense<0.000000e+00> : vector<8xf32>
    %415 = vector.multi_reduction <add>, %414, %cst_175 [1] : vector<8x8xf32> to vector<8xf32>
    %416 = vector.shape_cast %415 : vector<8xf32> to vector<8x1xf32>
    %417 = tpu.reciprocal %416 {approx = true} : vector<8x1xf32> -> vector<8x1xf32>
    %418 = vector.broadcast %417 : vector<8x1xf32> to vector<8x8xf32>
    %419 = arith.mulf %414, %418 : vector<8x8xf32>
    %cst_176 = arith.constant dense<0.000000e+00> : vector<8x8xf32>
    %420 = tpu.matmul %419, %405, %cst_176 {dimension_numbers = #tpu.dot_dimension_numbers<[1], [0], [0], [1], [0, 0, 1, 1], [], []>} : vector<8x8xf32>, vector<8x8xf32>, vector<8x8xf32> -> vector<8x8xf32>
    %421 = vector.extract_strided_slice %317 {offsets = [32, 0], sizes = [8, 64], strides = [1, 1]} : vector<64x64xf32> to vector<8x64xf32>
    %cst_177 = arith.constant dense<0.000000e+00> : vector<8x64xf32>
    %422 = tpu.matmul %420, %421, %cst_177 {dimension_numbers = #tpu.dot_dimension_numbers<[1], [0], [0], [1], [0, 0, 1, 1], [], []>} : vector<8x8xf32>, vector<8x64xf32>, vector<8x64xf32> -> vector<8x64xf32>
    %423 = arith.addf %402, %422 : vector<8x64xf32>
    %424 = vector.extract_strided_slice %315 {offsets = [0, 40], sizes = [8, 8], strides = [1, 1]} : vector<8x192xf32> to vector<8x8xf32>
    %425 = vector.extract_strided_slice %315 {offsets = [0, 104], sizes = [8, 8], strides = [1, 1]} : vector<8x192xf32> to vector<8x8xf32>
    %426 = vector.extract_strided_slice %315 {offsets = [0, 168], sizes = [8, 8], strides = [1, 1]} : vector<8x192xf32> to vector<8x8xf32>
    %cst_178 = arith.constant dense<0.000000e+00> : vector<8x8xf32>
    %427 = tpu.matmul %424, %425, %cst_178 {dimension_numbers = #tpu.dot_dimension_numbers<[1], [1], [0], [0], [0, 0, 1, 0], [], []>} : vector<8x8xf32>, vector<8x8xf32>, vector<8x8xf32> -> vector<8x8xf32>
    %cst_179 = arith.constant 0.353553385 : f32
    %428 = vector.broadcast %cst_179 : f32 to vector<8x8xf32>
    %429 = arith.mulf %427, %428 : vector<8x8xf32>
    %430 = arith.select %25, %429, %1 : vector<8x8xi1>, vector<8x8xf32>
    %cst_180 = arith.constant dense<0xFF800000> : vector<8xf32>
    %431 = vector.multi_reduction <maximumf>, %430, %cst_180 [1] : vector<8x8xf32> to vector<8xf32>
    %432 = vector.shape_cast %431 : vector<8xf32> to vector<8x1xf32>
    %433 = vector.broadcast %432 : vector<8x1xf32> to vector<8x8xf32>
    %434 = arith.subf %430, %433 : vector<8x8xf32>
    %435 = math.exp %434 : vector<8x8xf32>
    %cst_181 = arith.constant dense<0.000000e+00> : vector<8xf32>
    %436 = vector.multi_reduction <add>, %435, %cst_181 [1] : vector<8x8xf32> to vector<8xf32>
    %437 = vector.shape_cast %436 : vector<8xf32> to vector<8x1xf32>
    %438 = tpu.reciprocal %437 {approx = true} : vector<8x1xf32> -> vector<8x1xf32>
    %439 = vector.broadcast %438 : vector<8x1xf32> to vector<8x8xf32>
    %440 = arith.mulf %435, %439 : vector<8x8xf32>
    %cst_182 = arith.constant dense<0.000000e+00> : vector<8x8xf32>
    %441 = tpu.matmul %440, %426, %cst_182 {dimension_numbers = #tpu.dot_dimension_numbers<[1], [0], [0], [1], [0, 0, 1, 1], [], []>} : vector<8x8xf32>, vector<8x8xf32>, vector<8x8xf32> -> vector<8x8xf32>
    %442 = vector.extract_strided_slice %317 {offsets = [40, 0], sizes = [8, 64], strides = [1, 1]} : vector<64x64xf32> to vector<8x64xf32>
    %cst_183 = arith.constant dense<0.000000e+00> : vector<8x64xf32>
    %443 = tpu.matmul %441, %442, %cst_183 {dimension_numbers = #tpu.dot_dimension_numbers<[1], [0], [0], [1], [0, 0, 1, 1], [], []>} : vector<8x8xf32>, vector<8x64xf32>, vector<8x64xf32> -> vector<8x64xf32>
    %444 = arith.addf %423, %443 : vector<8x64xf32>
    %445 = vector.extract_strided_slice %315 {offsets = [0, 48], sizes = [8, 8], strides = [1, 1]} : vector<8x192xf32> to vector<8x8xf32>
    %446 = vector.extract_strided_slice %315 {offsets = [0, 112], sizes = [8, 8], strides = [1, 1]} : vector<8x192xf32> to vector<8x8xf32>
    %447 = vector.extract_strided_slice %315 {offsets = [0, 176], sizes = [8, 8], strides = [1, 1]} : vector<8x192xf32> to vector<8x8xf32>
    %cst_184 = arith.constant dense<0.000000e+00> : vector<8x8xf32>
    %448 = tpu.matmul %445, %446, %cst_184 {dimension_numbers = #tpu.dot_dimension_numbers<[1], [1], [0], [0], [0, 0, 1, 0], [], []>} : vector<8x8xf32>, vector<8x8xf32>, vector<8x8xf32> -> vector<8x8xf32>
    %cst_185 = arith.constant 0.353553385 : f32
    %449 = vector.broadcast %cst_185 : f32 to vector<8x8xf32>
    %450 = arith.mulf %448, %449 : vector<8x8xf32>
    %451 = arith.select %29, %450, %1 : vector<8x8xi1>, vector<8x8xf32>
    %cst_186 = arith.constant dense<0xFF800000> : vector<8xf32>
    %452 = vector.multi_reduction <maximumf>, %451, %cst_186 [1] : vector<8x8xf32> to vector<8xf32>
    %453 = vector.shape_cast %452 : vector<8xf32> to vector<8x1xf32>
    %454 = vector.broadcast %453 : vector<8x1xf32> to vector<8x8xf32>
    %455 = arith.subf %451, %454 : vector<8x8xf32>
    %456 = math.exp %455 : vector<8x8xf32>
    %cst_187 = arith.constant dense<0.000000e+00> : vector<8xf32>
    %457 = vector.multi_reduction <add>, %456, %cst_187 [1] : vector<8x8xf32> to vector<8xf32>
    %458 = vector.shape_cast %457 : vector<8xf32> to vector<8x1xf32>
    %459 = tpu.reciprocal %458 {approx = true} : vector<8x1xf32> -> vector<8x1xf32>
    %460 = vector.broadcast %459 : vector<8x1xf32> to vector<8x8xf32>
    %461 = arith.mulf %456, %460 : vector<8x8xf32>
    %cst_188 = arith.constant dense<0.000000e+00> : vector<8x8xf32>
    %462 = tpu.matmul %461, %447, %cst_188 {dimension_numbers = #tpu.dot_dimension_numbers<[1], [0], [0], [1], [0, 0, 1, 1], [], []>} : vector<8x8xf32>, vector<8x8xf32>, vector<8x8xf32> -> vector<8x8xf32>
    %463 = vector.extract_strided_slice %317 {offsets = [48, 0], sizes = [8, 64], strides = [1, 1]} : vector<64x64xf32> to vector<8x64xf32>
    %cst_189 = arith.constant dense<0.000000e+00> : vector<8x64xf32>
    %464 = tpu.matmul %462, %463, %cst_189 {dimension_numbers = #tpu.dot_dimension_numbers<[1], [0], [0], [1], [0, 0, 1, 1], [], []>} : vector<8x8xf32>, vector<8x64xf32>, vector<8x64xf32> -> vector<8x64xf32>
    %465 = arith.addf %444, %464 : vector<8x64xf32>
    %466 = vector.extract_strided_slice %315 {offsets = [0, 56], sizes = [8, 8], strides = [1, 1]} : vector<8x192xf32> to vector<8x8xf32>
    %467 = vector.extract_strided_slice %315 {offsets = [0, 120], sizes = [8, 8], strides = [1, 1]} : vector<8x192xf32> to vector<8x8xf32>
    %468 = vector.extract_strided_slice %315 {offsets = [0, 184], sizes = [8, 8], strides = [1, 1]} : vector<8x192xf32> to vector<8x8xf32>
    %cst_190 = arith.constant dense<0.000000e+00> : vector<8x8xf32>
    %469 = tpu.matmul %466, %467, %cst_190 {dimension_numbers = #tpu.dot_dimension_numbers<[1], [1], [0], [0], [0, 0, 1, 0], [], []>} : vector<8x8xf32>, vector<8x8xf32>, vector<8x8xf32> -> vector<8x8xf32>
    %cst_191 = arith.constant 0.353553385 : f32
    %470 = vector.broadcast %cst_191 : f32 to vector<8x8xf32>
    %471 = arith.mulf %469, %470 : vector<8x8xf32>
    %472 = arith.select %33, %471, %1 : vector<8x8xi1>, vector<8x8xf32>
    %cst_192 = arith.constant dense<0xFF800000> : vector<8xf32>
    %473 = vector.multi_reduction <maximumf>, %472, %cst_192 [1] : vector<8x8xf32> to vector<8xf32>
    %474 = vector.shape_cast %473 : vector<8xf32> to vector<8x1xf32>
    %475 = vector.broadcast %474 : vector<8x1xf32> to vector<8x8xf32>
    %476 = arith.subf %472, %475 : vector<8x8xf32>
    %477 = math.exp %476 : vector<8x8xf32>
    %cst_193 = arith.constant dense<0.000000e+00> : vector<8xf32>
    %478 = vector.multi_reduction <add>, %477, %cst_193 [1] : vector<8x8xf32> to vector<8xf32>
    %479 = vector.shape_cast %478 : vector<8xf32> to vector<8x1xf32>
    %480 = tpu.reciprocal %479 {approx = true} : vector<8x1xf32> -> vector<8x1xf32>
    %481 = vector.broadcast %480 : vector<8x1xf32> to vector<8x8xf32>
    %482 = arith.mulf %477, %481 : vector<8x8xf32>
    %cst_194 = arith.constant dense<0.000000e+00> : vector<8x8xf32>
    %483 = tpu.matmul %482, %468, %cst_194 {dimension_numbers = #tpu.dot_dimension_numbers<[1], [0], [0], [1], [0, 0, 1, 1], [], []>} : vector<8x8xf32>, vector<8x8xf32>, vector<8x8xf32> -> vector<8x8xf32>
    %484 = vector.extract_strided_slice %317 {offsets = [56, 0], sizes = [8, 64], strides = [1, 1]} : vector<64x64xf32> to vector<8x64xf32>
    %cst_195 = arith.constant dense<0.000000e+00> : vector<8x64xf32>
    %485 = tpu.matmul %483, %484, %cst_195 {dimension_numbers = #tpu.dot_dimension_numbers<[1], [0], [0], [1], [0, 0, 1, 1], [], []>} : vector<8x8xf32>, vector<8x64xf32>, vector<8x64xf32> -> vector<8x64xf32>
    %486 = arith.addf %465, %485 : vector<8x64xf32>
    %487 = arith.addf %283, %486 : vector<8x64xf32>
    %c1_196 = arith.constant 1 : index
    %c0_197 = arith.constant 0 : index
    %c0_198 = arith.constant 0 : index
    %488 = vector.load %arg8[%c1_196, %c0_197, %c0_198] : memref<2x1x64xf32, #tpu.memory_space<vmem>>, vector<1x1x64xf32>
    %489 = vector.shape_cast %488 : vector<1x1x64xf32> to vector<1x64xf32>
    %490 = vector.broadcast %489 : vector<1x64xf32> to vector<8x64xf32>
    %491 = arith.addf %487, %490 : vector<8x64xf32>
    %c1_199 = arith.constant 1 : index
    %c0_200 = arith.constant 0 : index
    %c0_201 = arith.constant 0 : index
    %492 = vector.load %arg9[%c1_199, %c0_200, %c0_201] : memref<2x1x64xf32, #tpu.memory_space<vmem>>, vector<1x1x64xf32>
    %493 = vector.shape_cast %492 : vector<1x1x64xf32> to vector<1x64xf32>
    %c1_202 = arith.constant 1 : index
    %c0_203 = arith.constant 0 : index
    %c0_204 = arith.constant 0 : index
    %494 = vector.load %arg10[%c1_202, %c0_203, %c0_204] : memref<2x1x64xf32, #tpu.memory_space<vmem>>, vector<1x1x64xf32>
    %495 = vector.shape_cast %494 : vector<1x1x64xf32> to vector<1x64xf32>
    %cst_205 = arith.constant dense<0.000000e+00> : vector<8xf32>
    %496 = vector.multi_reduction <add>, %491, %cst_205 [1] : vector<8x64xf32> to vector<8xf32>
    %497 = vector.shape_cast %496 : vector<8xf32> to vector<8x1xf32>
    %cst_206 = arith.constant 6.400000e+01 : f32
    %498 = vector.broadcast %cst_206 : f32 to vector<8x1xf32>
    %499 = arith.divf %497, %498 : vector<8x1xf32>
    %500 = vector.broadcast %499 : vector<8x1xf32> to vector<8x64xf32>
    %501 = arith.subf %491, %500 : vector<8x64xf32>
    %502 = arith.mulf %501, %501 : vector<8x64xf32>
    %cst_207 = arith.constant dense<0.000000e+00> : vector<8xf32>
    %503 = vector.multi_reduction <add>, %502, %cst_207 [1] : vector<8x64xf32> to vector<8xf32>
    %504 = vector.shape_cast %503 : vector<8xf32> to vector<8x1xf32>
    %cst_208 = arith.constant 0.0158730168 : f32
    %505 = vector.broadcast %cst_208 : f32 to vector<8x1xf32>
    %506 = arith.mulf %504, %505 : vector<8x1xf32>
    %507 = math.sqrt %506 : vector<8x1xf32>
    %cst_209 = arith.constant 1.000000e+06 : f32
    %508 = vector.broadcast %cst_209 : f32 to vector<8x1xf32>
    %509 = arith.addf %507, %508 : vector<8x1xf32>
    %510 = tpu.reciprocal %509 {approx = true} : vector<8x1xf32> -> vector<8x1xf32>
    %511 = vector.broadcast %493 : vector<1x64xf32> to vector<8x64xf32>
    %512 = arith.mulf %511, %501 : vector<8x64xf32>
    %513 = vector.broadcast %510 : vector<8x1xf32> to vector<8x64xf32>
    %514 = arith.mulf %512, %513 : vector<8x64xf32>
    %515 = vector.broadcast %495 : vector<1x64xf32> to vector<8x64xf32>
    %516 = arith.addf %514, %515 : vector<8x64xf32>
    %c1_210 = arith.constant 1 : index
    %c0_211 = arith.constant 0 : index
    %c0_212 = arith.constant 0 : index
    %517 = vector.load %arg11[%c1_210, %c0_211, %c0_212] : memref<2x64x64xf32, #tpu.memory_space<vmem>>, vector<1x64x64xf32>
    %518 = vector.shape_cast %517 : vector<1x64x64xf32> to vector<64x64xf32>
    %cst_213 = arith.constant dense<0.000000e+00> : vector<8x64xf32>
    %519 = tpu.matmul %516, %518, %cst_213 {dimension_numbers = #tpu.dot_dimension_numbers<[1], [0], [0], [1], [0, 0, 1, 1], [], []>} : vector<8x64xf32>, vector<64x64xf32>, vector<8x64xf32> -> vector<8x64xf32>
    %c1_214 = arith.constant 1 : index
    %c0_215 = arith.constant 0 : index
    %c0_216 = arith.constant 0 : index
    %520 = vector.load %arg12[%c1_214, %c0_215, %c0_216] : memref<2x1x64xf32, #tpu.memory_space<vmem>>, vector<1x1x64xf32>
    %521 = vector.shape_cast %520 : vector<1x1x64xf32> to vector<1x64xf32>
    %522 = vector.broadcast %521 : vector<1x64xf32> to vector<8x64xf32>
    %523 = arith.addf %519, %522 : vector<8x64xf32>
    %cst_217 = arith.constant 0.000000e+00 : f32
    %524 = vector.broadcast %cst_217 : f32 to vector<8x64xf32>
    %525 = arith.maximumf %523, %524 : vector<8x64xf32>
    %c1_218 = arith.constant 1 : index
    %c0_219 = arith.constant 0 : index
    %c0_220 = arith.constant 0 : index
    %526 = vector.load %arg13[%c1_218, %c0_219, %c0_220] : memref<2x64x64xf32, #tpu.memory_space<vmem>>, vector<1x64x64xf32>
    %527 = vector.shape_cast %526 : vector<1x64x64xf32> to vector<64x64xf32>
    %cst_221 = arith.constant dense<0.000000e+00> : vector<8x64xf32>
    %528 = tpu.matmul %525, %527, %cst_221 {dimension_numbers = #tpu.dot_dimension_numbers<[1], [0], [0], [1], [0, 0, 1, 1], [], []>} : vector<8x64xf32>, vector<64x64xf32>, vector<8x64xf32> -> vector<8x64xf32>
    %529 = arith.addf %491, %528 : vector<8x64xf32>
    %c1_222 = arith.constant 1 : index
    %c0_223 = arith.constant 0 : index
    %c0_224 = arith.constant 0 : index
    %530 = vector.load %arg14[%c1_222, %c0_223, %c0_224] : memref<2x1x64xf32, #tpu.memory_space<vmem>>, vector<1x1x64xf32>
    %531 = vector.shape_cast %530 : vector<1x1x64xf32> to vector<1x64xf32>
    %532 = vector.broadcast %531 : vector<1x64xf32> to vector<8x64xf32>
    %533 = arith.addf %529, %532 : vector<8x64xf32>
    %c0_225 = arith.constant 0 : index
    %c0_226 = arith.constant 0 : index
    %534 = vector.load %arg15[%c0_225, %c0_226] : memref<1x64xf32, #tpu.memory_space<vmem>>, vector<1x64xf32>
    %c0_227 = arith.constant 0 : index
    %c0_228 = arith.constant 0 : index
    %535 = vector.load %arg16[%c0_227, %c0_228] : memref<1x64xf32, #tpu.memory_space<vmem>>, vector<1x64xf32>
    %cst_229 = arith.constant dense<0.000000e+00> : vector<8xf32>
    %536 = vector.multi_reduction <add>, %533, %cst_229 [1] : vector<8x64xf32> to vector<8xf32>
    %537 = vector.shape_cast %536 : vector<8xf32> to vector<8x1xf32>
    %cst_230 = arith.constant 6.400000e+01 : f32
    %538 = vector.broadcast %cst_230 : f32 to vector<8x1xf32>
    %539 = arith.divf %537, %538 : vector<8x1xf32>
    %540 = vector.broadcast %539 : vector<8x1xf32> to vector<8x64xf32>
    %541 = arith.subf %533, %540 : vector<8x64xf32>
    %542 = arith.mulf %541, %541 : vector<8x64xf32>
    %cst_231 = arith.constant dense<0.000000e+00> : vector<8xf32>
    %543 = vector.multi_reduction <add>, %542, %cst_231 [1] : vector<8x64xf32> to vector<8xf32>
    %544 = vector.shape_cast %543 : vector<8xf32> to vector<8x1xf32>
    %cst_232 = arith.constant 0.0158730168 : f32
    %545 = vector.broadcast %cst_232 : f32 to vector<8x1xf32>
    %546 = arith.mulf %544, %545 : vector<8x1xf32>
    %547 = math.sqrt %546 : vector<8x1xf32>
    %cst_233 = arith.constant 1.000000e+06 : f32
    %548 = vector.broadcast %cst_233 : f32 to vector<8x1xf32>
    %549 = arith.addf %547, %548 : vector<8x1xf32>
    %550 = tpu.reciprocal %549 {approx = true} : vector<8x1xf32> -> vector<8x1xf32>
    %551 = vector.broadcast %534 : vector<1x64xf32> to vector<8x64xf32>
    %552 = arith.mulf %551, %541 : vector<8x64xf32>
    %553 = vector.broadcast %550 : vector<8x1xf32> to vector<8x64xf32>
    %554 = arith.mulf %552, %553 : vector<8x64xf32>
    %555 = vector.broadcast %535 : vector<1x64xf32> to vector<8x64xf32>
    %556 = arith.addf %554, %555 : vector<8x64xf32>
    %c0_234 = arith.constant 0 : index
    %c0_235 = arith.constant 0 : index
    %557 = vector.load %arg17[%c0_234, %c0_235] : memref<8x64xf32, #tpu.memory_space<vmem>>, vector<8x64xf32>
    tpu.vector_store %arg17[%c0_234, %c0_235], %556 {strides = array<i32>} : memref<8x64xf32, #tpu.memory_space<vmem>>, vector<8x64xf32>,
    return
  }
}

</mosaic_0001>

<bundles_post_ra>
// kernel: encoder_forward.1
= control target key start
LH: loop header
LB: loop body
LE: loop exit
PB: predicated region body
PF: predicated region fallthrough
CT: control target
= control target key end

     0   :  { %s6471_s0 = inlined_call_operand.vmem [shape: f32[8,64], index: 0, kind: input, shape index: {}]   ;;  %s6472_s1 = inlined_call_operand.vmem [shape: f32[8,8,8], index: 1, kind: input, shape index: {}]   ;;  %s6473_s2 = inlined_call_operand.vmem [shape: f32[8,8], index: 2, kind: input, shape index: {}]   ;;  %s6474_s3 = inlined_call_operand.vmem [shape: f32[2,1,64], index: 3, kind: input, shape index: {}]   ;;  %s6475_s4 = inlined_call_operand.vmem [shape: f32[2,1,64], index: 4, kind: input, shape index: {}]   ;;  %s6476_s5 = inlined_call_operand.vmem [shape: f32[2,64,192], index: 5, kind: input, shape index: {}]   ;;  %s6477_s6 = inlined_call_operand.vmem [shape: f32[2,1,192], index: 6, kind: input, shape index: {}]   ;;  %s6478_s7 = inlined_call_operand.vmem [shape: f32[2,64,64], index: 7, kind: input, shape index: {}]   ;;  %s6479_s8 = inlined_call_operand.vmem [shape: f32[2,1,64], index: 8, kind: input, shape index: {}]   ;;  %s6480_s9 = inlined_call_operand.vmem [shape: f32[2,1,64], index: 9, kind: input, shape index: {}]   ;;  %s6481_s10 = inlined_call_operand.vmem [shape: f32[2,1,64], index: 10, kind: input, shape index: {}]   ;;  %s6482_s11 = inlined_call_operand.hbm [shape: f32[2,64,64], index: 11, kind: input, shape index: {}]   ;;  %s6483_s12 = inlined_call_operand.vmem [shape: f32[2,1,64], index: 12, kind: input, shape index: {}]   ;;  %s6484_s13 = inlined_call_operand.hbm [shape: f32[2,64,64], index: 13, kind: input, shape index: {}]   ;;  %s6485_s14 = inlined_call_operand.vmem [shape: f32[2,1,64], index: 14, kind: input, shape index: {}]   ;;  %s6486_s15 = inlined_call_operand.vmem [shape: f32[1,64], index: 15, kind: input, shape index: {}]   ;;  %s6487_s16 = inlined_call_operand.vmem [shape: f32[1,64], index: 16, kind: input, shape index: {}]   ;;  %s6488_s17 = inlined_call_operand.hbm [shape: f32[8,64], index: 17, kind: output, shape index: {}]  }
   0x1   :  { %6502 = sst [smem:[#allocation11_spill]] %s6471_s0 }
   0x2   :  { %6503 = sst [smem:[#allocation12_spill]] %s6472_s1 }
   0x3   :  { %22 = vsyncpa [#allocation3], 0 }
   0x4   :  { %23 = vsyncpa [#allocation6], 0 }
   0x5   :  { %24 = vsyncpa [#allocation4], 0  ;;  %s5596_s24 = smov [#allocation2]   ;;  %s5524_s28 = scalar_lea.hbm %s6482_s11, 2048 }
   0x6   :  { %s52_s25 = sshll.u32 %s5596_s24, 4  ;;  %p5525_p0 = scmp.ne.s32.totalorder %s6482_s11, %s5524_s28  ;;  %s53_s25 = int_to_ptr.vmem [resolvable:$true] %s52_s25 }
   0x7   :  { %p5528_p1 = scmp.lt.u32.totalorder %s5524_s28, %s6482_s11 }
   0x9   :  { %p5530_p2 = pnand %p5528_p1, %p5525_p0 }
   0xb   :  { %5533 = shalt.err (!%p5530_p2)
}
   0xc   :  { %s5534_s19 = scalar_lea.vmem %s53_s25, 2048  ;;  %p5539_p4 = scmp.lt.s32.totalorder %s53_s25, %s53_s25 }
   0xd   :  { %p5535_p3 = scmp.ne.s32.totalorder %s53_s25, %s5534_s19  ;;  %p5540_p5 = scmp.lt.s32.totalorder %s5534_s19, %s5534_s19 }
   0xf   :  { %p5541_p6 = por %p5540_p5, %p5539_p4 }
  0x11   :  { %p5542_p7 = pnand %p5541_p6, %p5535_p3 }
  0x13   :  { %5545 = shalt.err (!%p5542_p7)
}
  0x14   :  { %s5597_s1 = smov 128   ;;  %s6492_s20 = smov 8  }
  0x15   :  { %58 = dma.hbm_to_vmem [thread:$0]  %s6482_s11, 2048, %s53_s25, [#allocation3], %s5597_s1, %s5597_s1, %s6492_s20  }
  0x16   :  { %s5599_s23 = smov [#allocation5]   ;;  %s5546_s28 = scalar_lea.hbm %s6484_s13, 2048 }
  0x17   :  { %s66_s24 = sshll.u32 %s5599_s23, 4  ;;  %p5547_p8 = scmp.ne.s32.totalorder %s6484_s13, %s5546_s28  ;;  %s67_s24 = int_to_ptr.vmem [resolvable:$true] %s66_s24 }
  0x18   :  { %p5550_p9 = scmp.lt.u32.totalorder %s5546_s28, %s6484_s13 }
  0x1a   :  { %p5552_p10 = pnand %p5550_p9, %p5547_p8 }
  0x1c   :  { %5555 = shalt.err (!%p5552_p10)
}
  0x1d   :  { %s5556_s19 = scalar_lea.vmem %s67_s24, 2048  ;;  %p5561_p12 = scmp.lt.s32.totalorder %s67_s24, %s67_s24 }
  0x1e   :  { %p5557_p11 = scmp.ne.s32.totalorder %s67_s24, %s5556_s19  ;;  %p5562_p13 = scmp.lt.s32.totalorder %s5556_s19, %s5556_s19 }
  0x20   :  { %p5563_p0 = por %p5562_p13, %p5561_p12 }
  0x22   :  { %p5564_p1 = pnand %p5563_p0, %p5557_p11 }
  0x24   :  { %5567 = shalt.err (!%p5564_p1)
}
  0x25   :  { %72 = dma.hbm_to_vmem [thread:$0]  %s6484_s13, 2048, %s67_s24, [#allocation6], %s5597_s1, %s5597_s1, %s6492_s20  }
  0x26   :  { %5590 = dma.done.wait [#allocation3], 2048  }
  0x27   :  { %5591 = vsyncadd [#allocation3], 4294965248 }
  0x28   :  { %5592 = dma.done.wait [#allocation6], 2048  }
  0x29   :  { %5593 = vsyncadd [#allocation6], 4294965248  ;;  %vm112_vm0 = vcmask 523264   ;;  %s6504_s23 = sld [smem:[#allocation11_spill]]  ;;  %v149_v7 = vld [vmem:[%s6476_s5 + $0x8] sm:$0xff]  ;;  %v151_v8 = vld [vmem:[%s6476_s5 + $0x18] sm:$0xff]  ;;  %v166_v46 = vlaneseq }
  0x2a   :  { %v5337_v9 = vpack.c.bf16 %v151_v8, %v149_v7  ;;  %v148_v10 = vld [vmem:[%s6476_s5] sm:$0xff]  ;;  %v150_v11 = vld [vmem:[%s6476_s5 + $0x10] sm:$0xff]  ;;  %v153_v12 = vld [vmem:[%s6476_s5 + $0x28] sm:$0xff]  ;;  %v5600_v17 = vmov 0.0   ;;  %vm5601_vm3 = vmmov 0   ;;  %s5602_s29 = smov 56  }
  0x2b   :  { %v5339_v13 = vpack.c.bf16 %v150_v11, %v148_v10  ;;  %v155_v14 = vld [vmem:[%s6476_s5 + $0x38] sm:$0xff]  ;;  %v152_v15 = vld [vmem:[%s6476_s5 + $0x20] sm:$0xff]  ;;  %v154_v16 = vld [vmem:[%s6476_s5 + $0x30] sm:$0xff]  ;;  %243 = vmatprep.mubr.f32.mxu0 %v5600_v17  ;;  %5021 = vmatprep.subr.mxu1 %v5600_v17  ;;  %v5801_v47 = vshrl.u32 %v166_v46, 7  ;;  %s5603_s0 = smov 64   ;;  %vm261_vm4 = vcmask 64512  }
  0x2c   :  { %5338 = vmatprep.subr.bf16.mxu0 %v5337_v9  ;;  %v5341_v18 = vpack.c.bf16 %v155_v14, %v153_v12  ;;  %v157_v19 = vld [vmem:[%s6476_s5 + $0x48] sm:$0xff]  ;;  %v159_v20 = vld [vmem:[%s6476_s5 + $0x58] sm:$0xff]  ;;  %v5343_v21 = vpack.c.bf16 %v154_v16, %v152_v15  ;;  %v156_v23 = vld [vmem:[%s6476_s5 + $0x40] sm:$0xff]  ;;  %5023 = vmatprep.mubr.msk.f32.mxu1 %vm5601_vm3, %v5600_v17  ;;  %s6505_s19 = sld [smem:[#allocation12_spill]]  ;;  %s5604_s21 = smov 120  }
  0x2d   :  { %5340 = vmatpush1.bf16.msra.mxu0 %v5339_v13  ;;  %v5345_v22 = vpack.c.bf16 %v159_v20, %v157_v19  ;;  %v158_v24 = vld [vmem:[%s6476_s5 + $0x50] sm:$0xff]  ;;  %v161_v25 = vld [vmem:[%s6476_s5 + $0x68] sm:$0xff]  ;;  %v163_v26 = vld [vmem:[%s6476_s5 + $0x78] sm:$0xff]  ;;  %v168_v48 = vsub.s32 0, %v5801_v47  ;;  %v172_v54 = vsub.s32 1, %v5801_v47  ;;  %s5605_s13 = smov 48  }
  0x2e   :  { %5342 = vmatprep.subr.bf16.mxu0 %v5341_v18  ;;  %v5347_v27 = vpack.c.bf16 %v158_v24, %v156_v23  ;;  %v5349_v28 = vpack.c.bf16 %v163_v26, %v161_v25  ;;  %v160_v29 = vld [vmem:[%s6476_s5 + $0x60] sm:$0xff]  ;;  %v162_v30 = vld [vmem:[%s6476_s5 + $0x70] sm:$0xff]  ;;  %s5606_s1 = smov 112   ;;  %v251_v26 = vld [vmem:[%s6478_s7 + $0x8] sm:$0xff]  ;;  %s5607_s11 = smov 40  }
  0x2f   :  { %v5737_v0 = vld [vmem:[%s6504_s23] sm:$0xff]  ;;  %v5351_v31 = vpack.c.bf16 %v162_v30, %v160_v29  ;;  %s5608_s25 = smov 104   ;;  %s6499_s22 = smov 32  }
  0x30   :  { %v113_v1 = vsel %vm112_vm0, %v5737_v0, 0.0  ;;  %v4771_v40 = vld [vmem:[%s6474_s3] ss:$0 sm:$0xff]  ;;  %s6500_s28 = smov 96   ;;  %s6491_s26 = smov 24  }
  0x31   :  { %114 = vadd.xlane.f32.xlu0 %v113_v1  ;;  %5344 = vmatpush1.bf16.msra.mxu0 %v5343_v21  ;;  %v4772_v43 = vld [vmem:[%s6475_s4] ss:$0 sm:$0xff]  ;;  %s6497_s27 = smov 88   ;;  %s6490_s30 = smov 16  }
  0x32   :  { %5346 = vmatprep.subr.bf16.mxu0 %v5345_v22  ;;  %v164_v49 = vld [vmem:[%s6477_s6] sm:$0x3]  ;;  %v5861_v14 = vld [vmem:[%s6505_s19 + $0x8] sm:$0xff]  ;;  %s6495_s23 = smov 80   ;;  %s6510_s18 = smov 16  }
  0x33   :  { %v169_v50 = vrot.slane %v164_v49, %v168_v48  ;;  %v173_v55 = vrot.slane %v164_v49, %v172_v54  ;;  %v5835_v58 = vld [vmem:[%s6505_s19] sm:$0xff]  ;;  %vm91_vm6 = vcmp.ne.f32.partialorder %v5861_v14, 0.0 }
  0x34   :  { %v5840_v60 = vld [vmem:[%s6473_s2] sm:$0xff]  ;;  %vm88_vm5 = vcmp.ne.f32.partialorder %v5835_v58, 0.0 }
  0x35   :  { %5348 = vmatpush1.bf16.msra.mxu0 %v5347_v27 }
  0x36   :  { %5350 = vmatprep.subr.bf16.mxu0 %v5349_v28 }
  0x39   :  { %5352 = vmatpush1.bf16.msra.mxu0 %v5351_v31  ;;  %v250_v31 = vld [vmem:[%s6478_s7] sm:$0xff] }
  0x3a   :  { %5041 = vmatprep.subr.mxu0 %v5600_v17 }
  0xbe   :  { %v115_v2 = vpop.xlane.xlu0 %114 }
  0xbf   :  { %v117_v3 = vmul.f32 0.015625, %v115_v2 }
  0xc1   :  { %v118_v4 = vsub.f32 %v5737_v0, %v117_v3 }
  0xc3   :  { %v119_v5 = vmul.f32 %v118_v4, %v118_v4  ;;  %v139_v41 = vmul.f32 %v4771_v40, %v118_v4 }
  0xc5   :  { %v120_v6 = vsel %vm112_vm0, %v119_v5, 0.0 }
  0xc6   :  { %121 = vadd.xlane.f32.xlu0 %v120_v6 }
 0x153   :  { %v122_v32 = vpop.xlane.xlu0 %121 }
 0x154   :  { %v123_v33 = vmul.f32 0.015873017, %v122_v32 }
 0x156   :  { %5439 = vrsqrt.f32 %v123_v33  ;;  %vm126_vm1 = vcmp.eq.f32.partialorder %v123_v33, inf  ;;  %v129_v36 = vand.u32 2147483648, %v123_v33  ;;  %vm128_vm2 = vcmp.eq.f32.partialorder %v123_v33, 0.0 }
 0x160   :  { %v5440_v34 = vpop.eup %5439 }
 0x161   :  { %v125_v35 = vmul.f32 %v5440_v34, %v123_v33 }
 0x163   :  { %v127_v37 = vsel %vm126_vm1, %v123_v33, %v125_v35 }
 0x164   :  { %v130_v38 = vsel %vm128_vm2, %v129_v36, %v127_v37 }
 0x165   :  { %v131_v39 = vadd.f32 1000000.0, %v130_v38 }
 0x167   :  { %5441 = vrcp.f32 %v131_v39 }
 0x171   :  { %v5442_v42 = vpop.eup %5441 }
 0x172   :  { %v140_v44 = vmul.f32 %v5442_v42, %v139_v41  ;;  %v5903_v41 = vld [vmem:[%s6505_s19 + $0x10] sm:$0xff] }
 0x173   :  { %vm94_vm7 = vcmp.ne.f32.partialorder %v5903_v41, 0.0 }
 0x174   :  { %v147_v45 = vadd.f32 %v4772_v43, %v140_v44 }
 0x176   :  { %4773 = vmatmul.mubr.msk.f32.vlgmr.msra.gmra.mrb[0].mxu0 %vm112_vm0, %v147_v45 }
 0x177   :  { %5043 = vmatprep.mubr.msk.f32.mxu0 %vm5601_vm3, %v5600_v17  ;;  %5042 = vmatpush3.msra.mxu0 %v251_v26 }
 0x178   :  { %5051 = vmatprep.subr.mxu0 %v5600_v17 }
 0x249   :  { %v245_v51 = vpop.f32.mrb[0].mxu0 }
 0x24a   :  { %v5813_v52 = vadd.f32 %v245_v51, %v169_v50  ;;  %v247_v53 = vpop.f32.mrb[1].mxu0 }
 0x24b   :  { %v5824_v57 = vadd.f32 %v247_v53, %v173_v55 }
 0x24c   :  { %424 = vrot.lane.b32.xlu0 %v5813_v52, %s5602_s29  ;;  %259 = vrot.lane.b32.xlu1 %v5813_v52, %s5603_s0 }
 0x2be   :  { %v260_v56 = vpop.permute.xlu1 %259  ;;  %v425_v7 = vpop.permute.xlu0 %424 }
 0x2bf   :  { %5022 = vmatpush3.xpose.msk.msra.mxu1 %vm261_vm4, %v260_v56 }
 0x2c0   :  { %5026 = vmatprep.subr.mxu1 %v5600_v17 }
 0x2c2   :  { %5024 = vmatmul.mubr.msk.f32.vlgmr.msra.gmra.mrb[0].mxu1 %vm261_vm4, %v5813_v52 }
 0x2c3   :  { %5027 = vmatpush3.msra.mxu1 %v5824_v57  ;;  %5028 = vmatprep.mubr.msk.f32.mxu1 %vm5601_vm3, %v5600_v17 }
 0x2c4   :  { %5031 = vmatprep.subr.mxu1 %v5600_v17 }
 0x395   :  { %v332_v59 = vpop.f32.mrb[0].mxu1 }
 0x396   :  { %v336_v61 = vmul.f32 0.35355338, %v332_v59  ;;  %v5025_v62 = vpop.f32.mrb[1].mxu1  ;;  %v252_v59 = vld [vmem:[%s6478_s7 + $0x10] sm:$0xff] }
 0x398   :  { %v337_v63 = vsel %vm88_vm5, %v336_v61, %v5840_v60 }
 0x399   :  { %v338_v1 = vsel %vm261_vm4, %v337_v63, -inf }
 0x39a   :  { %339 = vmax.xlane.f32.xlu1 %v338_v1 }
 0x427   :  { %v340_v2 = vpop.xlane.xlu1 %339 }
 0x428   :  { %v341_v3 = vsub.f32 %v337_v63, %v340_v2 }
 0x42a   :  { %v342_v4 = vmul.f32 1.442695, %v341_v3 }
 0x42c   :  { %5443 = vpow2.f32 %v342_v4 }
 0x436   :  { %v5444_v5 = vpop.eup %5443 }
 0x437   :  { %v344_v6 = vsel %vm261_vm4, %v5444_v5, 0.0 }
 0x438   :  { %345 = vadd.xlane.f32.xlu0 %v344_v6  ;;  %v5938_v6 = vld [vmem:[%s6505_s19 + $0x18] sm:$0xff] }
 0x439   :  { %vm97_vm8 = vcmp.ne.f32.partialorder %v5938_v6, 0.0 }
 0x44e   :  { %422 = vrot.lane.b32.xlu0 %v5813_v52, %s5604_s21 }
 0x4c5   :  { %v346_v8 = vpop.xlane.xlu0 %345 }
 0x4c6   :  { %5445 = vrcp.f32 %v346_v8 }
 0x4c9   :  { %v423_v11 = vpop.permute.xlu0 %422 }
 0x4d0   :  { %v5446_v9 = vpop.eup %5445 }
 0x4d1   :  { %v348_v10 = vmul.f32 %v5446_v9, %v5444_v5 }
 0x4d3   :  { %5029 = vmatmul.mubr.msk.f32.vlgmr.msra.gmra.mrb[2].mxu1 %vm261_vm4, %v348_v10 }
 0x4d4   :  { %5032 = vmatpush3.xpose.msk.msra.mxu1 %vm261_vm4, %v425_v7  ;;  %5033 = vmatprep.mubr.msk.f32.mxu1 %vm5601_vm3, %v5600_v17 }
 0x4d5   :  { %5036 = vmatprep.subr.mxu1 %v5600_v17 }
 0x4d7   :  { %5034 = vmatmul.mubr.msk.f32.vlgmr.msra.gmra.mrb[4].mxu1 %vm261_vm4, %v423_v11 }
 0x4d8   :  { %5038 = vmatprep.mubr.msk.f32.mxu1 %vm5601_vm3, %v5600_v17 }
 0x5a6   :  { %v418_v12 = vpop.f32.mrb[2].mxu1 }
 0x5a7   :  { %v5030_v13 = vpop.f32.mrb[3].mxu1 }
 0x5aa   :  { %v496_v15 = vpop.f32.mrb[4].mxu1 }
 0x5ab   :  { %v500_v16 = vmul.f32 0.35355338, %v496_v15  ;;  %v5035_v18 = vpop.f32.mrb[5].mxu1 }
 0x5ad   :  { %v501_v19 = vsel %vm91_vm6, %v500_v16, %v5840_v60 }
 0x5ae   :  { %v502_v20 = vsel %vm261_vm4, %v501_v19, -inf }
 0x5af   :  { %503 = vmax.xlane.f32.xlu0 %v502_v20 }
 0x63c   :  { %v504_v21 = vpop.xlane.xlu0 %503 }
 0x63d   :  { %v505_v22 = vsub.f32 %v501_v19, %v504_v21 }
 0x63f   :  { %v506_v23 = vmul.f32 1.442695, %v505_v22 }
 0x641   :  { %5447 = vpow2.f32 %v506_v23 }
 0x64b   :  { %v5448_v24 = vpop.eup %5447 }
 0x64c   :  { %v508_v25 = vsel %vm261_vm4, %v5448_v24, 0.0 }
 0x64d   :  { %509 = vadd.xlane.f32.xlu1 %v508_v25 }
 0x65e   :  { %514 = vrot.lane.b32.xlu1 %v5824_v57, %s5604_s21 }
 0x662   :  { %738 = vrot.lane.b32.xlu1 %v5813_v52, %s5605_s13 }
 0x666   :  { %736 = vrot.lane.b32.xlu1 %v5813_v52, %s5606_s1 }
 0x6da   :  { %v510_v27 = vpop.xlane.xlu1 %509 }
 0x6db   :  { %5449 = vrcp.f32 %v510_v27  ;;  %v253_v27 = vld [vmem:[%s6478_s7 + $0x18] sm:$0xff] }
 0x6de   :  { %v515_v28 = vpop.permute.xlu1 %514 }
 0x6df   :  { %5037 = vmatpush3.msra.mxu1 %v515_v28 }
 0x6e0   :  { %5046 = vmatprep.subr.mxu1 %v5600_v17 }
 0x6e2   :  { %v739_v32 = vpop.permute.xlu1 %738 }
 0x6e5   :  { %v5450_v29 = vpop.eup %5449 }
 0x6e6   :  { %v512_v30 = vmul.f32 %v5450_v29, %v5448_v24  ;;  %v737_v35 = vpop.permute.xlu1 %736 }
 0x6e8   :  { %5039 = vmatmul.mubr.msk.f32.vlgmr.msra.gmra.mrb[6].mxu1 %vm261_vm4, %v512_v30  ;;  %v5968_v30 = vld [vmem:[%s6505_s19 + $0x20] sm:$0xff] }
 0x6e9   :  { %5047 = vmatpush3.msra.mxu1 %v250_v31  ;;  %5048 = vmatprep.mubr.msk.f32.mxu1 %vm5601_vm3, %v5600_v17  ;;  %vm100_vm9 = vcmp.ne.f32.partialorder %v5968_v30, 0.0 }
 0x6ea   :  { %5056 = vmatprep.subr.mxu1 %v5600_v17 }
 0x6ec   :  { %5049 = vmatmul.mubr.msk.f32.vlgmr.msra.gmra.mrb[8].mxu1 %vm261_vm4, %v418_v12 }
 0x6ed   :  { %5058 = vmatprep.mubr.msk.f32.mxu1 %vm5601_vm3, %v5600_v17 }
 0x7bb   :  { %v586_v33 = vpop.f32.mrb[6].mxu1 }
 0x7bc   :  { %v5040_v34 = vpop.f32.mrb[7].mxu1  ;;  %5044 = vmatmul.mubr.msk.f32.vlgmr.msra.gmra.mrb[2].mxu0 %vm261_vm4, %v586_v33 }
 0x7bd   :  { %5052 = vmatpush3.xpose.msk.msra.mxu0 %vm261_vm4, %v739_v32  ;;  %5053 = vmatprep.mubr.msk.f32.mxu0 %vm5601_vm3, %v5600_v17 }
 0x7be   :  { %5061 = vmatprep.subr.mxu0 %v5600_v17 }
 0x7bf   :  { %v732_v36 = vpop.f32.mrb[8].mxu1 }
 0x7c0   :  { %v5050_v37 = vpop.f32.mrb[9].mxu1  ;;  %5054 = vmatmul.mubr.msk.f32.vlgmr.msra.gmra.mrb[4].mxu0 %vm261_vm4, %v737_v35 }
 0x7c1   :  { %5063 = vmatprep.mubr.msk.f32.mxu0 %vm5601_vm3, %v5600_v17  ;;  %5062 = vmatpush3.msra.mxu0 %v252_v59 }
 0x7c2   :  { %5071 = vmatprep.subr.mxu0 %v5600_v17 }
 0x88f   :  { %v659_v38 = vpop.f32.mrb[2].mxu0 }
 0x890   :  { %v5898_v39 = vadd.f32 %v732_v36, %v659_v38  ;;  %v5045_v40 = vpop.f32.mrb[3].mxu0 }
 0x893   :  { %v810_v42 = vpop.f32.mrb[4].mxu0 }
 0x894   :  { %v814_v43 = vmul.f32 0.35355338, %v810_v42  ;;  %v5055_v44 = vpop.f32.mrb[5].mxu0 }
 0x896   :  { %v815_v45 = vsel %vm94_vm7, %v814_v43, %v5840_v60  ;;  %v254_v43 = vld [vmem:[%s6478_s7 + $0x20] sm:$0xff] }
 0x897   :  { %v816_v46 = vsel %vm261_vm4, %v815_v45, -inf }
 0x898   :  { %817 = vmax.xlane.f32.xlu0 %v816_v46 }
 0x8ae   :  { %827 = vrot.lane.b32.xlu0 %v5824_v57, %s5606_s1 }
 0x8b2   :  { %979 = vrot.lane.b32.xlu0 %v5813_v52, %s5607_s11 }
 0x8b6   :  { %977 = vrot.lane.b32.xlu0 %v5813_v52, %s5608_s25 }
 0x925   :  { %v818_v49 = vpop.xlane.xlu0 %817 }
 0x926   :  { %v819_v50 = vsub.f32 %v815_v45, %v818_v49 }
 0x928   :  { %v820_v51 = vmul.f32 1.442695, %v819_v50 }
 0x929   :  { %v828_v53 = vpop.permute.xlu0 %827 }
 0x92a   :  { %5451 = vpow2.f32 %v820_v51  ;;  %5057 = vmatpush3.msra.mxu1 %v828_v53 }
 0x92b   :  { %5066 = vmatprep.subr.mxu1 %v5600_v17 }
 0x92d   :  { %v980_v63 = vpop.permute.xlu0 %979 }
 0x931   :  { %v978_v2 = vpop.permute.xlu0 %977 }
 0x934   :  { %v5452_v55 = vpop.eup %5451 }
 0x935   :  { %v822_v56 = vsel %vm261_vm4, %v5452_v55, 0.0 }
 0x936   :  { %823 = vadd.xlane.f32.xlu1 %v822_v56 }
 0x947   :  { %1068 = vrot.lane.b32.xlu1 %v5824_v57, %s5608_s25 }
 0x94b   :  { %1220 = vrot.lane.b32.xlu1 %v5813_v52, %s6499_s22  ;;  %s6508_s22 = smov 88  }
 0x9c3   :  { %v824_v61 = vpop.xlane.xlu1 %823 }
 0x9c4   :  { %5453 = vrcp.f32 %v824_v61 }
 0x9c7   :  { %v1069_v4 = vpop.permute.xlu1 %1068 }
 0x9cb   :  { %v1221_v22 = vpop.permute.xlu1 %1220 }
 0x9ce   :  { %v5454_v62 = vpop.eup %5453 }
 0x9cf   :  { %v826_v1 = vmul.f32 %v5454_v62, %v5452_v55  ;;  %v6005_v62 = vld [vmem:[%s6505_s19 + $0x28] sm:$0xff] }
 0x9d0   :  { %vm103_vm10 = vcmp.ne.f32.partialorder %v6005_v62, 0.0 }
 0x9d1   :  { %5059 = vmatmul.mubr.msk.f32.vlgmr.msra.gmra.mrb[10].mxu1 %vm261_vm4, %v826_v1 }
 0x9d2   :  { %5067 = vmatpush3.xpose.msk.msra.mxu1 %vm261_vm4, %v980_v63  ;;  %5068 = vmatprep.mubr.msk.f32.mxu1 %vm5601_vm3, %v5600_v17 }
 0x9d3   :  { %5076 = vmatprep.subr.mxu1 %v5600_v17 }
 0x9d5   :  { %5069 = vmatmul.mubr.msk.f32.vlgmr.msra.gmra.mrb[12].mxu1 %vm261_vm4, %v978_v2 }
 0x9d6   :  { %5078 = vmatprep.mubr.msk.f32.mxu1 %vm5601_vm3, %v5600_v17  ;;  %5077 = vmatpush3.msra.mxu1 %v253_v27 }
 0x9d7   :  { %5086 = vmatprep.subr.mxu1 %v5600_v17 }
 0xaa4   :  { %v899_v3 = vpop.f32.mrb[10].mxu1 }
 0xaa5   :  { %v5060_v5 = vpop.f32.mrb[11].mxu1  ;;  %5064 = vmatmul.mubr.msk.f32.vlgmr.msra.gmra.mrb[6].mxu0 %vm261_vm4, %v899_v3 }
 0xaa6   :  { %5072 = vmatpush3.msra.mxu0 %v1069_v4  ;;  %5073 = vmatprep.mubr.msk.f32.mxu0 %vm5601_vm3, %v5600_v17 }
 0xaa7   :  { %5081 = vmatprep.subr.mxu0 %v5600_v17 }
 0xaa8   :  { %v1051_v7 = vpop.f32.mrb[12].mxu1 }
 0xaa9   :  { %v1055_v8 = vmul.f32 0.35355338, %v1051_v7  ;;  %v5070_v9 = vpop.f32.mrb[13].mxu1 }
 0xaab   :  { %v1056_v10 = vsel %vm97_vm8, %v1055_v8, %v5840_v60 }
 0xaac   :  { %v1057_v11 = vsel %vm261_vm4, %v1056_v10, -inf }
 0xaad   :  { %1058 = vmax.xlane.f32.xlu0 %v1057_v11 }
 0xb3a   :  { %v1059_v12 = vpop.xlane.xlu0 %1058 }
 0xb3b   :  { %v1060_v13 = vsub.f32 %v1056_v10, %v1059_v12 }
 0xb3d   :  { %v1061_v15 = vmul.f32 1.442695, %v1060_v13 }
 0xb3f   :  { %5455 = vpow2.f32 %v1061_v15 }
 0xb49   :  { %v5456_v16 = vpop.eup %5455 }
 0xb4a   :  { %v1063_v18 = vsel %vm261_vm4, %v5456_v16, 0.0 }
 0xb4b   :  { %1064 = vadd.xlane.f32.xlu1 %v1063_v18 }
 0xb5c   :  { %1218 = vrot.lane.b32.xlu1 %v5813_v52, %s6500_s28 }
 0xb78   :  { %v972_v19 = vpop.f32.mrb[6].mxu0 }
 0xb79   :  { %v976_v20 = vadd.f32 %v972_v19, %v5898_v39  ;;  %v5065_v21 = vpop.f32.mrb[7].mxu0 }
 0xb7a   :  { %v255_v21 = vld [vmem:[%s6478_s7 + $0x28] sm:$0xff] }
 0xbd8   :  { %v1065_v23 = vpop.xlane.xlu1 %1064 }
 0xbd9   :  { %5457 = vrcp.f32 %v1065_v23 }
 0xbdc   :  { %v1219_v26 = vpop.permute.xlu1 %1218 }
 0xbe3   :  { %v5458_v24 = vpop.eup %5457 }
 0xbe4   :  { %v1067_v25 = vmul.f32 %v5458_v24, %v5456_v16  ;;  %v6034_v24 = vld [vmem:[%s6505_s19 + $0x30] sm:$0xff] }
 0xbe5   :  { %vm106_vm11 = vcmp.ne.f32.partialorder %v6034_v24, 0.0 }
 0xbe6   :  { %5074 = vmatmul.mubr.msk.f32.vlgmr.msra.gmra.mrb[8].mxu0 %vm261_vm4, %v1067_v25 }
 0xbe7   :  { %5082 = vmatpush3.xpose.msk.msra.mxu0 %vm261_vm4, %v1221_v22  ;;  %5083 = vmatprep.mubr.msk.f32.mxu0 %vm5601_vm3, %v5600_v17 }
 0xbe8   :  { %5091 = vmatprep.subr.mxu0 %v5600_v17 }
 0xbea   :  { %5084 = vmatmul.mubr.msk.f32.vlgmr.msra.gmra.mrb[10].mxu0 %vm261_vm4, %v1219_v26 }
 0xbeb   :  { %5093 = vmatprep.mubr.msk.f32.mxu0 %vm5601_vm3, %v5600_v17  ;;  %5092 = vmatpush3.msra.mxu0 %v254_v43 }
 0xbec   :  { %5101 = vmatprep.subr.mxu0 %v5600_v17 }
 0xcb9   :  { %v1140_v28 = vpop.f32.mrb[8].mxu0 }
 0xcba   :  { %v5075_v29 = vpop.f32.mrb[9].mxu0  ;;  %5079 = vmatmul.mubr.msk.f32.vlgmr.msra.gmra.mrb[14].mxu1 %vm261_vm4, %v1140_v28 }
 0xcbb   :  { %5088 = vmatprep.mubr.msk.f32.mxu1 %vm5601_vm3, %v5600_v17 }
 0xcbd   :  { %v1292_v31 = vpop.f32.mrb[10].mxu0 }
 0xcbe   :  { %v1296_v32 = vmul.f32 0.35355338, %v1292_v31  ;;  %v5085_v33 = vpop.f32.mrb[11].mxu0 }
 0xcc0   :  { %v1297_v34 = vsel %vm100_vm9, %v1296_v32, %v5840_v60 }
 0xcc1   :  { %v1298_v35 = vsel %vm261_vm4, %v1297_v34, -inf }
 0xcc2   :  { %1299 = vmax.xlane.f32.xlu0 %v1298_v35 }
 0xcd8   :  { %1309 = vrot.lane.b32.xlu0 %v5824_v57, %s6500_s28  ;;  %s6509_s28 = smov 24  }
 0xcdc   :  { %1461 = vrot.lane.b32.xlu0 %v5813_v52, %s6491_s26  ;;  %s6493_s26 = smov 72  }
 0xce0   :  { %1459 = vrot.lane.b32.xlu0 %v5813_v52, %s6497_s27 }
 0xd4f   :  { %v1300_v36 = vpop.xlane.xlu0 %1299 }
 0xd50   :  { %v1301_v37 = vsub.f32 %v1297_v34, %v1300_v36 }
 0xd52   :  { %v1302_v38 = vmul.f32 1.442695, %v1301_v37 }
 0xd53   :  { %v1310_v39 = vpop.permute.xlu0 %1309 }
 0xd54   :  { %5459 = vpow2.f32 %v1302_v38  ;;  %5087 = vmatpush3.msra.mxu1 %v1310_v39 }
 0xd55   :  { %5096 = vmatprep.subr.mxu1 %v5600_v17 }
 0xd57   :  { %v1462_v51 = vpop.permute.xlu0 %1461 }
 0xd5b   :  { %v1460_v55 = vpop.permute.xlu0 %1459 }
 0xd5e   :  { %v5460_v40 = vpop.eup %5459 }
 0xd5f   :  { %v1304_v42 = vsel %vm261_vm4, %v5460_v40, 0.0 }
 0xd60   :  { %1305 = vadd.xlane.f32.xlu1 %v1304_v42 }
 0xd71   :  { %1550 = vrot.lane.b32.xlu1 %v5824_v57, %s6497_s27  ;;  %s6513_s27 = smov 8  }
 0xd75   :  { %1702 = vrot.lane.b32.xlu1 %v5813_v52, %s6490_s30 }
 0xd8d   :  { %v1213_v44 = vpop.f32.mrb[14].mxu1 }
 0xd8e   :  { %v1217_v45 = vadd.f32 %v1213_v44, %v976_v20  ;;  %v5080_v46 = vpop.f32.mrb[15].mxu1 }
 0xded   :  { %v1306_v49 = vpop.xlane.xlu1 %1305 }
 0xdee   :  { %5461 = vrcp.f32 %v1306_v49 }
 0xdf1   :  { %v1551_v59 = vpop.permute.xlu1 %1550 }
 0xdf5   :  { %v1703_v15 = vpop.permute.xlu1 %1702 }
 0xdf8   :  { %v5462_v50 = vpop.eup %5461 }
 0xdf9   :  { %v1308_v53 = vmul.f32 %v5462_v50, %v5460_v40  ;;  %v6067_v50 = vld [vmem:[%s6505_s19 + $0x38] sm:$0xff]  ;;  %s6512_s19 = smov 72  }
 0xdfa   :  { %vm109_vm12 = vcmp.ne.f32.partialorder %v6067_v50, 0.0 }
 0xdfb   :  { %5089 = vmatmul.mubr.msk.f32.vlgmr.msra.gmra.mrb[16].mxu1 %vm261_vm4, %v1308_v53 }
 0xdfc   :  { %5097 = vmatpush3.xpose.msk.msra.mxu1 %vm261_vm4, %v1462_v51  ;;  %5098 = vmatprep.mubr.msk.f32.mxu1 %vm5601_vm3, %v5600_v17 }
 0xdfd   :  { %5106 = vmatprep.subr.mxu1 %v5600_v17 }
 0xdff   :  { %5099 = vmatmul.mubr.msk.f32.vlgmr.msra.gmra.mrb[18].mxu1 %vm261_vm4, %v1460_v55 }
 0xe00   :  { %5108 = vmatprep.mubr.msk.f32.mxu1 %vm5601_vm3, %v5600_v17  ;;  %5107 = vmatpush3.msra.mxu1 %v255_v21 }
 0xe01   :  { %5116 = vmatprep.subr.mxu1 %v5600_v17 }
 0xece   :  { %v1381_v56 = vpop.f32.mrb[16].mxu1 }
 0xecf   :  { %v5090_v61 = vpop.f32.mrb[17].mxu1  ;;  %5094 = vmatmul.mubr.msk.f32.vlgmr.msra.gmra.mrb[12].mxu0 %vm261_vm4, %v1381_v56 }
 0xed0   :  { %5102 = vmatpush3.msra.mxu0 %v1551_v59  ;;  %5103 = vmatprep.mubr.msk.f32.mxu0 %vm5601_vm3, %v5600_v17 }
 0xed1   :  { %5111 = vmatprep.subr.mxu0 %v5600_v17 }
 0xed2   :  { %v1533_v63 = vpop.f32.mrb[18].mxu1 }
 0xed3   :  { %v1537_v1 = vmul.f32 0.35355338, %v1533_v63  ;;  %v5100_v2 = vpop.f32.mrb[19].mxu1 }
 0xed5   :  { %v1538_v3 = vsel %vm103_vm10, %v1537_v1, %v5840_v60 }
 0xed6   :  { %v1539_v4 = vsel %vm261_vm4, %v1538_v3, -inf }
 0xed7   :  { %1540 = vmax.xlane.f32.xlu0 %v1539_v4  ;;  %v257_v4 = vld [vmem:[%s6478_s7 + $0x38] sm:$0xff] }
 0xf64   :  { %v1541_v5 = vpop.xlane.xlu0 %1540 }
 0xf65   :  { %v1542_v7 = vsub.f32 %v1538_v3, %v1541_v5 }
 0xf67   :  { %v1543_v8 = vmul.f32 1.442695, %v1542_v7 }
 0xf69   :  { %5463 = vpow2.f32 %v1543_v8 }
 0xf73   :  { %v5464_v9 = vpop.eup %5463 }
 0xf74   :  { %v1545_v10 = vsel %vm261_vm4, %v5464_v9, 0.0 }
 0xf75   :  { %1546 = vadd.xlane.f32.xlu1 %v1545_v10 }
 0xf86   :  { %1700 = vrot.lane.b32.xlu1 %v5813_v52, %s6495_s23 }
 0xfa2   :  { %v1454_v11 = vpop.f32.mrb[12].mxu0 }
 0xfa3   :  { %v1458_v12 = vadd.f32 %v1454_v11, %v1217_v45  ;;  %v5095_v13 = vpop.f32.mrb[13].mxu0  ;;  %v256_v45 = vld [vmem:[%s6478_s7 + $0x30] sm:$0xff] }
0x1002   :  { %v1547_v16 = vpop.xlane.xlu1 %1546 }
0x1003   :  { %5465 = vrcp.f32 %v1547_v16 }
0x1006   :  { %v1701_v20 = vpop.permute.xlu1 %1700 }
0x100d   :  { %v5466_v18 = vpop.eup %5465 }
0x100e   :  { %v1549_v19 = vmul.f32 %v5466_v18, %v5464_v9 }
0x1010   :  { %5104 = vmatmul.mubr.msk.f32.vlgmr.msra.gmra.mrb[14].mxu0 %vm261_vm4, %v1549_v19  ;;  %v4806_v19 = vld [vmem:[%s6479_s8] ss:$0 sm:$0xff] }
0x1011   :  { %5112 = vmatpush3.xpose.msk.msra.mxu0 %vm261_vm4, %v1703_v15  ;;  %5113 = vmatprep.mubr.msk.f32.mxu0 %vm5601_vm3, %v5600_v17 }
0x1012   :  { %5121 = vmatprep.subr.mxu0 %v5600_v17 }
0x1014   :  { %5114 = vmatmul.mubr.msk.f32.vlgmr.msra.gmra.mrb[16].mxu0 %vm261_vm4, %v1701_v20 }
0x1015   :  { %5123 = vmatprep.mubr.msk.f32.mxu0 %vm5601_vm3, %v5600_v17  ;;  %5122 = vmatpush3.msra.mxu0 %v256_v45 }
0x1016   :  { %5131 = vmatprep.subr.mxu0 %v5600_v17 }
0x10e3   :  { %v1622_v22 = vpop.f32.mrb[14].mxu0 }
0x10e4   :  { %v5105_v23 = vpop.f32.mrb[15].mxu0  ;;  %5109 = vmatmul.mubr.msk.f32.vlgmr.msra.gmra.mrb[20].mxu1 %vm261_vm4, %v1622_v22 }
0x10e5   :  { %5118 = vmatprep.mubr.msk.f32.mxu1 %vm5601_vm3, %v5600_v17 }
0x10e7   :  { %v1774_v25 = vpop.f32.mrb[16].mxu0 }
0x10e8   :  { %v1778_v26 = vmul.f32 0.35355338, %v1774_v25  ;;  %v5115_v27 = vpop.f32.mrb[17].mxu0 }
0x10ea   :  { %v1779_v28 = vsel %vm106_vm11, %v1778_v26, %v5840_v60 }
0x10eb   :  { %v1780_v29 = vsel %vm261_vm4, %v1779_v28, -inf }
0x10ec   :  { %1781 = vmax.xlane.f32.xlu0 %v1780_v29  ;;  %v2227_v29 = vld [vmem:[#allocation2] sm:$0xff] }
0x1102   :  { %1791 = vrot.lane.b32.xlu0 %v5824_v57, %s6495_s23 }
0x1106   :  { %1943 = vrot.lane.b32.xlu0 %v5813_v52, %s6492_s20 }
0x110a   :  { %1941 = vrot.lane.b32.xlu0 %v5813_v52, %s6493_s26 }
0x1179   :  { %v1782_v31 = vpop.xlane.xlu0 %1781 }
0x117a   :  { %v1783_v32 = vsub.f32 %v1779_v28, %v1782_v31  ;;  %v2228_v31 = vld [vmem:[#allocation2 + $0x8] sm:$0xff] }
0x117c   :  { %v1784_v33 = vmul.f32 1.442695, %v1783_v32  ;;  %v5354_v32 = vpack.c.bf16 %v2228_v31, %v2227_v29 }
0x117d   :  { %v1792_v34 = vpop.permute.xlu0 %1791 }
0x117e   :  { %5467 = vpow2.f32 %v1784_v33  ;;  %5117 = vmatpush3.msra.mxu1 %v1792_v34  ;;  %v5616_v33 = vmov 0.0|0.0   ;;  %v2230_v34 = vld [vmem:[#allocation2 + $0x18] sm:$0xff] }
0x117f   :  { %5126 = vmatprep.subr.mxu1 %v5600_v17 }
0x1181   :  { %v1944_v43 = vpop.permute.xlu0 %1943 }
0x1185   :  { %v1942_v44 = vpop.permute.xlu0 %1941 }
0x1188   :  { %v5468_v35 = vpop.eup %5467 }
0x1189   :  { %v1786_v36 = vsel %vm261_vm4, %v5468_v35, 0.0 }
0x118a   :  { %1787 = vadd.xlane.f32.xlu1 %v1786_v36  ;;  %v2231_v36 = vld [vmem:[#allocation2 + $0x20] sm:$0xff] }
0x11b7   :  { %v1695_v37 = vpop.f32.mrb[20].mxu1 }
0x11b8   :  { %v1699_v38 = vadd.f32 %v1695_v37, %v1458_v12  ;;  %v5110_v39 = vpop.f32.mrb[21].mxu1  ;;  %v2232_v37 = vld [vmem:[#allocation2 + $0x28] sm:$0xff] }
0x11b9   :  { %v2233_v39 = vld [vmem:[#allocation2 + $0x30] sm:$0xff] }
0x1217   :  { %v1788_v40 = vpop.xlane.xlu1 %1787 }
0x1218   :  { %5469 = vrcp.f32 %v1788_v40  ;;  %v2234_v40 = vld [vmem:[#allocation2 + $0x38] sm:$0xff] }
0x1222   :  { %v5470_v42 = vpop.eup %5469 }
0x1223   :  { %v1790_v52 = vmul.f32 %v5470_v42, %v5468_v35  ;;  %v5363_v42 = vpack.c.bf16 %v2234_v40, %v2233_v39  ;;  %v4822_v40 = vld [vmem:[%s6476_s5 + $0xa8] sm:$0xff] }
0x1225   :  { %5119 = vmatmul.mubr.msk.f32.vlgmr.msra.gmra.mrb[22].mxu1 %vm261_vm4, %v1790_v52  ;;  %v2317_v52 = vld [vmem:[#allocation5 + $0x8] sm:$0xff] }
0x1226   :  { %5127 = vmatpush3.xpose.msk.msra.mxu1 %vm261_vm4, %v1944_v43  ;;  %5128 = vmatprep.mubr.msk.f32.mxu1 %vm5601_vm3, %v5600_v17  ;;  %v2316_v43 = vld [vmem:[#allocation5] sm:$0xff] }
0x1227   :  { %5136 = vmatprep.subr.mxu1 %v5600_v17  ;;  %v5366_v45 = vpack.c.bf16 %v2317_v52, %v2316_v43  ;;  %v4821_v43 = vld [vmem:[%s6476_s5 + $0xa0] sm:$0xff] }
0x1229   :  { %5129 = vmatmul.mubr.msk.f32.vlgmr.msra.gmra.mrb[24].mxu1 %vm261_vm4, %v1942_v44  ;;  %v2318_v44 = vld [vmem:[#allocation5 + $0x10] sm:$0xff] }
0x122a   :  { %5138 = vmatprep.mubr.msk.f32.mxu1 %vm5601_vm3, %v5600_v17  ;;  %5137 = vmatpush3.msra.mxu1 %v257_v4 }
0x122b   :  { %5365 = vmatprep.subr.bf16.mxu1 %v5616_v33 }
0x12f8   :  { %v1863_v46 = vpop.f32.mrb[22].mxu1 }
0x12f9   :  { %v5120_v49 = vpop.f32.mrb[23].mxu1  ;;  %5124 = vmatmul.mubr.msk.f32.vlgmr.msra.gmra.mrb[18].mxu0 %vm261_vm4, %v1863_v46  ;;  %v2319_v46 = vld [vmem:[#allocation5 + $0x18] sm:$0xff] }
0x12fa   :  { %5133 = vmatprep.mubr.msk.f32.mxu0 %vm5601_vm3, %v5600_v17  ;;  %v5369_v49 = vpack.c.bf16 %v2319_v46, %v2318_v44  ;;  %v4823_v44 = vld [vmem:[%s6476_s5 + $0xb0] sm:$0xff]  ;;  %v4828_v46 = vld [vmem:[%s6476_s5 + $0xd8] sm:$0xff] }
0x12fc   :  { %v2015_v51 = vpop.f32.mrb[24].mxu1 }
0x12fd   :  { %v2019_v53 = vmul.f32 0.35355338, %v2015_v51  ;;  %v5130_v55 = vpop.f32.mrb[25].mxu1  ;;  %v2320_v51 = vld [vmem:[#allocation5 + $0x20] sm:$0xff] }
0x12ff   :  { %v2020_v56 = vsel %vm109_vm12, %v2019_v53, %v5840_v60  ;;  %v2321_v53 = vld [vmem:[#allocation5 + $0x28] sm:$0xff] }
0x1300   :  { %v2021_v59 = vsel %vm261_vm4, %v2020_v56, -inf  ;;  %v5372_v55 = vpack.c.bf16 %v2321_v53, %v2320_v51  ;;  %v4825_v53 = vld [vmem:[%s6476_s5 + $0xc0] sm:$0xff] }
0x1301   :  { %2022 = vmax.xlane.f32.xlu0 %v2021_v59 }
0x138e   :  { %v2023_v61 = vpop.xlane.xlu0 %2022 }
0x138f   :  { %v2024_v63 = vsub.f32 %v2020_v56, %v2023_v61 }
0x1391   :  { %v2025_v1 = vmul.f32 1.442695, %v2024_v63 }
0x1393   :  { %5471 = vpow2.f32 %v2025_v1 }
0x139d   :  { %v5472_v2 = vpop.eup %5471 }
0x139e   :  { %v2027_v3 = vsel %vm261_vm4, %v5472_v2, 0.0 }
0x139f   :  { %2028 = vadd.xlane.f32.xlu1 %v2027_v3 }
0x13b0   :  { %2032 = vrot.lane.b32.xlu1 %v5824_v57, %s6493_s26 }
0x13cc   :  { %v1936_v5 = vpop.f32.mrb[18].mxu0 }
0x13cd   :  { %v1940_v7 = vadd.f32 %v1936_v5, %v1699_v38  ;;  %v5125_v8 = vpop.f32.mrb[19].mxu0  ;;  %v5360_v38 = vpack.c.bf16 %v2232_v37, %v2231_v36  ;;  %v4807_v5 = vld [vmem:[%s6480_s9] ss:$0 sm:$0xff] }
0x13ce   :  { %v4817_v37 = vld [vmem:[%s6476_s5 + $0x80] sm:$0xff] }
0x142c   :  { %v2029_v9 = vpop.xlane.xlu1 %2028 }
0x142d   :  { %5473 = vrcp.f32 %v2029_v9  ;;  %v4808_v9 = vld [vmem:[%s6481_s10] ss:$0 sm:$0xff] }
0x1430   :  { %v2033_v10 = vpop.permute.xlu1 %2032 }
0x1431   :  { %5132 = vmatpush3.msra.mxu0 %v2033_v10 }
0x1432   :  { %5353 = vmatprep.subr.bf16.mxu0 %v5616_v33 }
0x1437   :  { %v5474_v11 = vpop.eup %5473 }
0x1438   :  { %v2031_v12 = vmul.f32 %v5474_v11, %v5472_v2 }
0x143a   :  { %5134 = vmatmul.mubr.msk.f32.vlgmr.msra.gmra.mrb[20].mxu0 %vm261_vm4, %v2031_v12  ;;  %v2322_v12 = vld [vmem:[#allocation5 + $0x30] sm:$0xff] }
0x143b   :  { %5157 = vmatprep.mubr.msk.f32.mxu0 %vm5601_vm3, %v5600_v17  ;;  %5355 = vmatpush3.bf16.msra.mxu0 %v5354_v32 }
0x143c   :  { %5356 = vmatprep.subr.bf16.mxu0 %v5616_v33 }
0x150d   :  { %v2104_v57 = vpop.f32.mrb[20].mxu0 }
0x150e   :  { %v5135_v13 = vpop.f32.mrb[21].mxu0  ;;  %5139 = vmatmul.mubr.msk.f32.vlgmr.msra.gmra.mrb[26].mxu1 %vm261_vm4, %v2104_v57  ;;  %v2323_v57 = vld [vmem:[#allocation5 + $0x38] sm:$0xff] }
0x150f   :  { %5176 = vmatprep.mubr.msk.f32.mxu1 %vm5601_vm3, %v5600_v17  ;;  %5367 = vmatpush3.bf16.msra.mxu1 %v5366_v45  ;;  %v5375_v13 = vpack.c.bf16 %v2323_v57, %v2322_v12  ;;  %v4826_v45 = vld [vmem:[%s6476_s5 + $0xc8] sm:$0xff]  ;;  %v4815_v57 = vld [vmem:[%s6474_s3 + $0x1] ss:$0 sm:$0xff] }
0x1510   :  { %5368 = vmatprep.subr.bf16.mxu1 %v5616_v33  ;;  %v5385_v51 = vpack.c.bf16 %v4828_v46, %v4826_v45  ;;  %v6230_v46 = vld [vmem:[%s6473_s2] sm:$0xff] }
0x1513   :  { %5370 = vmatpush3.bf16.msra.mxu1 %v5369_v49  ;;  %v5383_v49 = vpack.c.bf16 %v4823_v44, %v4821_v43 }
0x1514   :  { %5371 = vmatprep.subr.bf16.mxu1 %v5616_v33 }
0x1517   :  { %5373 = vmatpush3.bf16.msra.mxu1 %v5372_v55  ;;  %v4827_v55 = vld [vmem:[%s6476_s5 + $0xd0] sm:$0xff] }
0x1518   :  { %5374 = vmatprep.subr.bf16.mxu1 %v5616_v33 }
0x151b   :  { %5376 = vmatpush3.bf16.msra.mxu1 %v5375_v13 }
0x151c   :  { %5179 = vmatprep.subr.mxu1 %v5600_v17 }
0x15e1   :  { %v2177_v15 = vpop.f32.mrb[26].mxu1 }
0x15e2   :  { %v2181_v16 = vadd.f32 %v2177_v15, %v1940_v7  ;;  %v5140_v18 = vpop.f32.mrb[27].mxu1  ;;  %v4809_v15 = vld [vmem:[%s6483_s12] ss:$0 sm:$0xff] }
0x15e4   :  { %v2182_v20 = vadd.f32 %v2181_v16, %v5737_v0  ;;  %v2229_v0 = vld [vmem:[#allocation2 + $0x10] sm:$0xff] }
0x15e5   :  { %v5357_v35 = vpack.c.bf16 %v2230_v34, %v2229_v0 }
0x15e6   :  { %v6092_v21 = vadd.f32 %v4806_v19, %v2182_v20 }
0x15e7   :  { %5358 = vmatpush3.bf16.msra.mxu0 %v5357_v35  ;;  %v4818_v35 = vld [vmem:[%s6476_s5 + $0x88] sm:$0xff] }
0x15e8   :  { %v2193_v22 = vsel %vm112_vm0, %v6092_v21, 0.0  ;;  %5359 = vmatprep.subr.bf16.mxu0 %v5616_v33 }
0x15e9   :  { %2194 = vadd.xlane.f32.xlu1 %v2193_v22 }
0x15eb   :  { %5361 = vmatpush3.bf16.msra.mxu0 %v5360_v38  ;;  %v4819_v38 = vld [vmem:[%s6476_s5 + $0x90] sm:$0xff] }
0x15ec   :  { %5362 = vmatprep.subr.bf16.mxu0 %v5616_v33  ;;  %v5379_v39 = vpack.c.bf16 %v4819_v38, %v4817_v37 }
0x15ef   :  { %5364 = vmatpush3.bf16.msra.mxu0 %v5363_v42  ;;  %v4824_v42 = vld [vmem:[%s6476_s5 + $0xb8] sm:$0xff] }
0x15f0   :  { %v5381_v52 = vpack.c.bf16 %v4824_v42, %v4822_v40 }
0x1676   :  { %v2195_v23 = vpop.xlane.xlu1 %2194 }
0x1677   :  { %v2196_v25 = vmul.f32 0.015625, %v2195_v23  ;;  %v4812_v23 = vld [vmem:[%s6485_s14] ss:$0 sm:$0xff] }
0x1679   :  { %v2197_v26 = vsub.f32 %v6092_v21, %v2196_v25 }
0x167b   :  { %v2198_v27 = vmul.f32 %v2197_v26, %v2197_v26  ;;  %v2218_v7 = vmul.f32 %v4807_v5, %v2197_v26 }
0x167d   :  { %v2199_v28 = vsel %vm112_vm0, %v2198_v27, 0.0 }
0x167e   :  { %2200 = vadd.xlane.f32.xlu0 %v2199_v28 }
0x170b   :  { %v2201_v56 = vpop.xlane.xlu0 %2200 }
0x170c   :  { %v2202_v59 = vmul.f32 0.015873017, %v2201_v56  ;;  %v4830_v56 = vld [vmem:[%s6476_s5 + $0xe8] sm:$0xff] }
0x170e   :  { %5475 = vrsqrt.f32 %v2202_v59  ;;  %vm2205_vm13 = vcmp.eq.f32.partialorder %v2202_v59, inf  ;;  %v2208_v1 = vand.u32 2147483648, %v2202_v59  ;;  %vm2207_vm14 = vcmp.eq.f32.partialorder %v2202_v59, 0.0 }
0x1718   :  { %v5476_v61 = vpop.eup %5475 }
0x1719   :  { %v2204_v63 = vmul.f32 %v5476_v61, %v2202_v59  ;;  %v5387_v61 = vpack.c.bf16 %v4827_v55, %v4825_v53 }
0x171b   :  { %v2206_v2 = vsel %vm2205_vm13, %v2202_v59, %v2204_v63  ;;  %v4832_v59 = vld [vmem:[%s6476_s5 + $0xf8] sm:$0xff] }
0x171c   :  { %v2209_v3 = vsel %vm2207_vm14, %v2208_v1, %v2206_v2  ;;  %v5389_v63 = vpack.c.bf16 %v4832_v59, %v4830_v56  ;;  %v4829_v1 = vld [vmem:[%s6476_s5 + $0xe0] sm:$0xff]  ;;  %v4831_v2 = vld [vmem:[%s6476_s5 + $0xf0] sm:$0xff] }
0x171d   :  { %v2210_v4 = vadd.f32 1000000.0, %v2209_v3  ;;  %v5391_v3 = vpack.c.bf16 %v4831_v2, %v4829_v1 }
0x171f   :  { %5477 = vrcp.f32 %v2210_v4 }
0x1729   :  { %v5478_v8 = vpop.eup %5477 }
0x172a   :  { %v2219_v10 = vmul.f32 %v5478_v8, %v2218_v7 }
0x172c   :  { %v2226_v11 = vadd.f32 %v4808_v9, %v2219_v10 }
0x172e   :  { %5158 = vmatmul.mubr.msk.f32.vlgmr.msra.gmra.mrb[22].mxu0 %vm112_vm0, %v2226_v11 }
0x172f   :  { %2541 = vmatprep.mubr.f32.mxu0 %v5600_v17 }
0x1801   :  { %v2311_v16 = vpop.f32.mrb[22].mxu0 }
0x1802   :  { %v2312_v18 = vadd.f32 %v4809_v15, %v2311_v16  ;;  %v5159_v19 = vpop.f32.mrb[23].mxu0  ;;  %v4816_v16 = vld [vmem:[%s6475_s4 + $0x1] ss:$0 sm:$0xff] }
0x1804   :  { %v2315_v20 = vmax.f32 %v2312_v18, 0.0 }
0x1806   :  { %5177 = vmatmul.mubr.msk.f32.vlgmr.msra.gmra.mrb[28].mxu1 %vm112_vm0, %v2315_v20  ;;  %v4833_v20 = vld [vmem:[%s6477_s6 + $0x2] sm:$0x3] }
0x1807   :  { %5181 = vmatprep.mubr.msk.f32.mxu1 %vm5601_vm3, %v5600_v17 }
0x18d9   :  { %v2393_v22 = vpop.f32.mrb[28].mxu1 }
0x18da   :  { %v2397_v25 = vadd.f32 %v2393_v22, %v6092_v21  ;;  %v5178_v26 = vpop.f32.mrb[29].mxu1  ;;  %v4820_v21 = vld [vmem:[%s6476_s5 + $0x98] sm:$0xff]  ;;  %v2467_v22 = vrot.slane %v4833_v20, %v168_v48  ;;  %s6511_s5 = smov 80  }
0x18db   :  { %v5377_v36 = vpack.c.bf16 %v4820_v21, %v4818_v35 }
0x18dc   :  { %v6125_v27 = vadd.f32 %v4812_v23, %v2397_v25 }
0x18dd   :  { %5378 = vmatprep.subr.bf16.mxu0 %v5377_v36 }
0x18de   :  { %v2410_v28 = vsel %vm112_vm0, %v6125_v27, 0.0  ;;  %5380 = vmatpush1.bf16.msra.mxu0 %v5379_v39 }
0x18df   :  { %2411 = vadd.xlane.f32.xlu0 %v2410_v28  ;;  %5382 = vmatprep.subr.bf16.mxu0 %v5381_v52  ;;  %v2471_v28 = vrot.slane %v4833_v20, %v172_v54 }
0x18e2   :  { %5384 = vmatpush1.bf16.msra.mxu0 %v5383_v49 }
0x18e3   :  { %5386 = vmatprep.subr.bf16.mxu0 %v5385_v51 }
0x18e6   :  { %5388 = vmatpush1.bf16.msra.mxu0 %v5387_v61 }
0x18e7   :  { %5390 = vmatprep.subr.bf16.mxu0 %v5389_v63  ;;  %v4836_v63 = vld [vmem:[%s6478_s7 + $0x48] sm:$0xff] }
0x18ea   :  { %5392 = vmatpush1.bf16.msra.mxu0 %v5391_v3 }
0x18eb   :  { %5199 = vmatprep.subr.mxu0 %v5600_v17 }
0x196c   :  { %v2412_v29 = vpop.xlane.xlu0 %2411 }
0x196d   :  { %v2413_v31 = vmul.f32 0.015625, %v2412_v29 }
0x196f   :  { %v2414_v32 = vsub.f32 %v6125_v27, %v2413_v31 }
0x1971   :  { %v2415_v0 = vmul.f32 %v2414_v32, %v2414_v32  ;;  %v2435_v13 = vmul.f32 %v4815_v57, %v2414_v32 }
0x1973   :  { %v2416_v34 = vsel %vm112_vm0, %v2415_v0, 0.0 }
0x1974   :  { %2417 = vadd.xlane.f32.xlu0 %v2416_v34 }
0x1a01   :  { %v2418_v4 = vpop.xlane.xlu0 %2417 }
0x1a02   :  { %v2419_v5 = vmul.f32 0.015873017, %v2418_v4  ;;  %v4835_v4 = vld [vmem:[%s6478_s7 + $0x40] sm:$0xff] }
0x1a04   :  { %5479 = vrsqrt.f32 %v2419_v5  ;;  %vm2422_vm15 = vcmp.eq.f32.partialorder %v2419_v5, inf  ;;  %v2425_v9 = vand.u32 2147483648, %v2419_v5  ;;  %vm2424_vm1 = vcmp.eq.f32.partialorder %v2419_v5, 0.0 }
0x1a0e   :  { %v5480_v7 = vpop.eup %5479 }
0x1a0f   :  { %v2421_v8 = vmul.f32 %v5480_v7, %v2419_v5 }
0x1a11   :  { %v2423_v10 = vsel %vm2422_vm15, %v2419_v5, %v2421_v8 }
0x1a12   :  { %v2426_v11 = vsel %vm2424_vm1, %v2425_v9, %v2423_v10 }
0x1a13   :  { %v2427_v12 = vadd.f32 1000000.0, %v2426_v11 }
0x1a15   :  { %5481 = vrcp.f32 %v2427_v12 }
0x1a1f   :  { %v5482_v15 = vpop.eup %5481 }
0x1a20   :  { %v2436_v18 = vmul.f32 %v5482_v15, %v2435_v13 }
0x1a22   :  { %v2443_v19 = vadd.f32 %v4816_v16, %v2436_v18 }
0x1a24   :  { %4834 = vmatmul.mubr.msk.f32.vlgmr.msra.gmra.mrb[24].mxu0 %vm112_vm0, %v2443_v19 }
0x1a25   :  { %5201 = vmatprep.mubr.msk.f32.mxu0 %vm5601_vm3, %v5600_v17  ;;  %5200 = vmatpush3.msra.mxu0 %v4836_v63 }
0x1a26   :  { %5209 = vmatprep.subr.mxu0 %v5600_v17 }
0x1af7   :  { %v2543_v23 = vpop.f32.mrb[24].mxu0 }
0x1af8   :  { %v6194_v25 = vadd.f32 %v2543_v23, %v2467_v22  ;;  %v2545_v26 = vpop.f32.mrb[25].mxu0 }
0x1af9   :  { %v6204_v31 = vadd.f32 %v2545_v26, %v2471_v28 }
0x1afa   :  { %2558 = vrot.lane.b32.xlu0 %v6194_v25, %s5603_s0 }
0x1afe   :  { %2722 = vrot.lane.b32.xlu0 %v6194_v25, %s5602_s29 }
0x1b6c   :  { %v2559_v29 = vpop.permute.xlu0 %2558 }
0x1b6d   :  { %5180 = vmatpush3.xpose.msk.msra.mxu1 %vm261_vm4, %v2559_v29 }
0x1b6e   :  { %5184 = vmatprep.subr.mxu1 %v5600_v17 }
0x1b70   :  { %5182 = vmatmul.mubr.msk.f32.vlgmr.msra.gmra.mrb[30].mxu1 %vm261_vm4, %v6194_v25  ;;  %v2723_v58 = vpop.permute.xlu0 %2722 }
0x1b71   :  { %5185 = vmatpush3.msra.mxu1 %v6204_v31  ;;  %5186 = vmatprep.mubr.msk.f32.mxu1 %vm5601_vm3, %v5600_v17 }
0x1b72   :  { %5189 = vmatprep.subr.mxu1 %v5600_v17 }
0x1c43   :  { %v2630_v48 = vpop.f32.mrb[30].mxu1 }
0x1c44   :  { %v2634_v47 = vmul.f32 0.35355338, %v2630_v48  ;;  %v5183_v54 = vpop.f32.mrb[31].mxu1 }
0x1c46   :  { %v2635_v32 = vsel %vm88_vm5, %v2634_v47, %v5840_v60 }
0x1c47   :  { %v2636_v0 = vsel %vm261_vm4, %v2635_v32, -inf }
0x1c48   :  { %2637 = vmax.xlane.f32.xlu1 %v2636_v0 }
0x1cd5   :  { %v2638_v34 = vpop.xlane.xlu1 %2637 }
0x1cd6   :  { %v2639_v35 = vsub.f32 %v2635_v32, %v2638_v34  ;;  %v4837_v34 = vld [vmem:[%s6478_s7 + $0x50] sm:$0xff] }
0x1cd8   :  { %v2640_v21 = vmul.f32 1.442695, %v2639_v35 }
0x1cda   :  { %5483 = vpow2.f32 %v2640_v21 }
0x1ce4   :  { %v5484_v36 = vpop.eup %5483 }
0x1ce5   :  { %v2642_v37 = vsel %vm261_vm4, %v5484_v36, 0.0 }
0x1ce6   :  { %2643 = vadd.xlane.f32.xlu1 %v2642_v37 }
0x1cf7   :  { %2720 = vrot.lane.b32.xlu1 %v6194_v25, %s5604_s21 }
0x1d73   :  { %v2644_v38 = vpop.xlane.xlu1 %2643 }
0x1d74   :  { %5485 = vrcp.f32 %v2644_v38 }
0x1d77   :  { %v2721_v60 = vpop.permute.xlu1 %2720 }
0x1d7e   :  { %v5486_v39 = vpop.eup %5485 }
0x1d7f   :  { %v2646_v40 = vmul.f32 %v5486_v39, %v5484_v36 }
0x1d81   :  { %5187 = vmatmul.mubr.msk.f32.vlgmr.msra.gmra.mrb[32].mxu1 %vm261_vm4, %v2646_v40 }
0x1d82   :  { %5190 = vmatpush3.xpose.msk.msra.mxu1 %vm261_vm4, %v2723_v58  ;;  %5191 = vmatprep.mubr.msk.f32.mxu1 %vm5601_vm3, %v5600_v17 }
0x1d83   :  { %5194 = vmatprep.subr.mxu1 %v5600_v17 }
0x1d85   :  { %5192 = vmatmul.mubr.msk.f32.vlgmr.msra.gmra.mrb[34].mxu1 %vm261_vm4, %v2721_v60 }
0x1d86   :  { %5196 = vmatprep.mubr.msk.f32.mxu1 %vm5601_vm3, %v5600_v17 }
0x1e54   :  { %v2716_v42 = vpop.f32.mrb[32].mxu1 }
0x1e55   :  { %v5188_v43 = vpop.f32.mrb[33].mxu1 }
0x1e58   :  { %v2794_v52 = vpop.f32.mrb[34].mxu1 }
0x1e59   :  { %v2798_v44 = vmul.f32 0.35355338, %v2794_v52  ;;  %v5193_v45 = vpop.f32.mrb[35].mxu1 }
0x1e5b   :  { %v2799_v49 = vsel %vm91_vm6, %v2798_v44, %v6230_v46 }
0x1e5c   :  { %v2800_v51 = vsel %vm261_vm4, %v2799_v49, -inf }
0x1e5d   :  { %2801 = vmax.xlane.f32.xlu0 %v2800_v51 }
0x1e73   :  { %2812 = vrot.lane.b32.xlu0 %v6204_v31, %s5604_s21 }
0x1e77   :  { %3034 = vrot.lane.b32.xlu0 %v6194_v25, %s5606_s1 }
0x1eea   :  { %v2802_v53 = vpop.xlane.xlu0 %2801 }
0x1eeb   :  { %v2803_v55 = vsub.f32 %v2799_v49, %v2802_v53 }
0x1eed   :  { %v2804_v56 = vmul.f32 1.442695, %v2803_v55 }
0x1eee   :  { %v2813_v59 = vpop.permute.xlu0 %2812 }
0x1eef   :  { %5487 = vpow2.f32 %v2804_v56  ;;  %5195 = vmatpush3.msra.mxu1 %v2813_v59 }
0x1ef0   :  { %5204 = vmatprep.subr.mxu1 %v5600_v17 }
0x1ef2   :  { %v3035_v9 = vpop.permute.xlu0 %3034 }
0x1ef9   :  { %v5488_v61 = vpop.eup %5487 }
0x1efa   :  { %v2806_v14 = vsel %vm261_vm4, %v5488_v61, 0.0 }
0x1efb   :  { %2807 = vadd.xlane.f32.xlu1 %v2806_v14 }
0x1f0c   :  { %3036 = vrot.lane.b32.xlu1 %v6194_v25, %s5605_s13 }
0x1f88   :  { %v2808_v1 = vpop.xlane.xlu1 %2807 }
0x1f89   :  { %5489 = vrcp.f32 %v2808_v1 }
0x1f8c   :  { %v3037_v7 = vpop.permute.xlu1 %3036 }
0x1f93   :  { %v5490_v2 = vpop.eup %5489 }
0x1f94   :  { %v2810_v3 = vmul.f32 %v5490_v2, %v5488_v61  ;;  %v4838_v61 = vld [vmem:[%s6478_s7 + $0x58] sm:$0xff] }
0x1f96   :  { %5197 = vmatmul.mubr.msk.f32.vlgmr.msra.gmra.mrb[36].mxu1 %vm261_vm4, %v2810_v3 }
0x1f97   :  { %5205 = vmatpush3.msra.mxu1 %v4835_v4  ;;  %5206 = vmatprep.mubr.msk.f32.mxu1 %vm5601_vm3, %v5600_v17 }
0x1f98   :  { %5214 = vmatprep.subr.mxu1 %v5600_v17 }
0x1f9a   :  { %5207 = vmatmul.mubr.msk.f32.vlgmr.msra.gmra.mrb[38].mxu1 %vm261_vm4, %v2716_v42 }
0x1f9b   :  { %5216 = vmatprep.mubr.msk.f32.mxu1 %vm5601_vm3, %v5600_v17 }
0x2069   :  { %v2884_v5 = vpop.f32.mrb[36].mxu1 }
0x206a   :  { %v5198_v8 = vpop.f32.mrb[37].mxu1  ;;  %5202 = vmatmul.mubr.msk.f32.vlgmr.msra.gmra.mrb[26].mxu0 %vm261_vm4, %v2884_v5 }
0x206b   :  { %5210 = vmatpush3.xpose.msk.msra.mxu0 %vm261_vm4, %v3037_v7  ;;  %5211 = vmatprep.mubr.msk.f32.mxu0 %vm5601_vm3, %v5600_v17 }
0x206c   :  { %5219 = vmatprep.subr.mxu0 %v5600_v17 }
0x206d   :  { %v3030_v10 = vpop.f32.mrb[38].mxu1 }
0x206e   :  { %v5208_v11 = vpop.f32.mrb[39].mxu1  ;;  %5212 = vmatmul.mubr.msk.f32.vlgmr.msra.gmra.mrb[28].mxu0 %vm261_vm4, %v3035_v9 }
0x206f   :  { %5221 = vmatprep.mubr.msk.f32.mxu0 %vm5601_vm3, %v5600_v17  ;;  %5220 = vmatpush3.msra.mxu0 %v4837_v34 }
0x2070   :  { %5229 = vmatprep.subr.mxu0 %v5600_v17 }
0x213d   :  { %v2957_v12 = vpop.f32.mrb[26].mxu0 }
0x213e   :  { %v3031_v57 = vadd.f32 %v3030_v10, %v2957_v12  ;;  %v5203_v13 = vpop.f32.mrb[27].mxu0 }
0x2141   :  { %v3108_v15 = vpop.f32.mrb[28].mxu0 }
0x2142   :  { %v3112_v16 = vmul.f32 0.35355338, %v3108_v15  ;;  %v5213_v18 = vpop.f32.mrb[29].mxu0 }
0x2144   :  { %v3113_v19 = vsel %vm94_vm7, %v3112_v16, %v6230_v46 }
0x2145   :  { %v3114_v20 = vsel %vm261_vm4, %v3113_v19, -inf }
0x2146   :  { %3115 = vmax.xlane.f32.xlu0 %v3114_v20 }
0x215c   :  { %3125 = vrot.lane.b32.xlu0 %v6204_v31, %s5606_s1  ;;  %s6506_s1 = smov 96  }
0x2160   :  { %3275 = vrot.lane.b32.xlu0 %v6194_v25, %s5608_s25 }
0x21d3   :  { %v3116_v22 = vpop.xlane.xlu0 %3115 }
0x21d4   :  { %v3117_v23 = vsub.f32 %v3113_v19, %v3116_v22  ;;  %v4839_v22 = vld [vmem:[%s6478_s7 + $0x60] sm:$0xff] }
0x21d6   :  { %v3118_v26 = vmul.f32 1.442695, %v3117_v23 }
0x21d7   :  { %v3126_v28 = vpop.permute.xlu0 %3125 }
0x21d8   :  { %5491 = vpow2.f32 %v3118_v26  ;;  %5215 = vmatpush3.msra.mxu1 %v3126_v28 }
0x21d9   :  { %5224 = vmatprep.subr.mxu1 %v5600_v17 }
0x21db   :  { %v3276_v0 = vpop.permute.xlu0 %3275 }
0x21e2   :  { %v5492_v29 = vpop.eup %5491 }
0x21e3   :  { %v3120_v41 = vsel %vm261_vm4, %v5492_v29, 0.0 }
0x21e4   :  { %3121 = vadd.xlane.f32.xlu1 %v3120_v41 }
0x21f5   :  { %3277 = vrot.lane.b32.xlu1 %v6194_v25, %s5607_s11  ;;  %s6507_s11 = smov 32  }
0x2271   :  { %v3122_v48 = vpop.xlane.xlu1 %3121 }
0x2272   :  { %5493 = vrcp.f32 %v3122_v48 }
0x2275   :  { %v3278_v32 = vpop.permute.xlu1 %3277 }
0x227c   :  { %v5494_v47 = vpop.eup %5493 }
0x227d   :  { %v3124_v54 = vmul.f32 %v5494_v47, %v5492_v29 }
0x227f   :  { %5217 = vmatmul.mubr.msk.f32.vlgmr.msra.gmra.mrb[40].mxu1 %vm261_vm4, %v3124_v54 }
0x2280   :  { %5225 = vmatpush3.xpose.msk.msra.mxu1 %vm261_vm4, %v3278_v32  ;;  %5226 = vmatprep.mubr.msk.f32.mxu1 %vm5601_vm3, %v5600_v17 }
0x2281   :  { %5234 = vmatprep.subr.mxu1 %v5600_v17 }
0x2283   :  { %5227 = vmatmul.mubr.msk.f32.vlgmr.msra.gmra.mrb[42].mxu1 %vm261_vm4, %v3276_v0 }
0x2284   :  { %5236 = vmatprep.mubr.msk.f32.mxu1 %vm5601_vm3, %v5600_v17  ;;  %5235 = vmatpush3.msra.mxu1 %v4838_v61 }
0x2285   :  { %5244 = vmatprep.subr.mxu1 %v5600_v17 }
0x2352   :  { %v3197_v35 = vpop.f32.mrb[40].mxu1 }
0x2353   :  { %v5218_v21 = vpop.f32.mrb[41].mxu1  ;;  %5222 = vmatmul.mubr.msk.f32.vlgmr.msra.gmra.mrb[30].mxu0 %vm261_vm4, %v3197_v35 }
0x2354   :  { %5231 = vmatprep.mubr.msk.f32.mxu0 %vm5601_vm3, %v5600_v17 }
0x2356   :  { %v3349_v36 = vpop.f32.mrb[42].mxu1 }
0x2357   :  { %v3353_v37 = vmul.f32 0.35355338, %v3349_v36  ;;  %v5228_v38 = vpop.f32.mrb[43].mxu1 }
0x2359   :  { %v3354_v39 = vsel %vm97_vm8, %v3353_v37, %v6230_v46 }
0x235a   :  { %v3355_v40 = vsel %vm261_vm4, %v3354_v39, -inf }
0x235b   :  { %3356 = vmax.xlane.f32.xlu0 %v3355_v40 }
0x2371   :  { %3366 = vrot.lane.b32.xlu0 %v6204_v31, %s5608_s25 }
0x2375   :  { %3516 = vrot.lane.b32.xlu0 %v6194_v25, %s6506_s1 }
0x23e8   :  { %v3357_v58 = vpop.xlane.xlu0 %3356 }
0x23e9   :  { %v3358_v60 = vsub.f32 %v3354_v39, %v3357_v58 }
0x23eb   :  { %v3359_v42 = vmul.f32 1.442695, %v3358_v60 }
0x23ec   :  { %v3367_v43 = vpop.permute.xlu0 %3366 }
0x23ed   :  { %5495 = vpow2.f32 %v3359_v42  ;;  %5230 = vmatpush3.msra.mxu0 %v3367_v43  ;;  %v4840_v42 = vld [vmem:[%s6478_s7 + $0x68] sm:$0xff] }
0x23ee   :  { %5239 = vmatprep.subr.mxu0 %v5600_v17 }
0x23f0   :  { %v3517_v59 = vpop.permute.xlu0 %3516 }
0x23f7   :  { %v5496_v52 = vpop.eup %5495 }
0x23f8   :  { %v3361_v6 = vsel %vm261_vm4, %v5496_v52, 0.0 }
0x23f9   :  { %3362 = vadd.xlane.f32.xlu1 %v3361_v6 }
0x240a   :  { %3518 = vrot.lane.b32.xlu1 %v6194_v25, %s6507_s11 }
0x2426   :  { %v3270_v44 = vpop.f32.mrb[30].mxu0 }
0x2427   :  { %v3274_v45 = vadd.f32 %v3270_v44, %v3031_v57  ;;  %v5223_v49 = vpop.f32.mrb[31].mxu0 }
0x2486   :  { %v3363_v51 = vpop.xlane.xlu1 %3362 }
0x2487   :  { %5497 = vrcp.f32 %v3363_v51 }
0x248a   :  { %v3519_v56 = vpop.permute.xlu1 %3518 }
0x2491   :  { %v5498_v53 = vpop.eup %5497 }
0x2492   :  { %v3365_v55 = vmul.f32 %v5498_v53, %v5496_v52 }
0x2494   :  { %5232 = vmatmul.mubr.msk.f32.vlgmr.msra.gmra.mrb[32].mxu0 %vm261_vm4, %v3365_v55 }
0x2495   :  { %5240 = vmatpush3.xpose.msk.msra.mxu0 %vm261_vm4, %v3519_v56  ;;  %5241 = vmatprep.mubr.msk.f32.mxu0 %vm5601_vm3, %v5600_v17 }
0x2496   :  { %5249 = vmatprep.subr.mxu0 %v5600_v17 }
0x2498   :  { %5242 = vmatmul.mubr.msk.f32.vlgmr.msra.gmra.mrb[34].mxu0 %vm261_vm4, %v3517_v59 }
0x2499   :  { %5251 = vmatprep.mubr.msk.f32.mxu0 %vm5601_vm3, %v5600_v17  ;;  %5250 = vmatpush3.msra.mxu0 %v4839_v22 }
0x249a   :  { %5259 = vmatprep.subr.mxu0 %v5600_v17 }
0x2567   :  { %v3438_v14 = vpop.f32.mrb[32].mxu0 }
0x2568   :  { %v5233_v63 = vpop.f32.mrb[33].mxu0  ;;  %5237 = vmatmul.mubr.msk.f32.vlgmr.msra.gmra.mrb[44].mxu1 %vm261_vm4, %v3438_v14 }
0x2569   :  { %5246 = vmatprep.mubr.msk.f32.mxu1 %vm5601_vm3, %v5600_v17 }
0x256b   :  { %v3590_v1 = vpop.f32.mrb[34].mxu0 }
0x256c   :  { %v3594_v2 = vmul.f32 0.35355338, %v3590_v1  ;;  %v5243_v3 = vpop.f32.mrb[35].mxu0 }
0x256e   :  { %v3595_v4 = vsel %vm100_vm9, %v3594_v2, %v6230_v46 }
0x256f   :  { %v3596_v5 = vsel %vm261_vm4, %v3595_v4, -inf }
0x2570   :  { %3597 = vmax.xlane.f32.xlu0 %v3596_v5 }
0x2586   :  { %3607 = vrot.lane.b32.xlu0 %v6204_v31, %s6506_s1 }
0x258a   :  { %3757 = vrot.lane.b32.xlu0 %v6194_v25, %s6508_s22 }
0x25fd   :  { %v3598_v7 = vpop.xlane.xlu0 %3597 }
0x25fe   :  { %v3599_v8 = vsub.f32 %v3595_v4, %v3598_v7 }
0x2600   :  { %v3600_v9 = vmul.f32 1.442695, %v3599_v8 }
0x2601   :  { %v3608_v10 = vpop.permute.xlu0 %3607 }
0x2602   :  { %5499 = vpow2.f32 %v3600_v9  ;;  %5245 = vmatpush3.msra.mxu1 %v3608_v10 }
0x2603   :  { %5254 = vmatprep.subr.mxu1 %v5600_v17 }
0x2605   :  { %v3758_v20 = vpop.permute.xlu0 %3757 }
0x260c   :  { %v5500_v11 = vpop.eup %5499 }
0x260d   :  { %v3602_v30 = vsel %vm261_vm4, %v5500_v11, 0.0 }
0x260e   :  { %3603 = vadd.xlane.f32.xlu1 %v3602_v30 }
0x261f   :  { %3759 = vrot.lane.b32.xlu1 %v6194_v25, %s6509_s28 }
0x263b   :  { %v3511_v12 = vpop.f32.mrb[44].mxu1 }
0x263c   :  { %v3515_v57 = vadd.f32 %v3511_v12, %v3274_v45  ;;  %v5238_v13 = vpop.f32.mrb[45].mxu1 }
0x269b   :  { %v3604_v15 = vpop.xlane.xlu1 %3603 }
0x269c   :  { %5501 = vrcp.f32 %v3604_v15 }
0x269f   :  { %v3760_v19 = vpop.permute.xlu1 %3759 }
0x26a6   :  { %v5502_v16 = vpop.eup %5501 }
0x26a7   :  { %v3606_v18 = vmul.f32 %v5502_v16, %v5500_v11 }
0x26a9   :  { %5247 = vmatmul.mubr.msk.f32.vlgmr.msra.gmra.mrb[46].mxu1 %vm261_vm4, %v3606_v18 }
0x26aa   :  { %5255 = vmatpush3.xpose.msk.msra.mxu1 %vm261_vm4, %v3760_v19  ;;  %5256 = vmatprep.mubr.msk.f32.mxu1 %vm5601_vm3, %v5600_v17 }
0x26ab   :  { %5264 = vmatprep.subr.mxu1 %v5600_v17 }
0x26ad   :  { %5257 = vmatmul.mubr.msk.f32.vlgmr.msra.gmra.mrb[48].mxu1 %vm261_vm4, %v3758_v20  ;;  %v4842_v20 = vld [vmem:[%s6478_s7 + $0x78] sm:$0xff] }
0x26ae   :  { %5266 = vmatprep.mubr.msk.f32.mxu1 %vm5601_vm3, %v5600_v17  ;;  %5265 = vmatpush3.msra.mxu1 %v4840_v42  ;;  %v4533_v42 = vld [vmem:[#allocation2 + $0x60] sm:$0xff] }
0x26af   :  { %5274 = vmatprep.subr.mxu1 %v5600_v17 }
0x277c   :  { %v3679_v23 = vpop.f32.mrb[46].mxu1 }
0x277d   :  { %v5248_v26 = vpop.f32.mrb[47].mxu1  ;;  %5252 = vmatmul.mubr.msk.f32.vlgmr.msra.gmra.mrb[36].mxu0 %vm261_vm4, %v3679_v23 }
0x277e   :  { %5261 = vmatprep.mubr.msk.f32.mxu0 %vm5601_vm3, %v5600_v17 }
0x2780   :  { %v3831_v28 = vpop.f32.mrb[48].mxu1 }
0x2781   :  { %v3835_v29 = vmul.f32 0.35355338, %v3831_v28  ;;  %v5258_v41 = vpop.f32.mrb[49].mxu1 }
0x2783   :  { %v3836_v48 = vsel %vm103_vm10, %v3835_v29, %v6230_v46 }
0x2784   :  { %v3837_v47 = vsel %vm261_vm4, %v3836_v48, -inf }
0x2785   :  { %3838 = vmax.xlane.f32.xlu1 %v3837_v47 }
0x2796   :  { %4000 = vrot.lane.b32.xlu1 %v6194_v25, %s6510_s18 }
0x279a   :  { %3998 = vrot.lane.b32.xlu1 %v6194_v25, %s6511_s5 }
0x2812   :  { %v3839_v54 = vpop.xlane.xlu1 %3838 }
0x2813   :  { %v3840_v32 = vsub.f32 %v3836_v48, %v3839_v54 }
0x2815   :  { %v3841_v0 = vmul.f32 1.442695, %v3840_v32  ;;  %v4876_v32 = vld [vmem:[%s6479_s8 + $0x1] ss:$0 sm:$0xff] }
0x2816   :  { %v4001_v40 = vpop.permute.xlu1 %4000 }
0x2817   :  { %5503 = vpow2.f32 %v3841_v0 }
0x281a   :  { %v3999_v60 = vpop.permute.xlu1 %3998 }
0x2821   :  { %v5504_v34 = vpop.eup %5503 }
0x2822   :  { %v3843_v35 = vsel %vm261_vm4, %v5504_v34, 0.0 }
0x2823   :  { %3844 = vadd.xlane.f32.xlu0 %v3843_v35 }
0x2839   :  { %3848 = vrot.lane.b32.xlu0 %v6204_v31, %s6508_s22  ;;  %s5617_s22 = smov [#allocation7]  }
0x283a   :  { %s4754_s28 = sshll.u32 %s5617_s22, 4  ;;  %s4755_s28 = int_to_ptr.vmem [resolvable:$true] %s4754_s28 }
0x283b   :  { %s5568_s30 = scalar_lea.vmem %s4755_s28, 128  ;;  %p5573_p3 = scmp.lt.s32.totalorder %s4755_s28, %s4755_s28 }
0x283c   :  { %p5569_p2 = scmp.ne.s32.totalorder %s4755_s28, %s5568_s30  ;;  %p5574_p4 = scmp.lt.s32.totalorder %s5568_s30, %s5568_s30 }
0x283e   :  { %p5575_p5 = por %p5574_p4, %p5573_p3 }
0x2840   :  { %p5576_p6 = pnand %p5575_p5, %p5569_p2 }
0x2850   :  { %v3752_v62 = vpop.f32.mrb[36].mxu0 }
0x2851   :  { %v3756_v21 = vadd.f32 %v3752_v62, %v3515_v57  ;;  %v5253_v36 = vpop.f32.mrb[37].mxu0 }
0x28b0   :  { %v3845_v37 = vpop.xlane.xlu0 %3844 }
0x28b1   :  { %5505 = vrcp.f32 %v3845_v37 }
0x28b4   :  { %v3849_v38 = vpop.permute.xlu0 %3848 }
0x28b5   :  { %5260 = vmatpush3.msra.mxu0 %v3849_v38  ;;  %v4529_v38 = vld [vmem:[#allocation2 + $0x40] sm:$0xff] }
0x28b6   :  { %5269 = vmatprep.subr.mxu0 %v5600_v17 }
0x28bb   :  { %v5506_v39 = vpop.eup %5505 }
0x28bc   :  { %v3847_v58 = vmul.f32 %v5506_v39, %v5504_v34  ;;  %v4530_v39 = vld [vmem:[#allocation2 + $0x48] sm:$0xff] }
0x28be   :  { %5262 = vmatmul.mubr.msk.f32.vlgmr.msra.gmra.mrb[38].mxu0 %vm261_vm4, %v3847_v58  ;;  %v4531_v58 = vld [vmem:[#allocation2 + $0x50] sm:$0xff] }
0x28bf   :  { %5270 = vmatpush3.xpose.msk.msra.mxu0 %vm261_vm4, %v4001_v40  ;;  %5271 = vmatprep.mubr.msk.f32.mxu0 %vm5601_vm3, %v5600_v17  ;;  %v5394_v40 = vpack.c.bf16 %v4530_v39, %v4529_v38  ;;  %v4888_v39 = vld [vmem:[%s6487_s16] ss:$0 sm:$0xff] }
0x28c0   :  { %5279 = vmatprep.subr.mxu0 %v5600_v17 }
0x28c2   :  { %5272 = vmatmul.mubr.msk.f32.vlgmr.msra.gmra.mrb[40].mxu0 %vm261_vm4, %v3999_v60  ;;  %v4532_v60 = vld [vmem:[#allocation2 + $0x58] sm:$0xff] }
0x28c3   :  { %5281 = vmatprep.mubr.msk.f32.mxu0 %vm5601_vm3, %v5600_v17 }
0x2991   :  { %v3920_v43 = vpop.f32.mrb[38].mxu0 }
0x2992   :  { %v5263_v52 = vpop.f32.mrb[39].mxu0  ;;  %5267 = vmatmul.mubr.msk.f32.vlgmr.msra.gmra.mrb[50].mxu1 %vm261_vm4, %v3920_v43  ;;  %v4534_v43 = vld [vmem:[#allocation2 + $0x68] sm:$0xff] }
0x2993   :  { %5276 = vmatprep.mubr.msk.f32.mxu1 %vm5601_vm3, %v5600_v17  ;;  %v5400_v52 = vpack.c.bf16 %v4534_v43, %v4533_v42 }
0x2995   :  { %v4072_v6 = vpop.f32.mrb[40].mxu0 }
0x2996   :  { %v4076_v44 = vmul.f32 0.35355338, %v4072_v6  ;;  %v5273_v45 = vpop.f32.mrb[41].mxu0  ;;  %v4535_v6 = vld [vmem:[#allocation2 + $0x70] sm:$0xff] }
0x2998   :  { %v4077_v49 = vsel %vm106_vm11, %v4076_v44, %v6230_v46  ;;  %v4536_v44 = vld [vmem:[#allocation2 + $0x78] sm:$0xff] }
0x2999   :  { %v4078_v51 = vsel %vm261_vm4, %v4077_v49, -inf  ;;  %v5403_v45 = vpack.c.bf16 %v4536_v44, %v4535_v6 }
0x299a   :  { %4079 = vmax.xlane.f32.xlu0 %v4078_v51  ;;  %v4621_v51 = vld [vmem:[#allocation5 + $0x48] sm:$0xff] }
0x29b0   :  { %4089 = vrot.lane.b32.xlu0 %v6204_v31, %s6511_s5 }
0x29b4   :  { %4239 = vrot.lane.b32.xlu0 %v6194_v25, %s6512_s19 }
0x2a27   :  { %v4080_v53 = vpop.xlane.xlu0 %4079 }
0x2a28   :  { %v4081_v55 = vsub.f32 %v4077_v49, %v4080_v53  ;;  %v4620_v49 = vld [vmem:[#allocation5 + $0x40] sm:$0xff]  ;;  %v4622_v53 = vld [vmem:[#allocation5 + $0x50] sm:$0xff] }
0x2a2a   :  { %v4082_v56 = vmul.f32 1.442695, %v4081_v55  ;;  %v5406_v55 = vpack.c.bf16 %v4621_v51, %v4620_v49 }
0x2a2b   :  { %v4090_v59 = vpop.permute.xlu0 %4089 }
0x2a2c   :  { %5507 = vpow2.f32 %v4082_v56  ;;  %5275 = vmatpush3.msra.mxu1 %v4090_v59  ;;  %v4623_v56 = vld [vmem:[#allocation5 + $0x58] sm:$0xff] }
0x2a2d   :  { %5284 = vmatprep.subr.mxu1 %v5600_v17  ;;  %v5409_v59 = vpack.c.bf16 %v4623_v56, %v4622_v53 }
0x2a2f   :  { %v4240_v7 = vpop.permute.xlu0 %4239 }
0x2a36   :  { %v5508_v61 = vpop.eup %5507 }
0x2a37   :  { %v4084_v24 = vsel %vm261_vm4, %v5508_v61, 0.0 }
0x2a38   :  { %4085 = vadd.xlane.f32.xlu1 %v4084_v24  ;;  %v4625_v24 = vld [vmem:[#allocation5 + $0x68] sm:$0xff] }
0x2a49   :  { %4241 = vrot.lane.b32.xlu1 %v6194_v25, %s6513_s27  ;;  %v4841_v25 = vld [vmem:[%s6478_s7 + $0x70] sm:$0xff] }
0x2a4a   :  { %5280 = vmatpush3.msra.mxu0 %v4841_v25 }
0x2a4b   :  { %5289 = vmatprep.subr.mxu0 %v5600_v17 }
0x2a65   :  { %v3993_v14 = vpop.f32.mrb[50].mxu1 }
0x2a66   :  { %v3997_v63 = vadd.f32 %v3993_v14, %v3756_v21  ;;  %v5268_v1 = vpop.f32.mrb[51].mxu1 }
0x2ac5   :  { %v4086_v2 = vpop.xlane.xlu1 %4085 }
0x2ac6   :  { %5509 = vrcp.f32 %v4086_v2 }
0x2ac9   :  { %v4242_v5 = vpop.permute.xlu1 %4241 }
0x2ad0   :  { %v5510_v3 = vpop.eup %5509 }
0x2ad1   :  { %v4088_v4 = vmul.f32 %v5510_v3, %v5508_v61  ;;  %v4624_v61 = vld [vmem:[#allocation5 + $0x60] sm:$0xff] }
0x2ad2   :  { %v5412_v14 = vpack.c.bf16 %v4625_v24, %v4624_v61 }
0x2ad3   :  { %5277 = vmatmul.mubr.msk.f32.vlgmr.msra.gmra.mrb[52].mxu1 %vm261_vm4, %v4088_v4 }
0x2ad4   :  { %5285 = vmatpush3.xpose.msk.msra.mxu1 %vm261_vm4, %v4242_v5  ;;  %5286 = vmatprep.mubr.msk.f32.mxu1 %vm5601_vm3, %v5600_v17 }
0x2ad5   :  { %5294 = vmatprep.subr.mxu1 %v5600_v17 }
0x2ad7   :  { %5287 = vmatmul.mubr.msk.f32.vlgmr.msra.gmra.mrb[54].mxu1 %vm261_vm4, %v4240_v7 }
0x2ad8   :  { %5296 = vmatprep.mubr.msk.f32.mxu1 %vm5601_vm3, %v5600_v17  ;;  %5295 = vmatpush3.msra.mxu1 %v4842_v20 }
0x2ad9   :  { %5405 = vmatprep.subr.bf16.mxu1 %v5616_v33 }
0x2ba6   :  { %v4161_v8 = vpop.f32.mrb[52].mxu1 }
0x2ba7   :  { %v5278_v9 = vpop.f32.mrb[53].mxu1  ;;  %5282 = vmatmul.mubr.msk.f32.vlgmr.msra.gmra.mrb[42].mxu0 %vm261_vm4, %v4161_v8  ;;  %v4879_v8 = vld [vmem:[%s6480_s9 + $0x1] ss:$0 sm:$0xff] }
0x2ba8   :  { %5291 = vmatprep.mubr.msk.f32.mxu0 %vm5601_vm3, %v5600_v17 }
0x2baa   :  { %v4313_v10 = vpop.f32.mrb[54].mxu1 }
0x2bab   :  { %v4317_v11 = vmul.f32 0.35355338, %v4313_v10  ;;  %v5288_v30 = vpop.f32.mrb[55].mxu1 }
0x2bad   :  { %v4318_v12 = vsel %vm109_vm12, %v4317_v11, %v6230_v46 }
0x2bae   :  { %v4319_v57 = vsel %vm261_vm4, %v4318_v12, -inf }
0x2baf   :  { %4320 = vmax.xlane.f32.xlu1 %v4319_v57  ;;  %v4627_v57 = vld [vmem:[#allocation5 + $0x78] sm:$0xff] }
0x2c3c   :  { %v4321_v13 = vpop.xlane.xlu1 %4320 }
0x2c3d   :  { %v4322_v15 = vsub.f32 %v4318_v12, %v4321_v13  ;;  %v4626_v12 = vld [vmem:[#allocation5 + $0x70] sm:$0xff] }
0x2c3e   :  { %v5415_v13 = vpack.c.bf16 %v4627_v57, %v4626_v12 }
0x2c3f   :  { %v4323_v16 = vmul.f32 1.442695, %v4322_v15  ;;  %v4882_v15 = vld [vmem:[%s6483_s12 + $0x1] ss:$0 sm:$0xff] }
0x2c41   :  { %5511 = vpow2.f32 %v4323_v16 }
0x2c4b   :  { %v5512_v18 = vpop.eup %5511 }
0x2c4c   :  { %v4325_v19 = vsel %vm261_vm4, %v5512_v18, 0.0 }
0x2c4d   :  { %4326 = vadd.xlane.f32.xlu0 %v4325_v19 }
0x2c63   :  { %4330 = vrot.lane.b32.xlu0 %v6204_v31, %s6512_s19 }
0x2c7a   :  { %v4234_v50 = vpop.f32.mrb[42].mxu0 }
0x2c7b   :  { %v4238_v46 = vadd.f32 %v4234_v50, %v3997_v63  ;;  %v5283_v22 = vpop.f32.mrb[43].mxu0 }
0x2cda   :  { %v4327_v23 = vpop.xlane.xlu0 %4326 }
0x2cdb   :  { %5513 = vrcp.f32 %v4327_v23 }
0x2cde   :  { %v4331_v26 = vpop.permute.xlu0 %4330 }
0x2cdf   :  { %5290 = vmatpush3.msra.mxu0 %v4331_v26 }
0x2ce0   :  { %5393 = vmatprep.subr.bf16.mxu0 %v5616_v33 }
0x2ce5   :  { %v5514_v28 = vpop.eup %5513 }
0x2ce6   :  { %v4329_v29 = vmul.f32 %v5514_v28, %v5512_v18 }
0x2ce8   :  { %5292 = vmatmul.mubr.msk.f32.vlgmr.msra.gmra.mrb[44].mxu0 %vm261_vm4, %v4329_v29 }
0x2ce9   :  { %5315 = vmatprep.mubr.msk.f32.mxu0 %vm5601_vm3, %v5600_v17  ;;  %5395 = vmatpush3.bf16.msra.mxu0 %v5394_v40 }
0x2cea   :  { %5396 = vmatprep.subr.bf16.mxu0 %v5616_v33 }
0x2dbb   :  { %v4402_v31 = vpop.f32.mrb[44].mxu0 }
0x2dbc   :  { %v5293_v41 = vpop.f32.mrb[45].mxu0  ;;  %5297 = vmatmul.mubr.msk.f32.vlgmr.msra.gmra.mrb[56].mxu1 %vm261_vm4, %v4402_v31 }
0x2dbd   :  { %5334 = vmatprep.mubr.msk.f32.mxu1 %vm5601_vm3, %v5600_v17  ;;  %5407 = vmatpush3.bf16.msra.mxu1 %v5406_v55 }
0x2dbe   :  { %5408 = vmatprep.subr.bf16.mxu1 %v5616_v33 }
0x2dc1   :  { %5410 = vmatpush3.bf16.msra.mxu1 %v5409_v59 }
0x2dc2   :  { %5411 = vmatprep.subr.bf16.mxu1 %v5616_v33 }
0x2dc5   :  { %5413 = vmatpush3.bf16.msra.mxu1 %v5412_v14 }
0x2dc6   :  { %5414 = vmatprep.subr.bf16.mxu1 %v5616_v33 }
0x2dc9   :  { %5416 = vmatpush3.bf16.msra.mxu1 %v5415_v13 }
0x2e8f   :  { %v4475_v48 = vpop.f32.mrb[56].mxu1 }
0x2e90   :  { %v4479_v47 = vadd.f32 %v4475_v48, %v4238_v46  ;;  %v5298_v54 = vpop.f32.mrb[57].mxu1  ;;  %v4886_v46 = vld [vmem:[%s6485_s14 + $0x1] ss:$0 sm:$0xff] }
0x2e92   :  { %v4480_v0 = vadd.f32 %v4479_v47, %v6125_v27  ;;  %v5397_v27 = vpack.c.bf16 %v4532_v60, %v4531_v58 }
0x2e94   :  { %v6423_v34 = vadd.f32 %v4876_v32, %v4480_v0  ;;  %5398 = vmatpush3.bf16.msra.mxu0 %v5397_v27 }
0x2e95   :  { %5399 = vmatprep.subr.bf16.mxu0 %v5616_v33 }
0x2e96   :  { %v4494_v35 = vsel %vm112_vm0, %v6423_v34, 0.0 }
0x2e97   :  { %4495 = vadd.xlane.f32.xlu1 %v4494_v35 }
0x2e98   :  { %5401 = vmatpush3.bf16.msra.mxu0 %v5400_v52 }
0x2e99   :  { %5402 = vmatprep.subr.bf16.mxu0 %v5616_v33  ;;  %v4880_v33 = vld [vmem:[%s6481_s10 + $0x1] ss:$0 sm:$0xff] }
0x2e9c   :  { %5404 = vmatpush3.bf16.msra.mxu0 %v5403_v45 }
0x2f24   :  { %v4496_v62 = vpop.xlane.xlu1 %4495 }
0x2f25   :  { %v4497_v21 = vmul.f32 0.015625, %v4496_v62 }
0x2f27   :  { %v4498_v36 = vsub.f32 %v6423_v34, %v4497_v21 }
0x2f29   :  { %v4499_v17 = vmul.f32 %v4498_v36, %v4498_v36  ;;  %v4519_v9 = vmul.f32 %v4879_v8, %v4498_v36 }
0x2f2b   :  { %v4500_v37 = vsel %vm112_vm0, %v4499_v17, 0.0  ;;  %v4887_v17 = vld [vmem:[%s6486_s15] ss:$0 sm:$0xff] }
0x2f2c   :  { %4501 = vadd.xlane.f32.xlu1 %v4500_v37 }
0x2fb9   :  { %v4502_v63 = vpop.xlane.xlu1 %4501 }
0x2fba   :  { %v4503_v1 = vmul.f32 0.015873017, %v4502_v63 }
0x2fbc   :  { %5515 = vrsqrt.f32 %v4503_v1  ;;  %vm4506_vm2 = vcmp.eq.f32.partialorder %v4503_v1, inf  ;;  %v4509_v4 = vand.u32 2147483648, %v4503_v1  ;;  %vm4508_vm3 = vcmp.eq.f32.partialorder %v4503_v1, 0.0 }
0x2fc6   :  { %v5516_v2 = vpop.eup %5515 }
0x2fc7   :  { %v4505_v3 = vmul.f32 %v5516_v2, %v4503_v1 }
0x2fc9   :  { %v4507_v5 = vsel %vm4506_vm2, %v4503_v1, %v4505_v3 }
0x2fca   :  { %v4510_v7 = vsel %vm4508_vm3, %v4509_v4, %v4507_v5 }
0x2fcb   :  { %v4511_v25 = vadd.f32 1000000.0, %v4510_v7 }
0x2fcd   :  { %5517 = vrcp.f32 %v4511_v25 }
0x2fd7   :  { %v5518_v10 = vpop.eup %5517 }
0x2fd8   :  { %v4520_v11 = vmul.f32 %v5518_v10, %v4519_v9 }
0x2fda   :  { %v4527_v30 = vadd.f32 %v4880_v33, %v4520_v11 }
0x2fdc   :  { %5316 = vmatmul.mubr.msk.f32.vlgmr.msra.gmra.mrb[46].mxu0 %vm112_vm0, %v4527_v30 }
0x30af   :  { %v4614_v16 = vpop.f32.mrb[46].mxu0 }
0x30b0   :  { %v4615_v18 = vadd.f32 %v4882_v15, %v4614_v16  ;;  %v5317_v19 = vpop.f32.mrb[47].mxu0 }
0x30b2   :  { %v4618_v20 = vmax.f32 %v4615_v18, 0.0 }
0x30b4   :  { %5335 = vmatmul.mubr.msk.f32.vlgmr.msra.gmra.mrb[58].mxu1 %vm112_vm0, %v4618_v20 }
0x3187   :  { %v4697_v50 = vpop.f32.mrb[58].mxu1 }
0x3188   :  { %v4701_v22 = vadd.f32 %v4697_v50, %v6423_v34  ;;  %v5336_v23 = vpop.f32.mrb[59].mxu1 }
0x318a   :  { %v4710_v26 = vadd.f32 %v4886_v46, %v4701_v22 }
0x318c   :  { %v4713_v28 = vsel %vm112_vm0, %v4710_v26, 0.0 }
0x318d   :  { %4714 = vadd.xlane.f32.xlu1 %v4713_v28 }
0x321a   :  { %v4715_v29 = vpop.xlane.xlu1 %4714 }
0x321b   :  { %v4716_v31 = vmul.f32 0.015625, %v4715_v29 }
0x321d   :  { %v4717_v41 = vsub.f32 %v4710_v26, %v4716_v31 }
0x321f   :  { %v4718_v48 = vmul.f32 %v4717_v41, %v4717_v41  ;;  %v4738_v37 = vmul.f32 %v4887_v17, %v4717_v41 }
0x3221   :  { %v4719_v47 = vsel %vm112_vm0, %v4718_v48, 0.0 }
0x3222   :  { %4720 = vadd.xlane.f32.xlu1 %v4719_v47 }
0x32af   :  { %v4721_v54 = vpop.xlane.xlu1 %4720 }
0x32b0   :  { %v4722_v32 = vmul.f32 0.015873017, %v4721_v54 }
0x32b2   :  { %5519 = vrsqrt.f32 %v4722_v32  ;;  %vm4725_vm4 = vcmp.eq.f32.partialorder %v4722_v32, inf  ;;  %v4728_v62 = vand.u32 2147483648, %v4722_v32  ;;  %vm4727_vm5 = vcmp.eq.f32.partialorder %v4722_v32, 0.0 }
0x32bc   :  { %v5520_v0 = vpop.eup %5519 }
0x32bd   :  { %v4724_v35 = vmul.f32 %v5520_v0, %v4722_v32 }
0x32bf   :  { %v4726_v34 = vsel %vm4725_vm4, %v4722_v32, %v4724_v35 }
0x32c0   :  { %v4729_v21 = vsel %vm4727_vm5, %v4728_v62, %v4726_v34 }
0x32c1   :  { %v4730_v36 = vadd.f32 1000000.0, %v4729_v21 }
0x32c3   :  { %5521 = vrcp.f32 %v4730_v36 }
0x32cd   :  { %v5522_v38 = vpop.eup %5521 }
0x32ce   :  { %v4739_v40 = vmul.f32 %v5522_v38, %v4738_v37 }
0x32d0   :  { %v4746_v58 = vadd.f32 %v4888_v39, %v4739_v40 }
0x32d2   :  { %4747 = vst.msk [vmem:[#allocation7] sm:$0xff] %vm112_vm0, %v4746_v58 }
0x32d3   :  { %5579 = shalt.err (!%p5576_p6)
}
0x32d4   :  { %s5580_s18 = scalar_lea.hbm %s6488_s17, 128 }
0x32d5   :  { %p5581_p7 = scmp.ne.s32.totalorder %s6488_s17, %s5580_s18  ;;  %p5584_p8 = scmp.lt.u32.totalorder %s5580_s18, %s6488_s17 }
0x32d7   :  { %p5586_p9 = pnand %p5584_p8, %p5581_p7 }
0x32d9   :  { %5589 = shalt.err (!%p5586_p9)
}
0x32da   :  { %4757 = dma.vmem_to_hbm [thread:$0]  %s4755_s28, 128, %s6488_s17, [#allocation4]  }
0x32db   :  { %5594 = dma.done.wait [#allocation4], 128  }
0x32dc   :  { %5595 = vsyncadd [#allocation4], 4294967168 }
0x32dd   :  { %4761 = vsyncpa [#allocation3], 1 }
0x32de   :  { %4762 = vsyncpa [#allocation6], 1 }
0x32df   :  { %4763 = vsyncpa [#allocation4], 1 }

</bundles_post_ra>
